<compile_context>
chip_gen: v7x
topology: tpu7x:2x2x1
jax: 0.10.0
libtpu: 0.0.40
codegen_flags: <defaults>
</compile_context>

<pallas_src>
import jax
import jax.numpy as jnp
from jax.experimental import pallas as pl
from jax.experimental.pallas import tpu as pltpu


def _round_up(n, m):
    return ((n + m - 1) // m) * m


def classifier_kernel(x_ref, we_ref, be_ref, w1_ref, b1_ref, w2_ref, b2_ref,
                      out_ref):
    # x_ref: (TM, 1024) bf16 tile of the flattened input.
    x = x_ref[...]

    # ---- synthetic autoencoder.encode: Linear(1024, 1024) + ReLU ----
    h = jnp.dot(x, we_ref[...], preferred_element_type=jnp.float32)
    h = jnp.maximum(h + be_ref[...], 0.0)

    # ---- fc1: Linear(1024, 512) + ReLU ----
    h = jnp.dot(h.astype(jnp.bfloat16), w1_ref[...],
                preferred_element_type=jnp.float32)
    h = jnp.maximum(h + b1_ref[...], 0.0)

    # ---- fc2: Linear(512, num_classes) padded to 128 lanes ----
    o = jnp.dot(h.astype(jnp.bfloat16), w2_ref[...],
                preferred_element_type=jnp.float32)
    out_ref[...] = (o + b2_ref[...]).astype(out_ref.dtype)


def classifier_forward(x_nchw, params, num_classes, *, tm=128):
    """x_nchw: (B, C, H, W) with C*H*W == 1024. Returns (B, num_classes) f32."""
    we, be, w1, b1, w2p, b2p = params
    B = x_nchw.shape[0]
    x_flat = x_nchw.reshape(B, -1).astype(jnp.bfloat16)  # torch.flatten(x, 1)
    assert x_flat.shape[1] == 1024, "encoder expects flattened dim 1024"

    NP = w2p.shape[1]  # padded class dim (multiple of 128)

    # Pick a batch tile: full 128-row MXU tiles when batch allows, otherwise the
    # smallest sublane-aligned tile that covers the batch.
    TM = min(tm, _round_up(B, 8))
    Bp = _round_up(B, TM)
    if Bp != B:
        x_flat = jnp.pad(x_flat, ((0, Bp - B), (0, 0)))

    grid = (Bp // TM,)

    out = pl.pallas_call(
        classifier_kernel,
        out_shape=jax.ShapeDtypeStruct((Bp, NP), jnp.float32),
        grid=grid,
        in_specs=[
            pl.BlockSpec((TM, 1024), lambda i: (i, 0)),    # x tile (pipelined)
            pl.BlockSpec((1024, 1024), lambda i: (0, 0)),  # We (resident)
            pl.BlockSpec((1, 1024), lambda i: (0, 0)),     # be
            pl.BlockSpec((1024, 512), lambda i: (0, 0)),   # W1 (resident)
            pl.BlockSpec((1, 512), lambda i: (0, 0)),      # b1
            pl.BlockSpec((512, NP), lambda i: (0, 0)),     # W2 padded (resident)
            pl.BlockSpec((1, NP), lambda i: (0, 0)),       # b2 padded
        ],
        out_specs=pl.BlockSpec((TM, NP), lambda i: (i, 0)),
        compiler_params=pltpu.CompilerParams(
            dimension_semantics=("parallel",),  # v7x: shard batch across 2 TCs
            vmem_limit_bytes=24 << 20,
        ),
    )(x_flat, we, be, w1, b1, w2p, b2p)

    return out[:B, :num_classes]


def init_params(key, num_classes=10):
    k = jax.random.split(key, 6)
    # encoder (synthetic stand-in): 1024 -> 1024
    we = (jax.random.normal(k[0], (1024, 1024), jnp.float32)
          * (1.0 / jnp.sqrt(1024.0)))
    be = jax.random.normal(k[1], (1, 1024), jnp.float32) * 0.01
    # fc1: 1024 -> 512
    w1 = (jax.random.normal(k[2], (1024, 512), jnp.float32)
          * (1.0 / jnp.sqrt(1024.0)))
    b1 = jax.random.normal(k[3], (1, 512), jnp.float32) * 0.01
    # fc2: 512 -> num_classes, zero-padded to 128 output lanes (lane-dense store)
    NP = _round_up(num_classes, 128)
    w2 = (jax.random.normal(k[4], (512, num_classes), jnp.float32)
          * (1.0 / jnp.sqrt(512.0)))
    b2 = jax.random.normal(k[5], (1, num_classes), jnp.float32) * 0.01
    w2p = jnp.zeros((512, NP), jnp.float32).at[:, :num_classes].set(w2)
    b2p = jnp.zeros((1, NP), jnp.float32).at[:, :num_classes].set(b2)

    # Weights in bf16 (MXU-native, halves HBM weight traffic); biases stay f32
    # since they add onto f32 accumulators.
    return (we.astype(jnp.bfloat16), be,
            w1.astype(jnp.bfloat16), b1,
            w2p.astype(jnp.bfloat16), b2p)


def reference_forward(x_nchw, params, num_classes):
    """Pure-JAX reference using the same mixed precision as the kernel."""
    we, be, w1, b1, w2p, b2p = params
    x = x_nchw.reshape(x_nchw.shape[0], -1).astype(jnp.bfloat16)
    h = jnp.dot(x, we, preferred_element_type=jnp.float32)
    h = jnp.maximum(h + be, 0.0)
    h = jnp.dot(h.astype(jnp.bfloat16), w1, preferred_element_type=jnp.float32)
    h = jnp.maximum(h + b1, 0.0)
    o = jnp.dot(h.astype(jnp.bfloat16), w2p, preferred_element_type=jnp.float32)
    o = o + b2p
    return o[:, :num_classes]


if __name__ == "__main__":
    key = jax.random.PRNGKey(0)
    kx, kp = jax.random.split(key)

    # Small deterministic input: B=2, C=4, H=W=16 -> flatten = 1024 (fc1 in_features)
    num_classes = 10
    x = jax.random.normal(kx, (2, 4, 16, 16), jnp.float32)
    params = init_params(kp, num_classes=num_classes)

    out = classifier_forward(x, params, num_classes)
    out = jax.block_until_ready(out)

    ref = reference_forward(x, params, num_classes)
    assert out.shape == (2, num_classes)
    assert jnp.allclose(out, ref, atol=2e-2, rtol=2e-2), "mismatch vs JAX reference"

    print("KERNEL_OK")
</pallas_src>

<mosaic_0001>
module attributes {stable_mosaic.version = 11 : i64} {
  func.func @classifier_kernel(%arg0: i32, %arg1: memref<8x1024xbf16, #tpu.memory_space<vmem>>, %arg2: memref<1024x1024xbf16, #tpu.memory_space<vmem>>, %arg3: memref<1x1024xf32, #tpu.memory_space<vmem>>, %arg4: memref<1024x512xbf16, #tpu.memory_space<vmem>>, %arg5: memref<1x512xf32, #tpu.memory_space<vmem>>, %arg6: memref<512x128xbf16, #tpu.memory_space<vmem>>, %arg7: memref<1x128xf32, #tpu.memory_space<vmem>>, %arg8: memref<8x128xf32, #tpu.memory_space<vmem>>) attributes {dimension_semantics = [#tpu.dimension_semantics<parallel>], iteration_bounds = array<i64: 1>, scalar_prefetch = 0 : i64, scratch_operands = 0 : i64, tpu.core_type = #tpu.core_type<tc>, window_params = [{transform_indices = @transform_0, window_bounds = array<i64: 8, 1024>}, {pipeline_mode = #tpu.pipeline_mode<synchronous>, transform_indices = @transform_1, window_bounds = array<i64: 1024, 1024>}, {pipeline_mode = #tpu.pipeline_mode<synchronous>, transform_indices = @transform_2, window_bounds = array<i64: 1, 1024>}, {pipeline_mode = #tpu.pipeline_mode<synchronous>, transform_indices = @transform_3, window_bounds = array<i64: 1024, 512>}, {pipeline_mode = #tpu.pipeline_mode<synchronous>, transform_indices = @transform_4, window_bounds = array<i64: 1, 512>}, {pipeline_mode = #tpu.pipeline_mode<synchronous>, transform_indices = @transform_5, window_bounds = array<i64: 512, 128>}, {pipeline_mode = #tpu.pipeline_mode<synchronous>, transform_indices = @transform_6, window_bounds = array<i64: 1, 128>}, {transform_indices = @transform_7, window_bounds = array<i64: 8, 128>}]} {
    %c0 = arith.constant 0 : index
    %c0_0 = arith.constant 0 : index
    %0 = vector.load %arg1[%c0, %c0_0] : memref<8x1024xbf16, #tpu.memory_space<vmem>>, vector<8x1024xbf16>
    %c0_1 = arith.constant 0 : index
    %c0_2 = arith.constant 0 : index
    %1 = vector.load %arg2[%c0_1, %c0_2] : memref<1024x1024xbf16, #tpu.memory_space<vmem>>, vector<1024x1024xbf16>
    %cst = arith.constant dense<0.000000e+00> : vector<8x1024xf32>
    %2 = tpu.matmul %0, %1, %cst {dimension_numbers = #tpu.dot_dimension_numbers<[1], [0], [0], [1], [0, 0, 1, 1], [], []>} : vector<8x1024xbf16>, vector<1024x1024xbf16>, vector<8x1024xf32> -> vector<8x1024xf32>
    %c0_3 = arith.constant 0 : index
    %c0_4 = arith.constant 0 : index
    %3 = vector.load %arg3[%c0_3, %c0_4] : memref<1x1024xf32, #tpu.memory_space<vmem>>, vector<1x1024xf32>
    %4 = vector.broadcast %3 : vector<1x1024xf32> to vector<8x1024xf32>
    %5 = arith.addf %2, %4 : vector<8x1024xf32>
    %cst_5 = arith.constant 0.000000e+00 : f32
    %6 = vector.broadcast %cst_5 : f32 to vector<8x1024xf32>
    %7 = arith.maximumf %5, %6 : vector<8x1024xf32>
    %8 = arith.truncf %7 : vector<8x1024xf32> to vector<8x1024xbf16>
    %c0_6 = arith.constant 0 : index
    %c0_7 = arith.constant 0 : index
    %9 = vector.load %arg4[%c0_6, %c0_7] : memref<1024x512xbf16, #tpu.memory_space<vmem>>, vector<1024x512xbf16>
    %cst_8 = arith.constant dense<0.000000e+00> : vector<8x512xf32>
    %10 = tpu.matmul %8, %9, %cst_8 {dimension_numbers = #tpu.dot_dimension_numbers<[1], [0], [0], [1], [0, 0, 1, 1], [], []>} : vector<8x1024xbf16>, vector<1024x512xbf16>, vector<8x512xf32> -> vector<8x512xf32>
    %c0_9 = arith.constant 0 : index
    %c0_10 = arith.constant 0 : index
    %11 = vector.load %arg5[%c0_9, %c0_10] : memref<1x512xf32, #tpu.memory_space<vmem>>, vector<1x512xf32>
    %12 = vector.broadcast %11 : vector<1x512xf32> to vector<8x512xf32>
    %13 = arith.addf %10, %12 : vector<8x512xf32>
    %cst_11 = arith.constant 0.000000e+00 : f32
    %14 = vector.broadcast %cst_11 : f32 to vector<8x512xf32>
    %15 = arith.maximumf %13, %14 : vector<8x512xf32>
    %16 = arith.truncf %15 : vector<8x512xf32> to vector<8x512xbf16>
    %c0_12 = arith.constant 0 : index
    %c0_13 = arith.constant 0 : index
    %17 = vector.load %arg6[%c0_12, %c0_13] : memref<512x128xbf16, #tpu.memory_space<vmem>>, vector<512x128xbf16>
    %cst_14 = arith.constant dense<0.000000e+00> : vector<8x128xf32>
    %18 = tpu.matmul %16, %17, %cst_14 {dimension_numbers = #tpu.dot_dimension_numbers<[1], [0], [0], [1], [0, 0, 1, 1], [], []>} : vector<8x512xbf16>, vector<512x128xbf16>, vector<8x128xf32> -> vector<8x128xf32>
    %c0_15 = arith.constant 0 : index
    %c0_16 = arith.constant 0 : index
    %19 = vector.load %arg7[%c0_15, %c0_16] : memref<1x128xf32, #tpu.memory_space<vmem>>, vector<1x128xf32>
    %20 = vector.broadcast %19 : vector<1x128xf32> to vector<8x128xf32>
    %21 = arith.addf %18, %20 : vector<8x128xf32>
    %c0_17 = arith.constant 0 : index
    %c0_18 = arith.constant 0 : index
    %22 = vector.load %arg8[%c0_17, %c0_18] : memref<8x128xf32, #tpu.memory_space<vmem>>, vector<8x128xf32>
    tpu.vector_store %arg8[%c0_17, %c0_18], %21 {strides = array<i32>} : memref<8x128xf32, #tpu.memory_space<vmem>>, vector<8x128xf32>,
    return
  }
  func.func @transform_0(%arg0: i32) -> (i32, i32) {
    %c0_i32 = arith.constant 0 : i32
    %c0_i32_0 = arith.constant 0 : i32
    return %arg0, %c0_i32 : i32, i32
  }
  func.func @transform_1(%arg0: i32) -> (i32, i32) {
    %c0_i32 = arith.constant 0 : i32
    %c0_i32_0 = arith.constant 0 : i32
    %c0_i32_1 = arith.constant 0 : i32
    return %c0_i32, %c0_i32_0 : i32, i32
  }
  func.func @transform_2(%arg0: i32) -> (i32, i32) {
    %c0_i32 = arith.constant 0 : i32
    %c0_i32_0 = arith.constant 0 : i32
    %c0_i32_1 = arith.constant 0 : i32
    return %c0_i32, %c0_i32_0 : i32, i32
  }
  func.func @transform_3(%arg0: i32) -> (i32, i32) {
    %c0_i32 = arith.constant 0 : i32
    %c0_i32_0 = arith.constant 0 : i32
    %c0_i32_1 = arith.constant 0 : i32
    return %c0_i32, %c0_i32_0 : i32, i32
  }
  func.func @transform_4(%arg0: i32) -> (i32, i32) {
    %c0_i32 = arith.constant 0 : i32
    %c0_i32_0 = arith.constant 0 : i32
    %c0_i32_1 = arith.constant 0 : i32
    return %c0_i32, %c0_i32_0 : i32, i32
  }
  func.func @transform_5(%arg0: i32) -> (i32, i32) {
    %c0_i32 = arith.constant 0 : i32
    %c0_i32_0 = arith.constant 0 : i32
    %c0_i32_1 = arith.constant 0 : i32
    return %c0_i32, %c0_i32_0 : i32, i32
  }
  func.func @transform_6(%arg0: i32) -> (i32, i32) {
    %c0_i32 = arith.constant 0 : i32
    %c0_i32_0 = arith.constant 0 : i32
    %c0_i32_1 = arith.constant 0 : i32
    return %c0_i32, %c0_i32_0 : i32, i32
  }
  func.func @transform_7(%arg0: i32) -> (i32, i32) {
    %c0_i32 = arith.constant 0 : i32
    %c0_i32_0 = arith.constant 0 : i32
    return %arg0, %c0_i32 : i32, i32
  }
}

</mosaic_0001>

<bundles_post_ra>
// kernel: tpu_custom_call.1
= control target key start
LH: loop header
LB: loop body
LE: loop exit
PB: predicated region body
PF: predicated region fallthrough
CT: control target
= control target key end

     0   :  { %12 = vsyncpa [#allocation3], 0  ;;  %s8023_s0 = inlined_call_operand.hbm [shape: bf16[8,1024], index: 0, kind: input, shape index: {}]   ;;  %s8024_s1 = inlined_call_operand.hbm [shape: bf16[1024,1024], index: 1, kind: input, shape index: {}]   ;;  %s8025_s2 = inlined_call_operand.hbm [shape: f32[1,1024], index: 2, kind: input, shape index: {}]   ;;  %s8026_s3 = inlined_call_operand.hbm [shape: bf16[1024,512], index: 3, kind: input, shape index: {}]   ;;  %s8027_s4 = inlined_call_operand.hbm [shape: f32[1,512], index: 4, kind: input, shape index: {}]   ;;  %s8028_s5 = inlined_call_operand.hbm [shape: bf16[512,128], index: 5, kind: input, shape index: {}]   ;;  %s8029_s6 = inlined_call_operand.hbm [shape: f32[1,128], index: 6, kind: input, shape index: {}]   ;;  %s8030_s7 = inlined_call_operand.hbm [shape: f32[8,128], index: 7, kind: output, shape index: {}]  }
   0x1   :  { %13 = vsyncpa [#allocation6], 0 }
   0x2   :  { %14 = vsyncpa [#allocation9], 0 }
   0x3   :  { %15 = vsyncpa [#allocation12], 0 }
   0x4   :  { %16 = vsyncpa [#allocation4], 0  ;;  %s7751_s24 = smov [#allocation5]   ;;  %s7565_s28 = scalar_lea.hbm %s8024_s1, 65536 }
   0x5   :  { %s32_s25 = sshll.u32 %s7751_s24, 4  ;;  %p7566_p0 = scmp.ne.s32.totalorder %s8024_s1, %s7565_s28  ;;  %s33_s25 = int_to_ptr.vmem [resolvable:$true] %s32_s25 }
   0x6   :  { %p7569_p1 = scmp.lt.u32.totalorder %s7565_s28, %s8024_s1 }
   0x8   :  { %p7571_p2 = pnand %p7569_p1, %p7566_p0 }
   0xa   :  { %7574 = shalt.err (!%p7571_p2)
}
   0xb   :  { %s7575_s10 = scalar_lea.vmem %s33_s25, 65536  ;;  %p7580_p4 = scmp.lt.s32.totalorder %s33_s25, %s33_s25 }
   0xc   :  { %p7576_p3 = scmp.ne.s32.totalorder %s33_s25, %s7575_s10  ;;  %p7581_p5 = scmp.lt.s32.totalorder %s7575_s10, %s7575_s10 }
   0xe   :  { %p7582_p6 = por %p7581_p5, %p7580_p4 }
  0x10   :  { %p7583_p7 = pnand %p7582_p6, %p7576_p3 }
  0x12   :  { %7586 = shalt.err (!%p7583_p7)
}
  0x13   :  { %s7752_s11 = smov 512   ;;  %s7753_s12 = smov 32  }
  0x14   :  { %38 = dma.hbm_to_vmem [thread:$0]  %s8024_s1, 65536, %s33_s25, [#allocation6], %s7752_s11, %s7752_s11, %s7753_s12  }
  0x15   :  { %s7754_s15 = smov [#allocation8]   ;;  %s7587_s19 = scalar_lea.hbm %s8026_s3, 32768 }
  0x16   :  { %s54_s16 = sshll.u32 %s7754_s15, 4  ;;  %p7588_p8 = scmp.ne.s32.totalorder %s8026_s3, %s7587_s19  ;;  %s55_s16 = int_to_ptr.vmem [resolvable:$true] %s54_s16 }
  0x17   :  { %p7591_p9 = scmp.lt.u32.totalorder %s7587_s19, %s8026_s3 }
  0x19   :  { %p7593_p10 = pnand %p7591_p9, %p7588_p8 }
  0x1b   :  { %7596 = shalt.err (!%p7593_p10)
}
  0x1c   :  { %s7597_s24 = scalar_lea.vmem %s55_s16, 32768  ;;  %p7602_p12 = scmp.lt.s32.totalorder %s55_s16, %s55_s16 }
  0x1d   :  { %p7598_p11 = scmp.ne.s32.totalorder %s55_s16, %s7597_s24  ;;  %p7603_p13 = scmp.lt.s32.totalorder %s7597_s24, %s7597_s24 }
  0x1f   :  { %p7604_p0 = por %p7603_p13, %p7602_p12 }
  0x21   :  { %p7605_p1 = pnand %p7604_p0, %p7598_p11 }
  0x23   :  { %7608 = shalt.err (!%p7605_p1)
}
  0x24   :  { %s7755_s1 = smov 256   ;;  %s7756_s25 = smov 16  }
  0x25   :  { %60 = dma.hbm_to_vmem [thread:$0]  %s8026_s3, 32768, %s55_s16, [#allocation9], %s7755_s1, %s7755_s1, %s7756_s25  }
  0x26   :  { %s7757_s28 = smov [#allocation11]   ;;  %s7609_s9 = scalar_lea.hbm %s8028_s5, 4096 }
  0x27   :  { %s76_s29 = sshll.u32 %s7757_s28, 4  ;;  %p7610_p2 = scmp.ne.s32.totalorder %s8028_s5, %s7609_s9  ;;  %s77_s29 = int_to_ptr.vmem [resolvable:$true] %s76_s29 }
  0x28   :  { %p7613_p3 = scmp.lt.u32.totalorder %s7609_s9, %s8028_s5 }
  0x2a   :  { %p7615_p4 = pnand %p7613_p3, %p7610_p2 }
  0x2c   :  { %7618 = shalt.err (!%p7615_p4)
}
  0x2d   :  { %s7619_s14 = scalar_lea.vmem %s77_s29, 4096  ;;  %p7624_p6 = scmp.lt.s32.totalorder %s77_s29, %s77_s29 }
  0x2e   :  { %p7620_p5 = scmp.ne.s32.totalorder %s77_s29, %s7619_s14  ;;  %p7625_p7 = scmp.lt.s32.totalorder %s7619_s14, %s7619_s14 }
  0x30   :  { %p7626_p8 = por %p7625_p7, %p7624_p6 }
  0x32   :  { %p7627_p9 = pnand %p7626_p8, %p7620_p5 }
  0x34   :  { %7630 = shalt.err (!%p7627_p9)
}
  0x35   :  { %s7758_s3 = smov 64   ;;  %s7759_s15 = smov 4  }
  0x36   :  { %82 = dma.hbm_to_vmem [thread:$0]  %s8028_s5, 4096, %s77_s29, [#allocation12], %s7758_s3, %s7758_s3, %s7759_s15  }
  0x37   :  { %s7760_s18 = smov [#allocation2]   ;;  %s7761_s20 = smov [#allocation7]  }
  0x38   :  { %s23_s19 = sshll.u32 %s7760_s18, 4  ;;  %s45_s21 = sshll.u32 %s7761_s20, 4  ;;  %s24_s19 = int_to_ptr.vmem [resolvable:$true] %s23_s19  ;;  %s46_s21 = int_to_ptr.vmem [resolvable:$true] %s45_s21 }
  0x39   :  { %s7631_s24 = scalar_lea.hbm %s8023_s0, 512 }
  0x3a   :  { %p7632_p10 = scmp.ne.s32.totalorder %s8023_s0, %s7631_s24  ;;  %p7635_p11 = scmp.lt.u32.totalorder %s7631_s24, %s8023_s0 }
  0x3c   :  { %p7637_p12 = pnand %p7635_p11, %p7632_p10 }
  0x3e   :  { %7640 = shalt.err (!%p7637_p12)
}
  0x3f   :  { %s7641_s5 = scalar_lea.vmem %s24_s19, 512  ;;  %p7646_p0 = scmp.lt.s32.totalorder %s24_s19, %s24_s19 }
  0x40   :  { %p7642_p13 = scmp.ne.s32.totalorder %s24_s19, %s7641_s5  ;;  %p7647_p1 = scmp.lt.s32.totalorder %s7641_s5, %s7641_s5 }
  0x42   :  { %p7648_p2 = por %p7647_p1, %p7646_p0 }
  0x44   :  { %p7649_p3 = pnand %p7648_p2, %p7642_p13 }
  0x46   :  { %7652 = shalt.err (!%p7649_p3)
}
  0x47   :  { %26 = dma.hbm_to_vmem [thread:$0]  %s8023_s0, 512, %s24_s19, [#allocation3]  }
  0x48   :  { %s7653_s9 = scalar_lea.hbm %s8025_s2, 128 }
  0x49   :  { %p7654_p4 = scmp.ne.s32.totalorder %s8025_s2, %s7653_s9  ;;  %p7657_p5 = scmp.lt.u32.totalorder %s7653_s9, %s8025_s2 }
  0x4b   :  { %p7659_p6 = pnand %p7657_p5, %p7654_p4 }
  0x4d   :  { %7662 = shalt.err (!%p7659_p6)
}
  0x4e   :  { %s7663_s14 = scalar_lea.vmem %s46_s21, 128  ;;  %p7668_p8 = scmp.lt.s32.totalorder %s46_s21, %s46_s21 }
  0x4f   :  { %p7664_p7 = scmp.ne.s32.totalorder %s46_s21, %s7663_s14  ;;  %p7669_p9 = scmp.lt.s32.totalorder %s7663_s14, %s7663_s14 }
  0x51   :  { %p7670_p10 = por %p7669_p9, %p7668_p8 }
  0x53   :  { %p7671_p11 = pnand %p7670_p10, %p7664_p7 }
  0x55   :  { %7674 = shalt.err (!%p7671_p11)
}
  0x56   :  { %48 = dma.hbm_to_vmem [thread:$0]  %s8025_s2, 128, %s46_s21, [#allocation6]  }
  0x57   :  { %s7762_s15 = smov [#allocation10]   ;;  %s7763_s17 = smov [#allocation13]  }
  0x58   :  { %s67_s16 = sshll.u32 %s7762_s15, 4  ;;  %s89_s18 = sshll.u32 %s7763_s17, 4  ;;  %s68_s16 = int_to_ptr.vmem [resolvable:$true] %s67_s16  ;;  %s90_s18 = int_to_ptr.vmem [resolvable:$true] %s89_s18 }
  0x59   :  { %s7675_s22 = scalar_lea.hbm %s8027_s4, 64 }
  0x5a   :  { %p7676_p12 = scmp.ne.s32.totalorder %s8027_s4, %s7675_s22  ;;  %p7679_p13 = scmp.lt.u32.totalorder %s7675_s22, %s8027_s4 }
  0x5c   :  { %p7681_p0 = pnand %p7679_p13, %p7676_p12 }
  0x5e   :  { %7684 = shalt.err (!%p7681_p0)
}
  0x5f   :  { %s7685_s2 = scalar_lea.vmem %s68_s16, 64  ;;  %p7690_p2 = scmp.lt.s32.totalorder %s68_s16, %s68_s16 }
  0x60   :  { %p7686_p1 = scmp.ne.s32.totalorder %s68_s16, %s7685_s2  ;;  %p7691_p3 = scmp.lt.s32.totalorder %s7685_s2, %s7685_s2 }
  0x62   :  { %p7692_p4 = por %p7691_p3, %p7690_p2 }
  0x64   :  { %p7693_p5 = pnand %p7692_p4, %p7686_p1 }
  0x66   :  { %7696 = shalt.err (!%p7693_p5)
}
  0x67   :  { %70 = dma.hbm_to_vmem [thread:$0]  %s8027_s4, 64, %s68_s16, [#allocation9]  }
  0x68   :  { %s7697_s28 = scalar_lea.hbm %s8029_s6, 16 }
  0x69   :  { %p7698_p6 = scmp.ne.s32.totalorder %s8029_s6, %s7697_s28  ;;  %p7701_p7 = scmp.lt.u32.totalorder %s7697_s28, %s8029_s6 }
  0x6b   :  { %p7703_p8 = pnand %p7701_p7, %p7698_p6 }
  0x6d   :  { %7706 = shalt.err (!%p7703_p8)
}
  0x6e   :  { %s7707_s10 = scalar_lea.vmem %s90_s18, 16  ;;  %s7711_s11 = scalar_lea.vmem %s90_s18, 32 }
  0x6f   :  { %p7708_p9 = scmp.ne.s32.totalorder %s90_s18, %s7707_s10  ;;  %p7712_p10 = scmp.lt.s32.totalorder %s90_s18, %s90_s18 }
  0x70   :  { %p7713_p11 = scmp.lt.s32.totalorder %s7711_s11, %s7707_s10 }
  0x72   :  { %p7714_p12 = por %p7713_p11, %p7712_p10 }
  0x74   :  { %p7715_p13 = pnand %p7714_p12, %p7708_p9 }
  0x76   :  { %7718 = shalt.err (!%p7715_p13)
}
  0x77   :  { %92 = dma.hbm_to_vmem [thread:$0]  %s8029_s6, 16, %s90_s18, [#allocation12]  }
  0x78   :  { %7741 = dma.done.wait [#allocation3], 512  }
  0x79   :  { %7742 = vsyncadd [#allocation3], 4294966784 }
  0x7a   :  { %7743 = dma.done.wait [#allocation6], 65664  }
  0x7b   :  { %7744 = vsyncadd [#allocation6], 4294901632 }
  0x7c   :  { %7745 = dma.done.wait [#allocation9], 32832  }
  0x7d   :  { %7746 = vsyncadd [#allocation9], 4294934464 }
  0x7e   :  { %7747 = dma.done.wait [#allocation12], 4112  }
  0x7f   :  { %7748 = vsyncadd [#allocation12], 4294963184  ;;  %v119_v0 = vld [vmem:[#allocation5] sm:$0xff]  ;;  %v120_v2 = vld [vmem:[#allocation5 + $0x8] sm:$0xff]  ;;  %s7764_s6 = smov [#allocation14]  }
  0x80   :  { %v123_v1 = vld [vmem:[#allocation5 + $0x20] sm:$0xff]  ;;  %v124_v4 = vld [vmem:[#allocation5 + $0x28] sm:$0xff]  ;;  %s6177_s13 = sshll.u32 %s7764_s6, 4  ;;  %s6178_s13 = int_to_ptr.vmem [resolvable:$true] %s6177_s13 }
  0x81   :  { %v6198_v3 = vcombine.high %v119_v0, %v123_v1  ;;  %v6197_v5 = vcombine.low %v119_v0, %v123_v1  ;;  %v127_v6 = vld [vmem:[#allocation5 + $0x40] sm:$0xff]  ;;  %v6200_v8 = vcombine.high %v120_v2, %v124_v4  ;;  %v6199_v9 = vcombine.low %v120_v2, %v124_v4  ;;  %v128_v11 = vld [vmem:[#allocation5 + $0x48] sm:$0xff]  ;;  %s7719_s14 = scalar_lea.vmem %s6178_s13, 128  ;;  %p7724_p1 = scmp.lt.s32.totalorder %s6178_s13, %s6178_s13 }
  0x82   :  { %v131_v7 = vld [vmem:[#allocation5 + $0x60] sm:$0xff]  ;;  %v132_v12 = vld [vmem:[#allocation5 + $0x68] sm:$0xff]  ;;  %p7720_p0 = scmp.ne.s32.totalorder %s6178_s13, %s7719_s14  ;;  %p7725_p2 = scmp.lt.s32.totalorder %s7719_s14, %s7719_s14 }
  0x83   :  { %v6206_v10 = vcombine.high %v127_v6, %v131_v7  ;;  %v135_v13 = vld [vmem:[#allocation5 + $0x80] sm:$0xff]  ;;  %3261 = vmatprep.subr.bf16.mxu0 %v6198_v3  ;;  %v6208_v14 = vcombine.high %v128_v11, %v132_v12  ;;  %v136_v16 = vld [vmem:[#allocation5 + $0x88] sm:$0xff]  ;;  %3425 = vmatprep.subr.bf16.mxu1 %v6200_v8  ;;  %v6205_v18 = vcombine.low %v127_v6, %v131_v7 }
  0x84   :  { %v139_v15 = vld [vmem:[#allocation5 + $0xa0] sm:$0xff]  ;;  %v140_v17 = vld [vmem:[#allocation5 + $0xa8] sm:$0xff]  ;;  %3262 = vmatpush1.bf16.msra.mxu0 %v6197_v5  ;;  %3426 = vmatpush1.bf16.msra.mxu1 %v6199_v9  ;;  %v6207_v19 = vcombine.low %v128_v11, %v132_v12  ;;  %p7726_p3 = por %p7725_p2, %p7724_p1 }
  0x85   :  { %3263 = vmatprep.subr.bf16.mxu0 %v6206_v10  ;;  %v6214_v20 = vcombine.high %v135_v13, %v139_v15  ;;  %3427 = vmatprep.subr.bf16.mxu1 %v6208_v14  ;;  %v6216_v21 = vcombine.high %v136_v16, %v140_v17  ;;  %v143_v22 = vld [vmem:[#allocation5 + $0xc0] sm:$0xff]  ;;  %v144_v24 = vld [vmem:[#allocation5 + $0xc8] sm:$0xff]  ;;  %v6213_v26 = vcombine.low %v135_v13, %v139_v15 }
  0x86   :  { %v147_v23 = vld [vmem:[#allocation5 + $0xe0] sm:$0xff]  ;;  %v148_v25 = vld [vmem:[#allocation5 + $0xe8] sm:$0xff]  ;;  %v6215_v27 = vcombine.low %v136_v16, %v140_v17  ;;  %p7727_p4 = pnand %p7726_p3, %p7720_p0 }
  0x87   :  { %v6222_v28 = vcombine.high %v143_v22, %v147_v23  ;;  %v6224_v29 = vcombine.high %v144_v24, %v148_v25  ;;  %v151_v30 = vld [vmem:[#allocation5 + $0x100] sm:$0xff]  ;;  %v152_v32 = vld [vmem:[#allocation5 + $0x108] sm:$0xff]  ;;  %v6221_v34 = vcombine.low %v143_v22, %v147_v23  ;;  %v6223_v35 = vcombine.low %v144_v24, %v148_v25 }
  0x88   :  { %3264 = vmatpush1.bf16.msra.mxu0 %v6205_v18  ;;  %3428 = vmatpush1.bf16.msra.mxu1 %v6207_v19  ;;  %v155_v31 = vld [vmem:[#allocation5 + $0x120] sm:$0xff]  ;;  %v156_v33 = vld [vmem:[#allocation5 + $0x128] sm:$0xff] }
  0x89   :  { %3265 = vmatprep.subr.bf16.mxu0 %v6214_v20  ;;  %3429 = vmatprep.subr.bf16.mxu1 %v6216_v21  ;;  %v6230_v36 = vcombine.high %v151_v30, %v155_v31  ;;  %v6232_v37 = vcombine.high %v152_v32, %v156_v33  ;;  %v159_v38 = vld [vmem:[#allocation5 + $0x140] sm:$0xff]  ;;  %v160_v40 = vld [vmem:[#allocation5 + $0x148] sm:$0xff]  ;;  %v6229_v42 = vcombine.low %v151_v30, %v155_v31 }
  0x8a   :  { %v163_v39 = vld [vmem:[#allocation5 + $0x160] sm:$0xff]  ;;  %v164_v41 = vld [vmem:[#allocation5 + $0x168] sm:$0xff]  ;;  %v6231_v43 = vcombine.low %v152_v32, %v156_v33 }
  0x8b   :  { %v6238_v44 = vcombine.high %v159_v38, %v163_v39  ;;  %v6240_v45 = vcombine.high %v160_v40, %v164_v41  ;;  %v167_v46 = vld [vmem:[#allocation5 + $0x180] sm:$0xff]  ;;  %v168_v48 = vld [vmem:[#allocation5 + $0x188] sm:$0xff]  ;;  %v6237_v50 = vcombine.low %v159_v38, %v163_v39  ;;  %v6239_v51 = vcombine.low %v160_v40, %v164_v41 }
  0x8c   :  { %3266 = vmatpush1.bf16.msra.mxu0 %v6213_v26  ;;  %3430 = vmatpush1.bf16.msra.mxu1 %v6215_v27  ;;  %v171_v47 = vld [vmem:[#allocation5 + $0x1a0] sm:$0xff]  ;;  %v172_v49 = vld [vmem:[#allocation5 + $0x1a8] sm:$0xff] }
  0x8d   :  { %3267 = vmatprep.subr.bf16.mxu0 %v6222_v28  ;;  %3431 = vmatprep.subr.bf16.mxu1 %v6224_v29  ;;  %v6246_v52 = vcombine.high %v167_v46, %v171_v47  ;;  %v7889_v53 = vld [vmem:[#allocation2] sm:$0xff]  ;;  %v6248_v54 = vcombine.high %v168_v48, %v172_v49  ;;  %v176_v58 = vld [vmem:[#allocation5 + $0x1c8] sm:$0xff]  ;;  %v6245_v60 = vcombine.low %v167_v46, %v171_v47 }
  0x8e   :  { %v175_v55 = vld [vmem:[#allocation5 + $0x1c0] sm:$0xff]  ;;  %v7893_v57 = vcombine.high %v7889_v53, %v7889_v53  ;;  %v180_v59 = vld [vmem:[#allocation5 + $0x1e8] sm:$0xff]  ;;  %v6247_v61 = vcombine.low %v168_v48, %v172_v49 }
  0x8f   :  { %v179_v56 = vld [vmem:[#allocation5 + $0x1e0] sm:$0xff]  ;;  %v6256_v63 = vcombine.high %v176_v58, %v180_v59  ;;  %v184_v2 = vld [vmem:[#allocation5 + $0x208] sm:$0xff]  ;;  %v6255_v5 = vcombine.low %v176_v58, %v180_v59 }
  0x90   :  { %3268 = vmatpush1.bf16.msra.mxu0 %v6221_v34  ;;  %3432 = vmatpush1.bf16.msra.mxu1 %v6223_v35  ;;  %v6254_v62 = vcombine.high %v175_v55, %v179_v56  ;;  %v183_v0 = vld [vmem:[#allocation5 + $0x200] sm:$0xff]  ;;  %v188_v3 = vld [vmem:[#allocation5 + $0x228] sm:$0xff]  ;;  %v6253_v4 = vcombine.low %v175_v55, %v179_v56 }
  0x91   :  { %3269 = vmatprep.subr.bf16.mxu0 %v6230_v36  ;;  %3433 = vmatprep.subr.bf16.mxu1 %v6232_v37  ;;  %v187_v1 = vld [vmem:[#allocation5 + $0x220] sm:$0xff]  ;;  %v6264_v7 = vcombine.high %v184_v2, %v188_v3  ;;  %v192_v10 = vld [vmem:[#allocation5 + $0x248] sm:$0xff]  ;;  %v6263_v13 = vcombine.low %v184_v2, %v188_v3 }
  0x92   :  { %3293 = vmatprep.mubr.bf16.mxu0 %v7893_v57  ;;  %3457 = vmatprep.mubr.bf16.mxu1 %v7893_v57  ;;  %v6262_v6 = vcombine.high %v183_v0, %v187_v1  ;;  %v191_v8 = vld [vmem:[#allocation5 + $0x240] sm:$0xff]  ;;  %v196_v11 = vld [vmem:[#allocation5 + $0x268] sm:$0xff]  ;;  %v6261_v12 = vcombine.low %v183_v0, %v187_v1 }
  0x93   :  { %v195_v9 = vld [vmem:[#allocation5 + $0x260] sm:$0xff]  ;;  %v6272_v15 = vcombine.high %v192_v10, %v196_v11  ;;  %v200_v18 = vld [vmem:[#allocation5 + $0x288] sm:$0xff]  ;;  %v6271_v21 = vcombine.low %v192_v10, %v196_v11 }
  0x94   :  { %3270 = vmatpush1.bf16.msra.mxu0 %v6229_v42  ;;  %3434 = vmatpush1.bf16.msra.mxu1 %v6231_v43  ;;  %v6270_v14 = vcombine.high %v191_v8, %v195_v9  ;;  %v199_v16 = vld [vmem:[#allocation5 + $0x280] sm:$0xff]  ;;  %v204_v19 = vld [vmem:[#allocation5 + $0x2a8] sm:$0xff]  ;;  %v6269_v20 = vcombine.low %v191_v8, %v195_v9 }
  0x95   :  { %3271 = vmatprep.subr.bf16.mxu0 %v6238_v44  ;;  %3435 = vmatprep.subr.bf16.mxu1 %v6240_v45  ;;  %v203_v17 = vld [vmem:[#allocation5 + $0x2a0] sm:$0xff]  ;;  %v6280_v23 = vcombine.high %v200_v18, %v204_v19  ;;  %v208_v26 = vld [vmem:[#allocation5 + $0x2c8] sm:$0xff]  ;;  %v6279_v29 = vcombine.low %v200_v18, %v204_v19 }
  0x96   :  { %v6278_v22 = vcombine.high %v199_v16, %v203_v17  ;;  %v207_v24 = vld [vmem:[#allocation5 + $0x2c0] sm:$0xff]  ;;  %v212_v27 = vld [vmem:[#allocation5 + $0x2e8] sm:$0xff]  ;;  %v6277_v28 = vcombine.low %v199_v16, %v203_v17 }
  0x97   :  { %v211_v25 = vld [vmem:[#allocation5 + $0x2e0] sm:$0xff]  ;;  %v6288_v31 = vcombine.high %v208_v26, %v212_v27  ;;  %v216_v34 = vld [vmem:[#allocation5 + $0x308] sm:$0xff]  ;;  %v6287_v37 = vcombine.low %v208_v26, %v212_v27 }
  0x98   :  { %3272 = vmatpush1.bf16.msra.mxu0 %v6237_v50  ;;  %3436 = vmatpush1.bf16.msra.mxu1 %v6239_v51  ;;  %v6286_v30 = vcombine.high %v207_v24, %v211_v25  ;;  %v215_v32 = vld [vmem:[#allocation5 + $0x300] sm:$0xff]  ;;  %v220_v35 = vld [vmem:[#allocation5 + $0x328] sm:$0xff]  ;;  %v6285_v36 = vcombine.low %v207_v24, %v211_v25 }
  0x99   :  { %3273 = vmatprep.subr.bf16.mxu0 %v6246_v52  ;;  %3437 = vmatprep.subr.bf16.mxu1 %v6248_v54  ;;  %v219_v33 = vld [vmem:[#allocation5 + $0x320] sm:$0xff]  ;;  %v6296_v39 = vcombine.high %v216_v34, %v220_v35  ;;  %v224_v42 = vld [vmem:[#allocation5 + $0x348] sm:$0xff]  ;;  %v6295_v45 = vcombine.low %v216_v34, %v220_v35 }
  0x9a   :  { %v6294_v38 = vcombine.high %v215_v32, %v219_v33  ;;  %v223_v40 = vld [vmem:[#allocation5 + $0x340] sm:$0xff]  ;;  %v228_v43 = vld [vmem:[#allocation5 + $0x368] sm:$0xff]  ;;  %v6293_v44 = vcombine.low %v215_v32, %v219_v33 }
  0x9b   :  { %v227_v41 = vld [vmem:[#allocation5 + $0x360] sm:$0xff]  ;;  %v6304_v47 = vcombine.high %v224_v42, %v228_v43  ;;  %v232_v50 = vld [vmem:[#allocation5 + $0x388] sm:$0xff]  ;;  %v6303_v54 = vcombine.low %v224_v42, %v228_v43 }
  0x9c   :  { %3274 = vmatpush1.bf16.msra.mxu0 %v6245_v60  ;;  %3438 = vmatpush1.bf16.msra.mxu1 %v6247_v61  ;;  %v6302_v46 = vcombine.high %v223_v40, %v227_v41  ;;  %v231_v48 = vld [vmem:[#allocation5 + $0x380] sm:$0xff]  ;;  %v236_v51 = vld [vmem:[#allocation5 + $0x3a8] sm:$0xff]  ;;  %v6301_v52 = vcombine.low %v223_v40, %v227_v41 }
  0x9d   :  { %3275 = vmatprep.subr.bf16.mxu0 %v6254_v62  ;;  %3439 = vmatprep.subr.bf16.mxu1 %v6256_v63  ;;  %v235_v49 = vld [vmem:[#allocation5 + $0x3a0] sm:$0xff]  ;;  %v6312_v56 = vcombine.high %v232_v50, %v236_v51  ;;  %v240_v60 = vld [vmem:[#allocation5 + $0x3c8] sm:$0xff]  ;;  %v6311_v63 = vcombine.low %v232_v50, %v236_v51 }
  0x9e   :  { %v6310_v55 = vcombine.high %v231_v48, %v235_v49  ;;  %v239_v58 = vld [vmem:[#allocation5 + $0x3c0] sm:$0xff]  ;;  %v244_v61 = vld [vmem:[#allocation5 + $0x3e8] sm:$0xff]  ;;  %v6309_v62 = vcombine.low %v231_v48, %v235_v49 }
  0x9f   :  { %v243_v59 = vld [vmem:[#allocation5 + $0x3e0] sm:$0xff]  ;;  %v6320_v1 = vcombine.high %v240_v60, %v244_v61 }
  0xa0   :  { %3276 = vmatpush1.bf16.msra.mxu0 %v6253_v4  ;;  %3440 = vmatpush1.bf16.msra.mxu1 %v6255_v5  ;;  %v6318_v0 = vcombine.high %v239_v58, %v243_v59  ;;  %v247_v2 = vld [vmem:[#allocation5 + $0x400] sm:$0xff]  ;;  %v248_v4 = vld [vmem:[#allocation5 + $0x408] sm:$0xff] }
  0xa1   :  { %3277 = vmatprep.subr.bf16.mxu0 %v6262_v6  ;;  %3441 = vmatprep.subr.bf16.mxu1 %v6264_v7  ;;  %v251_v3 = vld [vmem:[#allocation5 + $0x420] sm:$0xff]  ;;  %v252_v5 = vld [vmem:[#allocation5 + $0x428] sm:$0xff]  ;;  %v6317_v6 = vcombine.low %v239_v58, %v243_v59  ;;  %v6319_v7 = vcombine.low %v240_v60, %v244_v61 }
  0xa2   :  { %v6326_v8 = vcombine.high %v247_v2, %v251_v3  ;;  %v6328_v9 = vcombine.high %v248_v4, %v252_v5  ;;  %v255_v10 = vld [vmem:[#allocation5 + $0x440] sm:$0xff]  ;;  %v6325_v16 = vcombine.low %v247_v2, %v251_v3  ;;  %v6327_v17 = vcombine.low %v248_v4, %v252_v5 }
  0xa3   :  { %v259_v11 = vld [vmem:[#allocation5 + $0x460] sm:$0xff] }
  0xa4   :  { %3278 = vmatpush1.bf16.msra.mxu0 %v6261_v12  ;;  %3442 = vmatpush1.bf16.msra.mxu1 %v6263_v13  ;;  %v7899_v12 = vcombine.low %v7889_v53, %v7889_v53  ;;  %v256_v13 = vld [vmem:[#allocation5 + $0x448] sm:$0xff]  ;;  %v6334_v18 = vcombine.high %v255_v10, %v259_v11  ;;  %v263_v19 = vld [vmem:[#allocation5 + $0x480] sm:$0xff]  ;;  %v6333_v24 = vcombine.low %v255_v10, %v259_v11 }
  0xa5   :  { %3279 = vmatprep.subr.bf16.mxu0 %v6270_v14  ;;  %3443 = vmatprep.subr.bf16.mxu1 %v6272_v15  ;;  %v260_v14 = vld [vmem:[#allocation5 + $0x468] sm:$0xff]  ;;  %v271_v27 = vld [vmem:[#allocation5 + $0x4c0] sm:$0xff] }
  0xa6   :  { %v7901_v15 = vld [vmem:[#allocation2 + $0x8] sm:$0xff]  ;;  %v6335_v25 = vcombine.low %v256_v13, %v260_v14  ;;  %v279_v35 = vld [vmem:[#allocation5 + $0x500] sm:$0xff] }
  0xa7   :  { %v7905_v53 = vcombine.high %v7901_v15, %v7901_v15  ;;  %v287_v43 = vld [vmem:[#allocation5 + $0x540] sm:$0xff] }
  0xa8   :  { %3280 = vmatpush1.bf16.msra.mxu0 %v6269_v20  ;;  %3444 = vmatpush1.bf16.msra.mxu1 %v6271_v21  ;;  %v267_v20 = vld [vmem:[#allocation5 + $0x4a0] sm:$0xff]  ;;  %v6336_v21 = vcombine.high %v256_v13, %v260_v14 }
  0xa9   :  { %3281 = vmatprep.subr.bf16.mxu0 %v6278_v22  ;;  %3445 = vmatprep.subr.bf16.mxu1 %v6280_v23  ;;  %v264_v22 = vld [vmem:[#allocation5 + $0x488] sm:$0xff]  ;;  %v6342_v26 = vcombine.high %v263_v19, %v267_v20  ;;  %v6341_v32 = vcombine.low %v263_v19, %v267_v20  ;;  %v295_v51 = vld [vmem:[#allocation5 + $0x580] sm:$0xff] }
  0xaa   :  { %v268_v23 = vld [vmem:[#allocation5 + $0x4a8] sm:$0xff]  ;;  %v303_v61 = vld [vmem:[#allocation5 + $0x5c0] sm:$0xff] }
  0xab   :  { %v6343_v33 = vcombine.low %v264_v22, %v268_v23  ;;  %v311_v5 = vld [vmem:[#allocation5 + $0x600] sm:$0xff]  ;;  %v324_v19 = vld [vmem:[#allocation5 + $0x668] sm:$0xff] }
  0xac   :  { %3282 = vmatpush1.bf16.msra.mxu0 %v6277_v28  ;;  %3446 = vmatpush1.bf16.msra.mxu1 %v6279_v29  ;;  %v275_v28 = vld [vmem:[#allocation5 + $0x4e0] sm:$0xff]  ;;  %v272_v29 = vld [vmem:[#allocation5 + $0x4c8] sm:$0xff] }
  0xad   :  { %3283 = vmatprep.subr.bf16.mxu0 %v6286_v30  ;;  %3447 = vmatprep.subr.bf16.mxu1 %v6288_v31  ;;  %v6344_v30 = vcombine.high %v264_v22, %v268_v23  ;;  %v276_v31 = vld [vmem:[#allocation5 + $0x4e8] sm:$0xff]  ;;  %v6350_v34 = vcombine.high %v271_v27, %v275_v28  ;;  %v6349_v40 = vcombine.low %v271_v27, %v275_v28  ;;  %v319_v14 = vld [vmem:[#allocation5 + $0x640] sm:$0xff] }
  0xae   :  { %v6351_v41 = vcombine.low %v272_v29, %v276_v31  ;;  %v327_v23 = vld [vmem:[#allocation5 + $0x680] sm:$0xff]  ;;  %v332_v27 = vld [vmem:[#allocation5 + $0x6a8] sm:$0xff] }
  0xb0   :  { %3284 = vmatpush1.bf16.msra.mxu0 %v6285_v36  ;;  %3448 = vmatpush1.bf16.msra.mxu1 %v6287_v37  ;;  %v283_v36 = vld [vmem:[#allocation5 + $0x520] sm:$0xff]  ;;  %v280_v37 = vld [vmem:[#allocation5 + $0x508] sm:$0xff] }
  0xb1   :  { %3285 = vmatprep.subr.bf16.mxu0 %v6294_v38  ;;  %3449 = vmatprep.subr.bf16.mxu1 %v6296_v39  ;;  %v6352_v38 = vcombine.high %v272_v29, %v276_v31  ;;  %v284_v39 = vld [vmem:[#allocation5 + $0x528] sm:$0xff]  ;;  %v6358_v42 = vcombine.high %v279_v35, %v283_v36  ;;  %v6357_v48 = vcombine.low %v279_v35, %v283_v36  ;;  %v335_v31 = vld [vmem:[#allocation5 + $0x6c0] sm:$0xff] }
  0xb2   :  { %v6359_v49 = vcombine.low %v280_v37, %v284_v39  ;;  %v340_v35 = vld [vmem:[#allocation5 + $0x6e8] sm:$0xff] }
  0xb4   :  { %3286 = vmatpush1.bf16.msra.mxu0 %v6293_v44  ;;  %3450 = vmatpush1.bf16.msra.mxu1 %v6295_v45  ;;  %v291_v44 = vld [vmem:[#allocation5 + $0x560] sm:$0xff]  ;;  %v288_v45 = vld [vmem:[#allocation5 + $0x548] sm:$0xff] }
  0xb5   :  { %3287 = vmatprep.subr.bf16.mxu0 %v6302_v46  ;;  %3451 = vmatprep.subr.bf16.mxu1 %v6304_v47  ;;  %v6360_v46 = vcombine.high %v280_v37, %v284_v39  ;;  %v292_v47 = vld [vmem:[#allocation5 + $0x568] sm:$0xff]  ;;  %v6366_v50 = vcombine.high %v287_v43, %v291_v44  ;;  %v6365_v58 = vcombine.low %v287_v43, %v291_v44  ;;  %v343_v39 = vld [vmem:[#allocation5 + $0x700] sm:$0xff] }
  0xb6   :  { %v6367_v59 = vcombine.low %v288_v45, %v292_v47  ;;  %v348_v43 = vld [vmem:[#allocation5 + $0x728] sm:$0xff] }
  0xb8   :  { %3288 = vmatpush1.bf16.msra.mxu0 %v6301_v52  ;;  %3452 = vmatpush1.bf16.msra.mxu1 %v6303_v54  ;;  %v299_v52 = vld [vmem:[#allocation5 + $0x5a0] sm:$0xff]  ;;  %v296_v54 = vld [vmem:[#allocation5 + $0x588] sm:$0xff] }
  0xb9   :  { %3289 = vmatprep.subr.bf16.mxu0 %v6310_v55  ;;  %3453 = vmatprep.subr.bf16.mxu1 %v6312_v56  ;;  %v6368_v55 = vcombine.high %v288_v45, %v292_v47  ;;  %v300_v56 = vld [vmem:[#allocation5 + $0x5a8] sm:$0xff]  ;;  %v6374_v60 = vcombine.high %v295_v51, %v299_v52  ;;  %v6373_v2 = vcombine.low %v295_v51, %v299_v52  ;;  %v351_v47 = vld [vmem:[#allocation5 + $0x740] sm:$0xff] }
  0xba   :  { %v6375_v3 = vcombine.low %v296_v54, %v300_v56  ;;  %v356_v51 = vld [vmem:[#allocation5 + $0x768] sm:$0xff] }
  0xbc   :  { %3290 = vmatpush1.bf16.msra.mxu0 %v6309_v62  ;;  %3454 = vmatpush1.bf16.msra.mxu1 %v6311_v63  ;;  %v307_v62 = vld [vmem:[#allocation5 + $0x5e0] sm:$0xff]  ;;  %v304_v63 = vld [vmem:[#allocation5 + $0x5c8] sm:$0xff] }
  0xbd   :  { %3291 = vmatprep.subr.bf16.mxu0 %v6318_v0  ;;  %3455 = vmatprep.subr.bf16.mxu1 %v6320_v1  ;;  %v6376_v0 = vcombine.high %v296_v54, %v300_v56  ;;  %v308_v1 = vld [vmem:[#allocation5 + $0x5e8] sm:$0xff]  ;;  %v6382_v4 = vcombine.high %v303_v61, %v307_v62  ;;  %v6381_v10 = vcombine.low %v303_v61, %v307_v62  ;;  %v359_v56 = vld [vmem:[#allocation5 + $0x780] sm:$0xff] }
  0xbe   :  { %v6383_v11 = vcombine.low %v304_v63, %v308_v1  ;;  %v364_v61 = vld [vmem:[#allocation5 + $0x7a8] sm:$0xff] }
  0xc0   :  { %3292 = vmatpush1.bf16.msra.mxu0 %v6317_v6  ;;  %3456 = vmatpush1.bf16.msra.mxu1 %v6319_v7  ;;  %v315_v6 = vld [vmem:[#allocation5 + $0x620] sm:$0xff]  ;;  %v312_v7 = vld [vmem:[#allocation5 + $0x608] sm:$0xff] }
  0xc1   :  { %3302 = vmatprep.subr.bf16.mxu0 %v6326_v8  ;;  %3466 = vmatprep.subr.bf16.mxu1 %v6328_v9  ;;  %v6384_v8 = vcombine.high %v304_v63, %v308_v1  ;;  %v316_v9 = vld [vmem:[#allocation5 + $0x628] sm:$0xff]  ;;  %v6390_v13 = vcombine.high %v311_v5, %v315_v6  ;;  %v6389_v20 = vcombine.low %v311_v5, %v315_v6  ;;  %v367_v1 = vld [vmem:[#allocation5 + $0x7c0] sm:$0xff] }
  0xc2   :  { %v372_v5 = vld [vmem:[#allocation5 + $0x7e8] sm:$0xff] }
  0xc3   :  { %3294 = vmatmul.mubr.bf16.vlgmr.msra.gmra.mrb[0].mxu0 %v7899_v12  ;;  %3458 = vmatmul.mubr.bf16.vlgmr.msra.gmra.mrb[0].mxu1 %v7899_v12 }
  0xc4   :  { %3303 = vmatpush1.bf16.msra.mxu0 %v6325_v16  ;;  %3467 = vmatpush1.bf16.msra.mxu1 %v6327_v17  ;;  %v323_v16 = vld [vmem:[#allocation5 + $0x660] sm:$0xff]  ;;  %v320_v17 = vld [vmem:[#allocation5 + $0x648] sm:$0xff] }
  0xc5   :  { %3304 = vmatprep.subr.bf16.mxu0 %v6334_v18  ;;  %3468 = vmatprep.subr.bf16.mxu1 %v6336_v21  ;;  %v6392_v18 = vcombine.high %v312_v7, %v316_v9  ;;  %v6391_v21 = vcombine.low %v312_v7, %v316_v9  ;;  %v6398_v22 = vcombine.high %v319_v14, %v323_v16  ;;  %v375_v9 = vld [vmem:[#allocation5 + $0x800] sm:$0xff] }
  0xc6   :  { %3334 = vmatprep.mubr.bf16.mxu0 %v7905_v53  ;;  %3498 = vmatprep.mubr.bf16.mxu1 %v7905_v53  ;;  %v6397_v28 = vcombine.low %v319_v14, %v323_v16  ;;  %v6399_v29 = vcombine.low %v320_v17, %v324_v19  ;;  %v380_v14 = vld [vmem:[#allocation5 + $0x828] sm:$0xff] }
  0xc8   :  { %3305 = vmatpush1.bf16.msra.mxu0 %v6333_v24  ;;  %3469 = vmatpush1.bf16.msra.mxu1 %v6335_v25  ;;  %v331_v24 = vld [vmem:[#allocation5 + $0x6a0] sm:$0xff]  ;;  %v328_v25 = vld [vmem:[#allocation5 + $0x688] sm:$0xff] }
  0xc9   :  { %3306 = vmatprep.subr.bf16.mxu0 %v6342_v26  ;;  %3470 = vmatprep.subr.bf16.mxu1 %v6344_v30  ;;  %v6400_v26 = vcombine.high %v320_v17, %v324_v19  ;;  %v6406_v30 = vcombine.high %v327_v23, %v331_v24  ;;  %v6405_v36 = vcombine.low %v327_v23, %v331_v24  ;;  %v383_v17 = vld [vmem:[#allocation5 + $0x840] sm:$0xff]  ;;  %v7911_v24 = vld [vmem:[#allocation2 + $0x10] sm:$0xff] }
  0xca   :  { %v6407_v37 = vcombine.low %v328_v25, %v332_v27 }
  0xcc   :  { %3307 = vmatpush1.bf16.msra.mxu0 %v6341_v32  ;;  %3471 = vmatpush1.bf16.msra.mxu1 %v6343_v33  ;;  %v339_v32 = vld [vmem:[#allocation5 + $0x6e0] sm:$0xff]  ;;  %v336_v33 = vld [vmem:[#allocation5 + $0x6c8] sm:$0xff] }
  0xcd   :  { %3308 = vmatprep.subr.bf16.mxu0 %v6350_v34  ;;  %3472 = vmatprep.subr.bf16.mxu1 %v6352_v38  ;;  %v6408_v34 = vcombine.high %v328_v25, %v332_v27  ;;  %v6414_v38 = vcombine.high %v335_v31, %v339_v32  ;;  %v6413_v44 = vcombine.low %v335_v31, %v339_v32  ;;  %v392_v31 = vld [vmem:[#allocation5 + $0x888] sm:$0xff] }
  0xce   :  { %v6415_v45 = vcombine.low %v336_v33, %v340_v35  ;;  %v7915_v25 = vcombine.low %v7901_v15, %v7901_v15 }
  0xd0   :  { %3309 = vmatpush1.bf16.msra.mxu0 %v6349_v40  ;;  %3473 = vmatpush1.bf16.msra.mxu1 %v6351_v41  ;;  %v347_v40 = vld [vmem:[#allocation5 + $0x720] sm:$0xff]  ;;  %v344_v41 = vld [vmem:[#allocation5 + $0x708] sm:$0xff] }
  0xd1   :  { %3310 = vmatprep.subr.bf16.mxu0 %v6358_v42  ;;  %3474 = vmatprep.subr.bf16.mxu1 %v6360_v46  ;;  %v6416_v42 = vcombine.high %v336_v33, %v340_v35  ;;  %v6422_v46 = vcombine.high %v343_v39, %v347_v40  ;;  %v6421_v52 = vcombine.low %v343_v39, %v347_v40  ;;  %v396_v33 = vld [vmem:[#allocation5 + $0x8a8] sm:$0xff] }
  0xd2   :  { %v6423_v54 = vcombine.low %v344_v41, %v348_v43  ;;  %v400_v39 = vld [vmem:[#allocation5 + $0x8c8] sm:$0xff]  ;;  %v6472_v40 = vcombine.high %v392_v31, %v396_v33 }
  0xd4   :  { %3311 = vmatpush1.bf16.msra.mxu0 %v6357_v48  ;;  %3475 = vmatpush1.bf16.msra.mxu1 %v6359_v49  ;;  %v355_v48 = vld [vmem:[#allocation5 + $0x760] sm:$0xff]  ;;  %v352_v49 = vld [vmem:[#allocation5 + $0x748] sm:$0xff] }
  0xd5   :  { %3312 = vmatprep.subr.bf16.mxu0 %v6366_v50  ;;  %3476 = vmatprep.subr.bf16.mxu1 %v6368_v55  ;;  %v6424_v50 = vcombine.high %v344_v41, %v348_v43  ;;  %v6430_v55 = vcombine.high %v351_v47, %v355_v48  ;;  %v6429_v62 = vcombine.low %v351_v47, %v355_v48  ;;  %v404_v41 = vld [vmem:[#allocation5 + $0x8e8] sm:$0xff] }
  0xd6   :  { %v6431_v63 = vcombine.low %v352_v49, %v356_v51  ;;  %v6471_v43 = vcombine.low %v392_v31, %v396_v33  ;;  %v408_v47 = vld [vmem:[#allocation5 + $0x908] sm:$0xff]  ;;  %v6480_v48 = vcombine.high %v400_v39, %v404_v41 }
  0xd7   :  { %v452_v31 = vld [vmem:[#allocation5 + $0xa68] sm:$0xff] }
  0xd8   :  { %3313 = vmatpush1.bf16.msra.mxu0 %v6365_v58  ;;  %3477 = vmatpush1.bf16.msra.mxu1 %v6367_v59  ;;  %v363_v58 = vld [vmem:[#allocation5 + $0x7a0] sm:$0xff]  ;;  %v360_v59 = vld [vmem:[#allocation5 + $0x788] sm:$0xff] }
  0xd9   :  { %3314 = vmatprep.subr.bf16.mxu0 %v6374_v60  ;;  %3478 = vmatprep.subr.bf16.mxu1 %v6376_v0  ;;  %v6432_v60 = vcombine.high %v352_v49, %v356_v51  ;;  %v6438_v0 = vcombine.high %v359_v56, %v363_v58  ;;  %v6437_v6 = vcombine.low %v359_v56, %v363_v58  ;;  %v412_v49 = vld [vmem:[#allocation5 + $0x928] sm:$0xff] }
  0xda   :  { %v6439_v7 = vcombine.low %v360_v59, %v364_v61  ;;  %v6479_v51 = vcombine.low %v400_v39, %v404_v41  ;;  %v416_v56 = vld [vmem:[#allocation5 + $0x948] sm:$0xff]  ;;  %v6488_v58 = vcombine.high %v408_v47, %v412_v49 }
  0xdb   :  { %v460_v39 = vld [vmem:[#allocation5 + $0xaa8] sm:$0xff] }
  0xdc   :  { %3315 = vmatpush1.bf16.msra.mxu0 %v6373_v2  ;;  %3479 = vmatpush1.bf16.msra.mxu1 %v6375_v3  ;;  %v371_v2 = vld [vmem:[#allocation5 + $0x7e0] sm:$0xff]  ;;  %v368_v3 = vld [vmem:[#allocation5 + $0x7c8] sm:$0xff] }
  0xdd   :  { %3316 = vmatprep.subr.bf16.mxu0 %v6382_v4  ;;  %3480 = vmatprep.subr.bf16.mxu1 %v6384_v8  ;;  %v6440_v4 = vcombine.high %v360_v59, %v364_v61  ;;  %v6446_v8 = vcombine.high %v367_v1, %v371_v2  ;;  %v6445_v16 = vcombine.low %v367_v1, %v371_v2  ;;  %v420_v59 = vld [vmem:[#allocation5 + $0x968] sm:$0xff] }
  0xde   :  { %v6487_v61 = vcombine.low %v408_v47, %v412_v49  ;;  %v424_v1 = vld [vmem:[#allocation5 + $0x988] sm:$0xff]  ;;  %v6496_v2 = vcombine.high %v416_v56, %v420_v59 }
  0xdf   :  { %v468_v47 = vld [vmem:[#allocation5 + $0xae8] sm:$0xff] }
  0xe0   :  { %3317 = vmatpush1.bf16.msra.mxu0 %v6381_v10  ;;  %3481 = vmatpush1.bf16.msra.mxu1 %v6383_v11  ;;  %v379_v10 = vld [vmem:[#allocation5 + $0x820] sm:$0xff]  ;;  %v376_v11 = vld [vmem:[#allocation5 + $0x808] sm:$0xff] }
  0xe1   :  { %3318 = vmatprep.subr.bf16.mxu0 %v6390_v13  ;;  %3482 = vmatprep.subr.bf16.mxu1 %v6392_v18  ;;  %v6448_v13 = vcombine.high %v368_v3, %v372_v5  ;;  %v6447_v18 = vcombine.low %v368_v3, %v372_v5  ;;  %v6454_v19 = vcombine.high %v375_v9, %v379_v10  ;;  %v428_v3 = vld [vmem:[#allocation5 + $0x9a8] sm:$0xff] }
  0xe2   :  { %v6456_v23 = vcombine.high %v376_v11, %v380_v14  ;;  %v6455_v27 = vcombine.low %v376_v11, %v380_v14  ;;  %v6495_v5 = vcombine.low %v416_v56, %v420_v59  ;;  %v436_v11 = vld [vmem:[#allocation5 + $0x9e8] sm:$0xff]  ;;  %v6503_v14 = vcombine.low %v424_v1, %v428_v3 }
  0xe3   :  { %v476_v56 = vld [vmem:[#allocation5 + $0xb28] sm:$0xff] }
  0xe4   :  { %3319 = vmatpush1.bf16.msra.mxu0 %v6389_v20  ;;  %3483 = vmatpush1.bf16.msra.mxu1 %v6391_v21  ;;  %v387_v20 = vld [vmem:[#allocation5 + $0x860] sm:$0xff]  ;;  %v384_v21 = vld [vmem:[#allocation5 + $0x848] sm:$0xff] }
  0xe5   :  { %3320 = vmatprep.subr.bf16.mxu0 %v6398_v22  ;;  %3484 = vmatprep.subr.bf16.mxu1 %v6400_v26  ;;  %v388_v22 = vld [vmem:[#allocation5 + $0x868] sm:$0xff]  ;;  %v6453_v26 = vcombine.low %v375_v9, %v379_v10  ;;  %v6461_v15 = vcombine.low %v383_v17, %v387_v20  ;;  %v6504_v10 = vcombine.high %v424_v1, %v428_v3 }
  0xe6   :  { %v6464_v32 = vcombine.high %v384_v21, %v388_v22  ;;  %v6463_v35 = vcombine.low %v384_v21, %v388_v22  ;;  %v432_v9 = vld [vmem:[#allocation5 + $0x9c8] sm:$0xff] }
  0xe7   :  { %v444_v21 = vld [vmem:[#allocation5 + $0xa28] sm:$0xff] }
  0xe8   :  { %3321 = vmatpush1.bf16.msra.mxu0 %v6397_v28  ;;  %3485 = vmatpush1.bf16.msra.mxu1 %v6399_v29  ;;  %v6462_v28 = vcombine.high %v383_v17, %v387_v20  ;;  %v391_v29 = vld [vmem:[#allocation5 + $0x880] sm:$0xff]  ;;  %v6512_v20 = vcombine.high %v432_v9, %v436_v11  ;;  %v484_v1 = vld [vmem:[#allocation5 + $0xb68] sm:$0xff] }
  0xe9   :  { %3322 = vmatprep.subr.bf16.mxu0 %v6406_v30  ;;  %3486 = vmatprep.subr.bf16.mxu1 %v6408_v34  ;;  %v395_v30 = vld [vmem:[#allocation5 + $0x8a0] sm:$0xff]  ;;  %v7919_v34 = vcombine.high %v7911_v24, %v7911_v24 }
  0xea   :  { %v439_v17 = vld [vmem:[#allocation5 + $0xa00] sm:$0xff] }
  0xec   :  { %3323 = vmatpush1.bf16.msra.mxu0 %v6405_v36  ;;  %3487 = vmatpush1.bf16.msra.mxu1 %v6407_v37  ;;  %v6470_v36 = vcombine.high %v391_v29, %v395_v30  ;;  %v399_v37 = vld [vmem:[#allocation5 + $0x8c0] sm:$0xff] }
  0xed   :  { %3324 = vmatprep.subr.bf16.mxu0 %v6414_v38  ;;  %3488 = vmatprep.subr.bf16.mxu1 %v6416_v42  ;;  %v403_v38 = vld [vmem:[#allocation5 + $0x8e0] sm:$0xff]  ;;  %v6469_v42 = vcombine.low %v391_v29, %v395_v30  ;;  %v448_v29 = vld [vmem:[#allocation5 + $0xa48] sm:$0xff] }
  0xee   :  { %v6527_v41 = vcombine.low %v448_v29, %v452_v31 }
  0xf0   :  { %3325 = vmatpush1.bf16.msra.mxu0 %v6413_v44  ;;  %3489 = vmatpush1.bf16.msra.mxu1 %v6415_v45  ;;  %v6478_v44 = vcombine.high %v399_v37, %v403_v38  ;;  %v407_v45 = vld [vmem:[#allocation5 + $0x900] sm:$0xff] }
  0xf1   :  { %3326 = vmatprep.subr.bf16.mxu0 %v6422_v46  ;;  %3490 = vmatprep.subr.bf16.mxu1 %v6424_v50  ;;  %v411_v46 = vld [vmem:[#allocation5 + $0x920] sm:$0xff]  ;;  %v6477_v50 = vcombine.low %v399_v37, %v403_v38  ;;  %v456_v37 = vld [vmem:[#allocation5 + $0xa88] sm:$0xff]  ;;  %v6528_v38 = vcombine.high %v448_v29, %v452_v31 }
  0xf2   :  { %v6535_v49 = vcombine.low %v456_v37, %v460_v39  ;;  %v508_v29 = vld [vmem:[#allocation5 + $0xc28] sm:$0xff]  ;;  %v511_v31 = vld [vmem:[#allocation5 + $0xc40] sm:$0xff] }
  0xf4   :  { %3327 = vmatpush1.bf16.msra.mxu0 %v6421_v52  ;;  %3491 = vmatpush1.bf16.msra.mxu1 %v6423_v54  ;;  %v6486_v52 = vcombine.high %v407_v45, %v411_v46  ;;  %v415_v54 = vld [vmem:[#allocation5 + $0x940] sm:$0xff] }
  0xf5   :  { %3328 = vmatprep.subr.bf16.mxu0 %v6430_v55  ;;  %3492 = vmatprep.subr.bf16.mxu1 %v6432_v60  ;;  %v419_v55 = vld [vmem:[#allocation5 + $0x960] sm:$0xff]  ;;  %v6485_v60 = vcombine.low %v407_v45, %v411_v46  ;;  %v464_v45 = vld [vmem:[#allocation5 + $0xac8] sm:$0xff]  ;;  %v6536_v46 = vcombine.high %v456_v37, %v460_v39  ;;  %v7929_v39 = vcombine.low %v7911_v24, %v7911_v24 }
  0xf6   :  { %v6543_v59 = vcombine.low %v464_v45, %v468_v47 }
  0xf8   :  { %3329 = vmatpush1.bf16.msra.mxu0 %v6429_v62  ;;  %3493 = vmatpush1.bf16.msra.mxu1 %v6431_v63  ;;  %v6494_v62 = vcombine.high %v415_v54, %v419_v55  ;;  %v423_v63 = vld [vmem:[#allocation5 + $0x980] sm:$0xff] }
  0xf9   :  { %3330 = vmatprep.subr.bf16.mxu0 %v6438_v0  ;;  %3494 = vmatprep.subr.bf16.mxu1 %v6440_v4  ;;  %v427_v0 = vld [vmem:[#allocation5 + $0x9a0] sm:$0xff]  ;;  %v6493_v4 = vcombine.low %v415_v54, %v419_v55  ;;  %v472_v54 = vld [vmem:[#allocation5 + $0xb08] sm:$0xff]  ;;  %v6544_v55 = vcombine.high %v464_v45, %v468_v47 }
  0xfa   :  { %v6551_v3 = vcombine.low %v472_v54, %v476_v56  ;;  %v520_v45 = vld [vmem:[#allocation5 + $0xc88] sm:$0xff] }
  0xfb   :  { %v524_v47 = vld [vmem:[#allocation5 + $0xca8] sm:$0xff] }
  0xfc   :  { %3331 = vmatpush1.bf16.msra.mxu0 %v6437_v6  ;;  %3495 = vmatpush1.bf16.msra.mxu1 %v6439_v7  ;;  %v6502_v6 = vcombine.high %v423_v63, %v427_v0  ;;  %v431_v7 = vld [vmem:[#allocation5 + $0x9c0] sm:$0xff] }
  0xfd   :  { %3332 = vmatprep.subr.bf16.mxu0 %v6446_v8  ;;  %3496 = vmatprep.subr.bf16.mxu1 %v6448_v13  ;;  %v435_v8 = vld [vmem:[#allocation5 + $0x9e0] sm:$0xff]  ;;  %v6501_v13 = vcombine.low %v423_v63, %v427_v0  ;;  %v480_v63 = vld [vmem:[#allocation5 + $0xb48] sm:$0xff]  ;;  %v6552_v0 = vcombine.high %v472_v54, %v476_v56 }
  0xfe   :  { %v6509_v22 = vcombine.low %v431_v7, %v435_v8  ;;  %v528_v54 = vld [vmem:[#allocation5 + $0xcc8] sm:$0xff] }
  0xff   :  { %v532_v56 = vld [vmem:[#allocation5 + $0xce8] sm:$0xff] }
 0x100   :  { %3333 = vmatpush1.bf16.msra.mxu0 %v6445_v16  ;;  %3497 = vmatpush1.bf16.msra.mxu1 %v6447_v18  ;;  %v6510_v16 = vcombine.high %v431_v7, %v435_v8  ;;  %v443_v18 = vld [vmem:[#allocation5 + $0xa20] sm:$0xff]  ;;  %v488_v7 = vld [vmem:[#allocation5 + $0xb88] sm:$0xff]  ;;  %v6560_v8 = vcombine.high %v480_v63, %v484_v1 }
 0x101   :  { %3343 = vmatprep.subr.bf16.mxu0 %v6454_v19  ;;  %3507 = vmatprep.subr.bf16.mxu1 %v6456_v23  ;;  %v440_v19 = vld [vmem:[#allocation5 + $0xa08] sm:$0xff]  ;;  %v6511_v23 = vcombine.low %v432_v9, %v436_v11  ;;  %v6559_v11 = vcombine.low %v480_v63, %v484_v1 }
 0x102   :  { %v6520_v30 = vcombine.high %v440_v19, %v444_v21  ;;  %v6519_v33 = vcombine.low %v440_v19, %v444_v21  ;;  %v492_v9 = vld [vmem:[#allocation5 + $0xba8] sm:$0xff] }
 0x103   :  { %3335 = vmatmul.mubr.bf16.vlgmr.msra.gmra.mrb[0].mxu0 %v7915_v25  ;;  %3499 = vmatmul.mubr.bf16.vlgmr.msra.gmra.mrb[0].mxu1 %v7915_v25  ;;  %v500_v19 = vld [vmem:[#allocation5 + $0xbe8] sm:$0xff]  ;;  %v6567_v21 = vcombine.low %v488_v7, %v492_v9 }
 0x104   :  { %3344 = vmatpush1.bf16.msra.mxu0 %v6453_v26  ;;  %3508 = vmatpush1.bf16.msra.mxu1 %v6455_v27  ;;  %v6518_v26 = vcombine.high %v439_v17, %v443_v18  ;;  %v447_v27 = vld [vmem:[#allocation5 + $0xa40] sm:$0xff]  ;;  %v536_v63 = vld [vmem:[#allocation5 + $0xd08] sm:$0xff] }
 0x105   :  { %3345 = vmatprep.subr.bf16.mxu0 %v6462_v28  ;;  %3509 = vmatprep.subr.bf16.mxu1 %v6464_v32  ;;  %v451_v28 = vld [vmem:[#allocation5 + $0xa60] sm:$0xff]  ;;  %v6517_v32 = vcombine.low %v439_v17, %v443_v18  ;;  %v496_v17 = vld [vmem:[#allocation5 + $0xbc8] sm:$0xff]  ;;  %v6568_v18 = vcombine.high %v488_v7, %v492_v9 }
 0x106   :  { %3375 = vmatprep.mubr.bf16.mxu0 %v7919_v34  ;;  %3539 = vmatprep.mubr.bf16.mxu1 %v7919_v34  ;;  %v540_v1 = vld [vmem:[#allocation5 + $0xd28] sm:$0xff] }
 0x107   :  { %v544_v7 = vld [vmem:[#allocation5 + $0xd48] sm:$0xff] }
 0x108   :  { %3346 = vmatpush1.bf16.msra.mxu0 %v6461_v15  ;;  %3510 = vmatpush1.bf16.msra.mxu1 %v6463_v35  ;;  %v6526_v15 = vcombine.high %v447_v27, %v451_v28  ;;  %v455_v35 = vld [vmem:[#allocation5 + $0xa80] sm:$0xff]  ;;  %v548_v9 = vld [vmem:[#allocation5 + $0xd68] sm:$0xff] }
 0x109   :  { %3347 = vmatprep.subr.bf16.mxu0 %v6470_v36  ;;  %3511 = vmatprep.subr.bf16.mxu1 %v6472_v40  ;;  %v459_v36 = vld [vmem:[#allocation5 + $0xaa0] sm:$0xff]  ;;  %v6525_v40 = vcombine.low %v447_v27, %v451_v28  ;;  %v504_v27 = vld [vmem:[#allocation5 + $0xc08] sm:$0xff]  ;;  %v6576_v28 = vcombine.high %v496_v17, %v500_v19 }
 0x10a   :  { %v6584_v37 = vcombine.high %v504_v27, %v508_v29 }
 0x10c   :  { %3348 = vmatpush1.bf16.msra.mxu0 %v6469_v42  ;;  %3512 = vmatpush1.bf16.msra.mxu1 %v6471_v43  ;;  %v6534_v42 = vcombine.high %v455_v35, %v459_v36  ;;  %v463_v43 = vld [vmem:[#allocation5 + $0xac0] sm:$0xff] }
 0x10d   :  { %3349 = vmatprep.subr.bf16.mxu0 %v6478_v44  ;;  %3513 = vmatprep.subr.bf16.mxu1 %v6480_v48  ;;  %v467_v44 = vld [vmem:[#allocation5 + $0xae0] sm:$0xff]  ;;  %v6533_v48 = vcombine.low %v455_v35, %v459_v36  ;;  %v512_v35 = vld [vmem:[#allocation5 + $0xc48] sm:$0xff] }
 0x10e   :  { %v516_v36 = vld [vmem:[#allocation5 + $0xc68] sm:$0xff] }
 0x110   :  { %3350 = vmatpush1.bf16.msra.mxu0 %v6477_v50  ;;  %3514 = vmatpush1.bf16.msra.mxu1 %v6479_v51  ;;  %v6542_v50 = vcombine.high %v463_v43, %v467_v44  ;;  %v471_v51 = vld [vmem:[#allocation5 + $0xb00] sm:$0xff] }
 0x111   :  { %3351 = vmatprep.subr.bf16.mxu0 %v6486_v52  ;;  %3515 = vmatprep.subr.bf16.mxu1 %v6488_v58  ;;  %v475_v52 = vld [vmem:[#allocation5 + $0xb20] sm:$0xff]  ;;  %v6541_v58 = vcombine.low %v463_v43, %v467_v44 }
 0x112   :  { %v519_v43 = vld [vmem:[#allocation5 + $0xc80] sm:$0xff] }
 0x113   :  { %v523_v44 = vld [vmem:[#allocation5 + $0xca0] sm:$0xff] }
 0x114   :  { %3352 = vmatpush1.bf16.msra.mxu0 %v6485_v60  ;;  %3516 = vmatpush1.bf16.msra.mxu1 %v6487_v61  ;;  %v6550_v60 = vcombine.high %v471_v51, %v475_v52  ;;  %v479_v61 = vld [vmem:[#allocation5 + $0xb40] sm:$0xff] }
 0x115   :  { %3353 = vmatprep.subr.bf16.mxu0 %v6494_v62  ;;  %3517 = vmatprep.subr.bf16.mxu1 %v6496_v2  ;;  %v483_v62 = vld [vmem:[#allocation5 + $0xb60] sm:$0xff]  ;;  %v6549_v2 = vcombine.low %v471_v51, %v475_v52 }
 0x116   :  { %v527_v51 = vld [vmem:[#allocation5 + $0xcc0] sm:$0xff] }
 0x117   :  { %v531_v52 = vld [vmem:[#allocation5 + $0xce0] sm:$0xff] }
 0x118   :  { %3354 = vmatpush1.bf16.msra.mxu0 %v6493_v4  ;;  %3518 = vmatpush1.bf16.msra.mxu1 %v6495_v5  ;;  %v6558_v4 = vcombine.high %v479_v61, %v483_v62  ;;  %v487_v5 = vld [vmem:[#allocation5 + $0xb80] sm:$0xff] }
 0x119   :  { %3355 = vmatprep.subr.bf16.mxu0 %v6502_v6  ;;  %3519 = vmatprep.subr.bf16.mxu1 %v6504_v10  ;;  %v491_v6 = vld [vmem:[#allocation5 + $0xba0] sm:$0xff]  ;;  %v6557_v10 = vcombine.low %v479_v61, %v483_v62 }
 0x11a   :  { %v535_v61 = vld [vmem:[#allocation5 + $0xd00] sm:$0xff] }
 0x11b   :  { %v539_v62 = vld [vmem:[#allocation5 + $0xd20] sm:$0xff] }
 0x11c   :  { %3356 = vmatpush1.bf16.msra.mxu0 %v6501_v13  ;;  %3520 = vmatpush1.bf16.msra.mxu1 %v6503_v14  ;;  %v6566_v13 = vcombine.high %v487_v5, %v491_v6  ;;  %v495_v14 = vld [vmem:[#allocation5 + $0xbc0] sm:$0xff] }
 0x11d   :  { %3357 = vmatprep.subr.bf16.mxu0 %v6510_v16  ;;  %3521 = vmatprep.subr.bf16.mxu1 %v6512_v20  ;;  %v499_v16 = vld [vmem:[#allocation5 + $0xbe0] sm:$0xff]  ;;  %v6565_v20 = vcombine.low %v487_v5, %v491_v6 }
 0x11e   :  { %v543_v5 = vld [vmem:[#allocation5 + $0xd40] sm:$0xff] }
 0x11f   :  { %v547_v6 = vld [vmem:[#allocation5 + $0xd60] sm:$0xff] }
 0x120   :  { %3358 = vmatpush1.bf16.msra.mxu0 %v6509_v22  ;;  %3522 = vmatpush1.bf16.msra.mxu1 %v6511_v23  ;;  %v6574_v22 = vcombine.high %v495_v14, %v499_v16  ;;  %v503_v23 = vld [vmem:[#allocation5 + $0xc00] sm:$0xff] }
 0x121   :  { %3359 = vmatprep.subr.bf16.mxu0 %v6518_v26  ;;  %3523 = vmatprep.subr.bf16.mxu1 %v6520_v30  ;;  %v507_v26 = vld [vmem:[#allocation5 + $0xc20] sm:$0xff]  ;;  %v6573_v30 = vcombine.low %v495_v14, %v499_v16 }
 0x122   :  { %v551_v14 = vld [vmem:[#allocation5 + $0xd80] sm:$0xff] }
 0x123   :  { %v555_v16 = vld [vmem:[#allocation5 + $0xda0] sm:$0xff] }
 0x124   :  { %3360 = vmatpush1.bf16.msra.mxu0 %v6517_v32  ;;  %3524 = vmatpush1.bf16.msra.mxu1 %v6519_v33  ;;  %v6575_v32 = vcombine.low %v496_v17, %v500_v19  ;;  %v6582_v33 = vcombine.high %v503_v23, %v507_v26  ;;  %v552_v17 = vld [vmem:[#allocation5 + $0xd88] sm:$0xff] }
 0x125   :  { %3361 = vmatprep.subr.bf16.mxu0 %v6526_v15  ;;  %3525 = vmatprep.subr.bf16.mxu1 %v6528_v38  ;;  %v515_v15 = vld [vmem:[#allocation5 + $0xc60] sm:$0xff]  ;;  %v7925_v38 = vld [vmem:[#allocation2 + $0x18] sm:$0xff]  ;;  %v556_v19 = vld [vmem:[#allocation5 + $0xda8] sm:$0xff] }
 0x126   :  { %v6589_v24 = vcombine.low %v511_v31, %v515_v15 }
 0x128   :  { %3362 = vmatpush1.bf16.msra.mxu0 %v6525_v40  ;;  %3526 = vmatpush1.bf16.msra.mxu1 %v6527_v41  ;;  %v6581_v40 = vcombine.low %v503_v23, %v507_v26  ;;  %v6583_v41 = vcombine.low %v504_v27, %v508_v29  ;;  %v559_v23 = vld [vmem:[#allocation5 + $0xdc0] sm:$0xff]  ;;  %v560_v27 = vld [vmem:[#allocation5 + $0xdc8] sm:$0xff] }
 0x129   :  { %3363 = vmatprep.subr.bf16.mxu0 %v6534_v42  ;;  %3527 = vmatprep.subr.bf16.mxu1 %v6536_v46  ;;  %v6590_v42 = vcombine.high %v511_v31, %v515_v15  ;;  %v6592_v46 = vcombine.high %v512_v35, %v516_v36  ;;  %v563_v26 = vld [vmem:[#allocation5 + $0xde0] sm:$0xff]  ;;  %v564_v29 = vld [vmem:[#allocation5 + $0xde8] sm:$0xff]  ;;  %v6631_v31 = vcombine.low %v552_v17, %v556_v19 }
 0x12a   :  { %v571_v15 = vld [vmem:[#allocation5 + $0xe20] sm:$0xff] }
 0x12c   :  { %3364 = vmatpush1.bf16.msra.mxu0 %v6533_v48  ;;  %3528 = vmatpush1.bf16.msra.mxu1 %v6535_v49  ;;  %v7933_v48 = vcombine.high %v7925_v38, %v7925_v38  ;;  %v6591_v49 = vcombine.low %v512_v35, %v516_v36  ;;  %v568_v35 = vld [vmem:[#allocation5 + $0xe08] sm:$0xff]  ;;  %v6640_v36 = vcombine.high %v560_v27, %v564_v29 }
 0x12d   :  { %3365 = vmatprep.subr.bf16.mxu0 %v6542_v50  ;;  %3529 = vmatprep.subr.bf16.mxu1 %v6544_v55  ;;  %v6598_v50 = vcombine.high %v519_v43, %v523_v44  ;;  %v6600_v55 = vcombine.high %v520_v45, %v524_v47 }
 0x130   :  { %3366 = vmatpush1.bf16.msra.mxu0 %v6541_v58  ;;  %3530 = vmatpush1.bf16.msra.mxu1 %v6543_v59  ;;  %v6597_v58 = vcombine.low %v519_v43, %v523_v44  ;;  %v6599_v59 = vcombine.low %v520_v45, %v524_v47  ;;  %v575_v43 = vld [vmem:[#allocation5 + $0xe40] sm:$0xff]  ;;  %v576_v45 = vld [vmem:[#allocation5 + $0xe48] sm:$0xff] }
 0x131   :  { %3367 = vmatprep.subr.bf16.mxu0 %v6550_v60  ;;  %3531 = vmatprep.subr.bf16.mxu1 %v6552_v0  ;;  %v6606_v60 = vcombine.high %v527_v51, %v531_v52  ;;  %v6608_v0 = vcombine.high %v528_v54, %v532_v56  ;;  %v579_v44 = vld [vmem:[#allocation5 + $0xe60] sm:$0xff]  ;;  %v580_v47 = vld [vmem:[#allocation5 + $0xe68] sm:$0xff] }
 0x134   :  { %3368 = vmatpush1.bf16.msra.mxu0 %v6549_v2  ;;  %3532 = vmatpush1.bf16.msra.mxu1 %v6551_v3  ;;  %v6605_v2 = vcombine.low %v527_v51, %v531_v52  ;;  %v6607_v3 = vcombine.low %v528_v54, %v532_v56  ;;  %v6656_v51 = vcombine.high %v576_v45, %v580_v47  ;;  %v583_v52 = vld [vmem:[#allocation5 + $0xe80] sm:$0xff]  ;;  %v588_v56 = vld [vmem:[#allocation5 + $0xea8] sm:$0xff] }
 0x135   :  { %3369 = vmatprep.subr.bf16.mxu0 %v6558_v4  ;;  %3533 = vmatprep.subr.bf16.mxu1 %v6560_v8  ;;  %v6614_v4 = vcombine.high %v535_v61, %v539_v62  ;;  %v6616_v8 = vcombine.high %v536_v63, %v540_v1  ;;  %v587_v54 = vld [vmem:[#allocation5 + $0xea0] sm:$0xff] }
 0x138   :  { %3370 = vmatpush1.bf16.msra.mxu0 %v6557_v10  ;;  %3534 = vmatpush1.bf16.msra.mxu1 %v6559_v11  ;;  %v6613_v10 = vcombine.low %v535_v61, %v539_v62  ;;  %v6615_v11 = vcombine.low %v536_v63, %v540_v1  ;;  %v591_v62 = vld [vmem:[#allocation5 + $0xec0] sm:$0xff]  ;;  %v596_v1 = vld [vmem:[#allocation5 + $0xee8] sm:$0xff] }
 0x139   :  { %3371 = vmatprep.subr.bf16.mxu0 %v6566_v13  ;;  %3535 = vmatprep.subr.bf16.mxu1 %v6568_v18  ;;  %v6622_v13 = vcombine.high %v543_v5, %v547_v6  ;;  %v6624_v18 = vcombine.high %v544_v7, %v548_v9  ;;  %v595_v63 = vld [vmem:[#allocation5 + $0xee0] sm:$0xff] }
 0x13c   :  { %3372 = vmatpush1.bf16.msra.mxu0 %v6565_v20  ;;  %3536 = vmatpush1.bf16.msra.mxu1 %v6567_v21  ;;  %v6621_v20 = vcombine.low %v543_v5, %v547_v6  ;;  %v6623_v21 = vcombine.low %v544_v7, %v548_v9  ;;  %v599_v6 = vld [vmem:[#allocation5 + $0xf00] sm:$0xff]  ;;  %v604_v9 = vld [vmem:[#allocation5 + $0xf28] sm:$0xff] }
 0x13d   :  { %3373 = vmatprep.subr.bf16.mxu0 %v6574_v22  ;;  %3537 = vmatprep.subr.bf16.mxu1 %v6576_v28  ;;  %v6630_v22 = vcombine.high %v551_v14, %v555_v16  ;;  %v6632_v28 = vcombine.high %v552_v17, %v556_v19  ;;  %v603_v7 = vld [vmem:[#allocation5 + $0xf20] sm:$0xff]  ;;  %v612_v19 = vld [vmem:[#allocation5 + $0xf68] sm:$0xff] }
 0x13e   :  { %v611_v17 = vld [vmem:[#allocation5 + $0xf60] sm:$0xff] }
 0x140   :  { %3374 = vmatpush1.bf16.msra.mxu0 %v6573_v30  ;;  %3538 = vmatpush1.bf16.msra.mxu1 %v6575_v32  ;;  %v6629_v30 = vcombine.low %v551_v14, %v555_v16  ;;  %v6638_v32 = vcombine.high %v559_v23, %v563_v26  ;;  %v607_v16 = vld [vmem:[#allocation5 + $0xf40] sm:$0xff] }
 0x141   :  { %3384 = vmatprep.subr.bf16.mxu0 %v6582_v33  ;;  %3548 = vmatprep.subr.bf16.mxu1 %v6584_v37  ;;  %v567_v33 = vld [vmem:[#allocation5 + $0xe00] sm:$0xff]  ;;  %v572_v37 = vld [vmem:[#allocation5 + $0xe28] sm:$0xff] }
 0x143   :  { %3376 = vmatmul.mubr.bf16.vlgmr.msra.gmra.mrb[0].mxu0 %v7929_v39  ;;  %3540 = vmatmul.mubr.bf16.vlgmr.msra.gmra.mrb[0].mxu1 %v7929_v39 }
 0x144   :  { %3385 = vmatpush1.bf16.msra.mxu0 %v6581_v40  ;;  %3549 = vmatpush1.bf16.msra.mxu1 %v6583_v41  ;;  %v6637_v40 = vcombine.low %v559_v23, %v563_v26  ;;  %v6639_v41 = vcombine.low %v560_v27, %v564_v29  ;;  %v615_v26 = vld [vmem:[#allocation5 + $0xf80] sm:$0xff]  ;;  %v620_v29 = vld [vmem:[#allocation5 + $0xfa8] sm:$0xff] }
 0x145   :  { %3386 = vmatprep.subr.bf16.mxu0 %v6590_v42  ;;  %3550 = vmatprep.subr.bf16.mxu1 %v6592_v46  ;;  %v6646_v42 = vcombine.high %v567_v33, %v571_v15  ;;  %v6648_v46 = vcombine.high %v568_v35, %v572_v37  ;;  %v619_v27 = vld [vmem:[#allocation5 + $0xfa0] sm:$0xff] }
 0x146   :  { %3416 = vmatprep.mubr.bf16.mxu0 %v7933_v48  ;;  %3580 = vmatprep.mubr.bf16.mxu1 %v7933_v48 }
 0x148   :  { %3387 = vmatpush1.bf16.msra.mxu0 %v6589_v24  ;;  %3551 = vmatpush1.bf16.msra.mxu1 %v6591_v49  ;;  %v6645_v24 = vcombine.low %v567_v33, %v571_v15  ;;  %v6647_v49 = vcombine.low %v568_v35, %v572_v37  ;;  %v623_v15 = vld [vmem:[#allocation5 + $0xfc0] sm:$0xff]  ;;  %v628_v37 = vld [vmem:[#allocation5 + $0xfe8] sm:$0xff] }
 0x149   :  { %3388 = vmatprep.subr.bf16.mxu0 %v6598_v50  ;;  %3552 = vmatprep.subr.bf16.mxu1 %v6600_v55  ;;  %v6654_v50 = vcombine.high %v575_v43, %v579_v44  ;;  %v584_v55 = vld [vmem:[#allocation5 + $0xe88] sm:$0xff]  ;;  %v627_v35 = vld [vmem:[#allocation5 + $0xfe0] sm:$0xff] }
 0x14a   :  { %v6664_v61 = vcombine.high %v584_v55, %v588_v56 }
 0x14c   :  { %3389 = vmatpush1.bf16.msra.mxu0 %v6597_v58  ;;  %3553 = vmatpush1.bf16.msra.mxu1 %v6599_v59  ;;  %v6653_v58 = vcombine.low %v575_v43, %v579_v44  ;;  %v6655_v59 = vcombine.low %v576_v45, %v580_v47  ;;  %v121_v44 = vld [vmem:[#allocation5 + $0x10] sm:$0xff]  ;;  %v126_v47 = vld [vmem:[#allocation5 + $0x38] sm:$0xff] }
 0x14d   :  { %3390 = vmatprep.subr.bf16.mxu0 %v6606_v60  ;;  %3554 = vmatprep.subr.bf16.mxu1 %v6608_v0  ;;  %v6662_v60 = vcombine.high %v583_v52, %v587_v54  ;;  %v592_v0 = vld [vmem:[#allocation5 + $0xec8] sm:$0xff]  ;;  %v125_v45 = vld [vmem:[#allocation5 + $0x30] sm:$0xff] }
 0x14e   :  { %v6672_v5 = vcombine.high %v592_v0, %v596_v1 }
 0x150   :  { %3391 = vmatpush1.bf16.msra.mxu0 %v6605_v2  ;;  %3555 = vmatpush1.bf16.msra.mxu1 %v6607_v3  ;;  %v6661_v2 = vcombine.low %v583_v52, %v587_v54  ;;  %v6663_v3 = vcombine.low %v584_v55, %v588_v56  ;;  %v129_v52 = vld [vmem:[#allocation5 + $0x50] sm:$0xff]  ;;  %v7941_v55 = vcombine.low %v7925_v38, %v7925_v38  ;;  %v130_v56 = vld [vmem:[#allocation5 + $0x58] sm:$0xff] }
 0x151   :  { %3392 = vmatprep.subr.bf16.mxu0 %v6614_v4  ;;  %3556 = vmatprep.subr.bf16.mxu1 %v6616_v8  ;;  %v6670_v4 = vcombine.high %v591_v62, %v595_v63  ;;  %v600_v8 = vld [vmem:[#allocation5 + $0xf08] sm:$0xff]  ;;  %v133_v54 = vld [vmem:[#allocation5 + $0x70] sm:$0xff] }
 0x152   :  { %v6680_v14 = vcombine.high %v600_v8, %v604_v9  ;;  %v6209_v38 = vcombine.low %v129_v52, %v133_v54 }
 0x154   :  { %3393 = vmatpush1.bf16.msra.mxu0 %v6613_v10  ;;  %3557 = vmatpush1.bf16.msra.mxu1 %v6615_v11  ;;  %v6669_v10 = vcombine.low %v591_v62, %v595_v63  ;;  %v6671_v11 = vcombine.low %v592_v0, %v596_v1  ;;  %v137_v63 = vld [vmem:[#allocation5 + $0x90] sm:$0xff]  ;;  %v138_v1 = vld [vmem:[#allocation5 + $0x98] sm:$0xff] }
 0x155   :  { %3394 = vmatprep.subr.bf16.mxu0 %v6622_v13  ;;  %3558 = vmatprep.subr.bf16.mxu1 %v6624_v18  ;;  %v6678_v13 = vcombine.high %v599_v6, %v603_v7  ;;  %v608_v18 = vld [vmem:[#allocation5 + $0xf48] sm:$0xff]  ;;  %v141_v0 = vld [vmem:[#allocation5 + $0xb0] sm:$0xff] }
 0x156   :  { %v6688_v23 = vcombine.high %v608_v18, %v612_v19 }
 0x158   :  { %3395 = vmatpush1.bf16.msra.mxu0 %v6621_v20  ;;  %3559 = vmatpush1.bf16.msra.mxu1 %v6623_v21  ;;  %v6677_v20 = vcombine.low %v599_v6, %v603_v7  ;;  %v6679_v21 = vcombine.low %v600_v8, %v604_v9  ;;  %v145_v6 = vld [vmem:[#allocation5 + $0xd0] sm:$0xff]  ;;  %v146_v8 = vld [vmem:[#allocation5 + $0xd8] sm:$0xff] }
 0x159   :  { %3396 = vmatprep.subr.bf16.mxu0 %v6630_v22  ;;  %3560 = vmatprep.subr.bf16.mxu1 %v6632_v28  ;;  %v6686_v22 = vcombine.high %v607_v16, %v611_v17  ;;  %v616_v28 = vld [vmem:[#allocation5 + $0xf88] sm:$0xff]  ;;  %v149_v7 = vld [vmem:[#allocation5 + $0xf0] sm:$0xff]  ;;  %v150_v9 = vld [vmem:[#allocation5 + $0xf8] sm:$0xff] }
 0x15a   :  { %v6696_v33 = vcombine.high %v616_v28, %v620_v29 }
 0x15c   :  { %3397 = vmatpush1.bf16.msra.mxu0 %v6629_v30  ;;  %3561 = vmatpush1.bf16.msra.mxu1 %v6631_v31  ;;  %v6685_v30 = vcombine.low %v607_v16, %v611_v17  ;;  %v6687_v31 = vcombine.low %v608_v18, %v612_v19  ;;  %v153_v16 = vld [vmem:[#allocation5 + $0x110] sm:$0xff]  ;;  %v154_v18 = vld [vmem:[#allocation5 + $0x118] sm:$0xff] }
 0x15d   :  { %3398 = vmatprep.subr.bf16.mxu0 %v6638_v32  ;;  %3562 = vmatprep.subr.bf16.mxu1 %v6640_v36  ;;  %v6694_v32 = vcombine.high %v615_v26, %v619_v27  ;;  %v624_v36 = vld [vmem:[#allocation5 + $0xfc8] sm:$0xff]  ;;  %v157_v17 = vld [vmem:[#allocation5 + $0x130] sm:$0xff]  ;;  %v158_v19 = vld [vmem:[#allocation5 + $0x138] sm:$0xff] }
 0x15e   :  { %v6704_v43 = vcombine.high %v624_v36, %v628_v37 }
 0x160   :  { %3399 = vmatpush1.bf16.msra.mxu0 %v6637_v40  ;;  %3563 = vmatpush1.bf16.msra.mxu1 %v6639_v41  ;;  %v6693_v40 = vcombine.low %v615_v26, %v619_v27  ;;  %v6695_v41 = vcombine.low %v616_v28, %v620_v29  ;;  %v165_v26 = vld [vmem:[#allocation5 + $0x170] sm:$0xff]  ;;  %v162_v27 = vld [vmem:[#allocation5 + $0x158] sm:$0xff]  ;;  %v6233_v29 = vcombine.low %v153_v16, %v157_v17 }
 0x161   :  { %3400 = vmatprep.subr.bf16.mxu0 %v6646_v42  ;;  %3564 = vmatprep.subr.bf16.mxu1 %v6648_v46  ;;  %v6702_v42 = vcombine.high %v623_v15, %v627_v35  ;;  %v122_v46 = vld [vmem:[#allocation5 + $0x18] sm:$0xff] }
 0x162   :  { %v166_v28 = vld [vmem:[#allocation5 + $0x178] sm:$0xff] }
 0x164   :  { %3401 = vmatpush1.bf16.msra.mxu0 %v6645_v24  ;;  %3565 = vmatpush1.bf16.msra.mxu1 %v6647_v49  ;;  %v6701_v24 = vcombine.low %v623_v15, %v627_v35  ;;  %v6703_v49 = vcombine.low %v624_v36, %v628_v37  ;;  %v173_v15 = vld [vmem:[#allocation5 + $0x1b0] sm:$0xff]  ;;  %v170_v35 = vld [vmem:[#allocation5 + $0x198] sm:$0xff] }
 0x165   :  { %3402 = vmatprep.subr.bf16.mxu0 %v6654_v50  ;;  %3566 = vmatprep.subr.bf16.mxu1 %v6656_v51  ;;  %v6202_v50 = vcombine.high %v121_v44, %v125_v45  ;;  %v6204_v51 = vcombine.high %v122_v46, %v126_v47  ;;  %v174_v36 = vld [vmem:[#allocation5 + $0x1b8] sm:$0xff] }
 0x168   :  { %3403 = vmatpush1.bf16.msra.mxu0 %v6653_v58  ;;  %3567 = vmatpush1.bf16.msra.mxu1 %v6655_v59  ;;  %v134_v58 = vld [vmem:[#allocation5 + $0x78] sm:$0xff]  ;;  %v6201_v59 = vcombine.low %v121_v44, %v125_v45  ;;  %v181_v44 = vld [vmem:[#allocation5 + $0x1f0] sm:$0xff] }
 0x169   :  { %3404 = vmatprep.subr.bf16.mxu0 %v6662_v60  ;;  %3568 = vmatprep.subr.bf16.mxu1 %v6664_v61  ;;  %v6203_v60 = vcombine.low %v122_v46, %v126_v47  ;;  %v6210_v61 = vcombine.high %v129_v52, %v133_v54  ;;  %v6212_v62 = vcombine.high %v130_v56, %v134_v58  ;;  %v178_v45 = vld [vmem:[#allocation5 + $0x1d8] sm:$0xff]  ;;  %v189_v52 = vld [vmem:[#allocation5 + $0x230] sm:$0xff] }
 0x16a   :  { %v182_v46 = vld [vmem:[#allocation5 + $0x1f8] sm:$0xff] }
 0x16b   :  { %v186_v54 = vld [vmem:[#allocation5 + $0x218] sm:$0xff] }
 0x16c   :  { %3405 = vmatpush1.bf16.msra.mxu0 %v6661_v2  ;;  %3569 = vmatpush1.bf16.msra.mxu1 %v6663_v3  ;;  %v142_v2 = vld [vmem:[#allocation5 + $0xb8] sm:$0xff]  ;;  %v6211_v3 = vcombine.low %v130_v56, %v134_v58 }
 0x16d   :  { %3406 = vmatprep.subr.bf16.mxu0 %v6670_v4  ;;  %3570 = vmatprep.subr.bf16.mxu1 %v6672_v5  ;;  %v6218_v4 = vcombine.high %v137_v63, %v141_v0  ;;  %v6220_v5 = vcombine.high %v138_v1, %v142_v2  ;;  %v190_v56 = vld [vmem:[#allocation5 + $0x238] sm:$0xff] }
 0x170   :  { %3407 = vmatpush1.bf16.msra.mxu0 %v6669_v10  ;;  %3571 = vmatpush1.bf16.msra.mxu1 %v6671_v11  ;;  %v6217_v10 = vcombine.low %v137_v63, %v141_v0  ;;  %v6219_v11 = vcombine.low %v138_v1, %v142_v2  ;;  %v197_v63 = vld [vmem:[#allocation5 + $0x270] sm:$0xff]  ;;  %v194_v0 = vld [vmem:[#allocation5 + $0x258] sm:$0xff] }
 0x171   :  { %3408 = vmatprep.subr.bf16.mxu0 %v6678_v13  ;;  %3572 = vmatprep.subr.bf16.mxu1 %v6680_v14  ;;  %v6226_v13 = vcombine.high %v145_v6, %v149_v7  ;;  %v6228_v14 = vcombine.high %v146_v8, %v150_v9  ;;  %v198_v1 = vld [vmem:[#allocation5 + $0x278] sm:$0xff] }
 0x174   :  { %3409 = vmatpush1.bf16.msra.mxu0 %v6677_v20  ;;  %3573 = vmatpush1.bf16.msra.mxu1 %v6679_v21  ;;  %v6225_v20 = vcombine.low %v145_v6, %v149_v7  ;;  %v6227_v21 = vcombine.low %v146_v8, %v150_v9  ;;  %v205_v6 = vld [vmem:[#allocation5 + $0x2b0] sm:$0xff]  ;;  %v202_v7 = vld [vmem:[#allocation5 + $0x298] sm:$0xff] }
 0x175   :  { %3410 = vmatprep.subr.bf16.mxu0 %v6686_v22  ;;  %3574 = vmatprep.subr.bf16.mxu1 %v6688_v23  ;;  %v6234_v22 = vcombine.high %v153_v16, %v157_v17  ;;  %v161_v23 = vld [vmem:[#allocation5 + $0x150] sm:$0xff]  ;;  %v206_v8 = vld [vmem:[#allocation5 + $0x2b8] sm:$0xff] }
 0x176   :  { %v6241_v37 = vcombine.low %v161_v23, %v165_v26  ;;  %v213_v16 = vld [vmem:[#allocation5 + $0x2f0] sm:$0xff]  ;;  %v210_v17 = vld [vmem:[#allocation5 + $0x2d8] sm:$0xff] }
 0x178   :  { %3411 = vmatpush1.bf16.msra.mxu0 %v6685_v30  ;;  %3575 = vmatpush1.bf16.msra.mxu1 %v6687_v31  ;;  %v6235_v30 = vcombine.low %v154_v18, %v158_v19  ;;  %v6242_v31 = vcombine.high %v161_v23, %v165_v26  ;;  %v221_v23 = vld [vmem:[#allocation5 + $0x330] sm:$0xff]  ;;  %v218_v26 = vld [vmem:[#allocation5 + $0x318] sm:$0xff] }
 0x179   :  { %3412 = vmatprep.subr.bf16.mxu0 %v6694_v32  ;;  %3576 = vmatprep.subr.bf16.mxu1 %v6696_v33  ;;  %v6244_v32 = vcombine.high %v162_v27, %v166_v28  ;;  %v169_v33 = vld [vmem:[#allocation5 + $0x190] sm:$0xff] }
 0x17a   :  { %v6249_v47 = vcombine.low %v169_v33, %v173_v15 }
 0x17c   :  { %3413 = vmatpush1.bf16.msra.mxu0 %v6693_v40  ;;  %3577 = vmatpush1.bf16.msra.mxu1 %v6695_v41  ;;  %v6243_v40 = vcombine.low %v162_v27, %v166_v28  ;;  %v6250_v41 = vcombine.high %v169_v33, %v173_v15  ;;  %v222_v27 = vld [vmem:[#allocation5 + $0x338] sm:$0xff]  ;;  %v229_v33 = vld [vmem:[#allocation5 + $0x370] sm:$0xff] }
 0x17d   :  { %3414 = vmatprep.subr.bf16.mxu0 %v6702_v42  ;;  %3578 = vmatprep.subr.bf16.mxu1 %v6704_v43  ;;  %v6252_v42 = vcombine.high %v170_v35, %v174_v36  ;;  %v177_v43 = vld [vmem:[#allocation5 + $0x1d0] sm:$0xff]  ;;  %v226_v15 = vld [vmem:[#allocation5 + $0x358] sm:$0xff] }
 0x17e   :  { %v6257_v58 = vcombine.low %v177_v43, %v181_v44 }
 0x180   :  { %3415 = vmatpush1.bf16.msra.mxu0 %v6701_v24  ;;  %3579 = vmatpush1.bf16.msra.mxu1 %v6703_v49  ;;  %v6251_v24 = vcombine.low %v170_v35, %v174_v36  ;;  %v6258_v49 = vcombine.high %v177_v43, %v181_v44  ;;  %v230_v35 = vld [vmem:[#allocation5 + $0x378] sm:$0xff]  ;;  %v237_v43 = vld [vmem:[#allocation5 + $0x3b0] sm:$0xff] }
 0x181   :  { %3589 = vmatprep.subr.bf16.mxu0 %v6202_v50  ;;  %3753 = vmatprep.subr.bf16.mxu1 %v6204_v51  ;;  %v6260_v50 = vcombine.high %v178_v45, %v182_v46  ;;  %v185_v51 = vld [vmem:[#allocation5 + $0x210] sm:$0xff]  ;;  %v234_v44 = vld [vmem:[#allocation5 + $0x398] sm:$0xff] }
 0x182   :  { %v6265_v2 = vcombine.low %v185_v51, %v189_v52 }
 0x183   :  { %3417 = vmatmul.mubr.bf16.vlgmr.msra.gmra.mrb[0].mxu0 %v7941_v55  ;;  %3581 = vmatmul.mubr.bf16.vlgmr.msra.gmra.mrb[0].mxu1 %v7941_v55 }
 0x184   :  { %3590 = vmatpush1.bf16.msra.mxu0 %v6201_v59  ;;  %3754 = vmatpush1.bf16.msra.mxu1 %v6203_v60  ;;  %v6259_v59 = vcombine.low %v178_v45, %v182_v46  ;;  %v6266_v60 = vcombine.high %v185_v51, %v189_v52  ;;  %v238_v45 = vld [vmem:[#allocation5 + $0x3b8] sm:$0xff]  ;;  %v245_v51 = vld [vmem:[#allocation5 + $0x3f0] sm:$0xff] }
 0x185   :  { %3591 = vmatprep.subr.bf16.mxu0 %v6210_v61  ;;  %3755 = vmatprep.subr.bf16.mxu1 %v6212_v62  ;;  %v6268_v61 = vcombine.high %v186_v54, %v190_v56  ;;  %v193_v62 = vld [vmem:[#allocation5 + $0x250] sm:$0xff]  ;;  %v242_v52 = vld [vmem:[#allocation5 + $0x3d8] sm:$0xff] }
 0x186   :  { %3621 = vmatprep.mubr.bf16.mxu0 %v7893_v57  ;;  %3785 = vmatprep.mubr.bf16.mxu1 %v7893_v57  ;;  %v6236_v57 = vcombine.high %v154_v18, %v158_v19  ;;  %v6273_v9 = vcombine.low %v193_v62, %v197_v63  ;;  %v214_v18 = vld [vmem:[#allocation5 + $0x2f8] sm:$0xff] }
 0x188   :  { %3592 = vmatpush1.bf16.msra.mxu0 %v6209_v38  ;;  %3756 = vmatpush1.bf16.msra.mxu1 %v6211_v3  ;;  %v6267_v38 = vcombine.low %v186_v54, %v190_v56  ;;  %v6274_v3 = vcombine.high %v193_v62, %v197_v63  ;;  %v246_v54 = vld [vmem:[#allocation5 + $0x3f8] sm:$0xff]  ;;  %v253_v62 = vld [vmem:[#allocation5 + $0x430] sm:$0xff] }
 0x189   :  { %3593 = vmatprep.subr.bf16.mxu0 %v6218_v4  ;;  %3757 = vmatprep.subr.bf16.mxu1 %v6220_v5  ;;  %v6276_v4 = vcombine.high %v194_v0, %v198_v1  ;;  %v201_v5 = vld [vmem:[#allocation5 + $0x290] sm:$0xff]  ;;  %v250_v63 = vld [vmem:[#allocation5 + $0x418] sm:$0xff] }
 0x18a   :  { %v6281_v19 = vcombine.low %v201_v5, %v205_v6 }
 0x18c   :  { %3594 = vmatpush1.bf16.msra.mxu0 %v6217_v10  ;;  %3758 = vmatpush1.bf16.msra.mxu1 %v6219_v11  ;;  %v6275_v10 = vcombine.low %v194_v0, %v198_v1  ;;  %v6282_v11 = vcombine.high %v201_v5, %v205_v6  ;;  %v254_v0 = vld [vmem:[#allocation5 + $0x438] sm:$0xff]  ;;  %v261_v5 = vld [vmem:[#allocation5 + $0x470] sm:$0xff] }
 0x18d   :  { %3595 = vmatprep.subr.bf16.mxu0 %v6226_v13  ;;  %3759 = vmatprep.subr.bf16.mxu1 %v6228_v14  ;;  %v6284_v13 = vcombine.high %v202_v7, %v206_v8  ;;  %v209_v14 = vld [vmem:[#allocation5 + $0x2d0] sm:$0xff]  ;;  %v258_v6 = vld [vmem:[#allocation5 + $0x458] sm:$0xff] }
 0x18e   :  { %v6289_v28 = vcombine.low %v209_v14, %v213_v16 }
 0x190   :  { %3596 = vmatpush1.bf16.msra.mxu0 %v6225_v20  ;;  %3760 = vmatpush1.bf16.msra.mxu1 %v6227_v21  ;;  %v6283_v20 = vcombine.low %v202_v7, %v206_v8  ;;  %v6290_v21 = vcombine.high %v209_v14, %v213_v16  ;;  %v262_v7 = vld [vmem:[#allocation5 + $0x478] sm:$0xff]  ;;  %v269_v14 = vld [vmem:[#allocation5 + $0x4b0] sm:$0xff] }
 0x191   :  { %3597 = vmatprep.subr.bf16.mxu0 %v6234_v22  ;;  %3761 = vmatprep.subr.bf16.mxu1 %v6236_v57  ;;  %v6292_v22 = vcombine.high %v210_v17, %v214_v18  ;;  %v217_v57 = vld [vmem:[#allocation5 + $0x310] sm:$0xff]  ;;  %v266_v16 = vld [vmem:[#allocation5 + $0x498] sm:$0xff] }
 0x192   :  { %v6297_v36 = vcombine.low %v217_v57, %v221_v23 }
 0x194   :  { %3598 = vmatpush1.bf16.msra.mxu0 %v6233_v29  ;;  %3762 = vmatpush1.bf16.msra.mxu1 %v6235_v30  ;;  %v6291_v29 = vcombine.low %v210_v17, %v214_v18  ;;  %v6298_v30 = vcombine.high %v217_v57, %v221_v23  ;;  %v270_v17 = vld [vmem:[#allocation5 + $0x4b8] sm:$0xff]  ;;  %v277_v57 = vld [vmem:[#allocation5 + $0x4f0] sm:$0xff] }
 0x195   :  { %3599 = vmatprep.subr.bf16.mxu0 %v6242_v31  ;;  %3763 = vmatprep.subr.bf16.mxu1 %v6244_v32  ;;  %v6300_v31 = vcombine.high %v218_v26, %v222_v27  ;;  %v225_v32 = vld [vmem:[#allocation5 + $0x350] sm:$0xff]  ;;  %v274_v23 = vld [vmem:[#allocation5 + $0x4d8] sm:$0xff] }
 0x196   :  { %v6305_v46 = vcombine.low %v225_v32, %v229_v33 }
 0x198   :  { %3600 = vmatpush1.bf16.msra.mxu0 %v6241_v37  ;;  %3764 = vmatpush1.bf16.msra.mxu1 %v6243_v40  ;;  %v6299_v37 = vcombine.low %v218_v26, %v222_v27  ;;  %v6306_v40 = vcombine.high %v225_v32, %v229_v33  ;;  %v278_v26 = vld [vmem:[#allocation5 + $0x4f8] sm:$0xff] }
 0x199   :  { %3601 = vmatprep.subr.bf16.mxu0 %v6250_v41  ;;  %3765 = vmatprep.subr.bf16.mxu1 %v6252_v42  ;;  %v6308_v41 = vcombine.high %v226_v15, %v230_v35  ;;  %v233_v42 = vld [vmem:[#allocation5 + $0x390] sm:$0xff]  ;;  %v282_v32 = vld [vmem:[#allocation5 + $0x518] sm:$0xff] }
 0x19a   :  { %v6313_v56 = vcombine.low %v233_v42, %v237_v43  ;;  %v286_v33 = vld [vmem:[#allocation5 + $0x538] sm:$0xff] }
 0x19c   :  { %3602 = vmatpush1.bf16.msra.mxu0 %v6249_v47  ;;  %3766 = vmatpush1.bf16.msra.mxu1 %v6251_v24  ;;  %v6307_v47 = vcombine.low %v226_v15, %v230_v35  ;;  %v6314_v24 = vcombine.high %v233_v42, %v237_v43  ;;  %v6355_v35 = vcombine.low %v274_v23, %v278_v26  ;;  %v294_v42 = vld [vmem:[#allocation5 + $0x578] sm:$0xff] }
 0x19d   :  { %3603 = vmatprep.subr.bf16.mxu0 %v6258_v49  ;;  %3767 = vmatprep.subr.bf16.mxu1 %v6260_v50  ;;  %v6316_v49 = vcombine.high %v234_v44, %v238_v45  ;;  %v241_v50 = vld [vmem:[#allocation5 + $0x3d0] sm:$0xff] }
 0x19e   :  { %v6321_v1 = vcombine.low %v241_v50, %v245_v51 }
 0x1a0   :  { %3604 = vmatpush1.bf16.msra.mxu0 %v6257_v58  ;;  %3768 = vmatpush1.bf16.msra.mxu1 %v6259_v59  ;;  %v6315_v58 = vcombine.low %v234_v44, %v238_v45  ;;  %v6322_v59 = vcombine.high %v241_v50, %v245_v51  ;;  %v6363_v44 = vcombine.low %v282_v32, %v286_v33  ;;  %v302_v50 = vld [vmem:[#allocation5 + $0x5b8] sm:$0xff] }
 0x1a1   :  { %3605 = vmatprep.subr.bf16.mxu0 %v6266_v60  ;;  %3769 = vmatprep.subr.bf16.mxu1 %v6268_v61  ;;  %v6324_v60 = vcombine.high %v242_v52, %v246_v54  ;;  %v249_v61 = vld [vmem:[#allocation5 + $0x410] sm:$0xff] }
 0x1a2   :  { %v6329_v8 = vcombine.low %v249_v61, %v253_v62 }
 0x1a4   :  { %3606 = vmatpush1.bf16.msra.mxu0 %v6265_v2  ;;  %3770 = vmatpush1.bf16.msra.mxu1 %v6267_v38  ;;  %v6323_v2 = vcombine.low %v242_v52, %v246_v54  ;;  %v6330_v38 = vcombine.high %v249_v61, %v253_v62  ;;  %v310_v61 = vld [vmem:[#allocation5 + $0x5f8] sm:$0xff] }
 0x1a5   :  { %3607 = vmatprep.subr.bf16.mxu0 %v6274_v3  ;;  %3771 = vmatprep.subr.bf16.mxu1 %v6276_v4  ;;  %v6332_v3 = vcombine.high %v250_v63, %v254_v0  ;;  %v257_v4 = vld [vmem:[#allocation5 + $0x450] sm:$0xff] }
 0x1a6   :  { %v6337_v18 = vcombine.low %v257_v4, %v261_v5 }
 0x1a8   :  { %3608 = vmatpush1.bf16.msra.mxu0 %v6273_v9  ;;  %3772 = vmatpush1.bf16.msra.mxu1 %v6275_v10  ;;  %v6331_v9 = vcombine.low %v250_v63, %v254_v0  ;;  %v6338_v10 = vcombine.high %v257_v4, %v261_v5  ;;  %v318_v4 = vld [vmem:[#allocation5 + $0x638] sm:$0xff] }
 0x1a9   :  { %3609 = vmatprep.subr.bf16.mxu0 %v6282_v11  ;;  %3773 = vmatprep.subr.bf16.mxu1 %v6284_v13  ;;  %v6340_v11 = vcombine.high %v258_v6, %v262_v7  ;;  %v265_v13 = vld [vmem:[#allocation5 + $0x490] sm:$0xff] }
 0x1aa   :  { %v6345_v27 = vcombine.low %v265_v13, %v269_v14 }
 0x1ac   :  { %3610 = vmatpush1.bf16.msra.mxu0 %v6281_v19  ;;  %3774 = vmatpush1.bf16.msra.mxu1 %v6283_v20  ;;  %v6339_v19 = vcombine.low %v258_v6, %v262_v7  ;;  %v6346_v20 = vcombine.high %v265_v13, %v269_v14  ;;  %v326_v13 = vld [vmem:[#allocation5 + $0x678] sm:$0xff] }
 0x1ad   :  { %3611 = vmatprep.subr.bf16.mxu0 %v6290_v21  ;;  %3775 = vmatprep.subr.bf16.mxu1 %v6292_v22  ;;  %v6348_v21 = vcombine.high %v266_v16, %v270_v17  ;;  %v273_v22 = vld [vmem:[#allocation5 + $0x4d0] sm:$0xff] }
 0x1ae   :  { %v6353_v15 = vcombine.low %v273_v22, %v277_v57 }
 0x1b0   :  { %3612 = vmatpush1.bf16.msra.mxu0 %v6289_v28  ;;  %3776 = vmatpush1.bf16.msra.mxu1 %v6291_v29  ;;  %v6354_v28 = vcombine.high %v273_v22, %v277_v57  ;;  %v6356_v29 = vcombine.high %v274_v23, %v278_v26  ;;  %v334_v22 = vld [vmem:[#allocation5 + $0x6b8] sm:$0xff] }
 0x1b1   :  { %3613 = vmatprep.subr.bf16.mxu0 %v6298_v30  ;;  %3777 = vmatprep.subr.bf16.mxu1 %v6300_v31  ;;  %v281_v30 = vld [vmem:[#allocation5 + $0x510] sm:$0xff] }
 0x1b2   :  { %v285_v31 = vld [vmem:[#allocation5 + $0x530] sm:$0xff] }
 0x1b3   :  { %v6361_v43 = vcombine.low %v281_v30, %v285_v31 }
 0x1b4   :  { %3614 = vmatpush1.bf16.msra.mxu0 %v6297_v36  ;;  %3778 = vmatpush1.bf16.msra.mxu1 %v6299_v37  ;;  %v6362_v36 = vcombine.high %v281_v30, %v285_v31  ;;  %v289_v37 = vld [vmem:[#allocation5 + $0x550] sm:$0xff]  ;;  %v342_v30 = vld [vmem:[#allocation5 + $0x6f8] sm:$0xff] }
 0x1b5   :  { %3615 = vmatprep.subr.bf16.mxu0 %v6306_v40  ;;  %3779 = vmatprep.subr.bf16.mxu1 %v6308_v41  ;;  %v293_v40 = vld [vmem:[#allocation5 + $0x570] sm:$0xff]  ;;  %v290_v41 = vld [vmem:[#allocation5 + $0x558] sm:$0xff] }
 0x1b6   :  { %v6370_v45 = vcombine.high %v289_v37, %v293_v40  ;;  %v6369_v51 = vcombine.low %v289_v37, %v293_v40  ;;  %v6371_v52 = vcombine.low %v290_v41, %v294_v42  ;;  %v350_v37 = vld [vmem:[#allocation5 + $0x738] sm:$0xff] }
 0x1b8   :  { %3616 = vmatpush1.bf16.msra.mxu0 %v6305_v46  ;;  %3780 = vmatpush1.bf16.msra.mxu1 %v6307_v47  ;;  %v6372_v46 = vcombine.high %v290_v41, %v294_v42  ;;  %v297_v47 = vld [vmem:[#allocation5 + $0x590] sm:$0xff] }
 0x1b9   :  { %3617 = vmatprep.subr.bf16.mxu0 %v6314_v24  ;;  %3781 = vmatprep.subr.bf16.mxu1 %v6316_v49  ;;  %v301_v24 = vld [vmem:[#allocation5 + $0x5b0] sm:$0xff]  ;;  %v298_v49 = vld [vmem:[#allocation5 + $0x598] sm:$0xff] }
 0x1ba   :  { %v6378_v54 = vcombine.high %v297_v47, %v301_v24  ;;  %v6377_v62 = vcombine.low %v297_v47, %v301_v24  ;;  %v6379_v63 = vcombine.low %v298_v49, %v302_v50  ;;  %v358_v47 = vld [vmem:[#allocation5 + $0x778] sm:$0xff] }
 0x1bc   :  { %3618 = vmatpush1.bf16.msra.mxu0 %v6313_v56  ;;  %3782 = vmatpush1.bf16.msra.mxu1 %v6315_v58  ;;  %v6380_v56 = vcombine.high %v298_v49, %v302_v50  ;;  %v305_v58 = vld [vmem:[#allocation5 + $0x5d0] sm:$0xff] }
 0x1bd   :  { %3619 = vmatprep.subr.bf16.mxu0 %v6322_v59  ;;  %3783 = vmatprep.subr.bf16.mxu1 %v6324_v60  ;;  %v309_v59 = vld [vmem:[#allocation5 + $0x5f0] sm:$0xff]  ;;  %v306_v60 = vld [vmem:[#allocation5 + $0x5d8] sm:$0xff] }
 0x1be   :  { %v6386_v0 = vcombine.high %v305_v58, %v309_v59  ;;  %v6385_v5 = vcombine.low %v305_v58, %v309_v59  ;;  %v6387_v6 = vcombine.low %v306_v60, %v310_v61  ;;  %v366_v58 = vld [vmem:[#allocation5 + $0x7b8] sm:$0xff] }
 0x1c0   :  { %3620 = vmatpush1.bf16.msra.mxu0 %v6321_v1  ;;  %3784 = vmatpush1.bf16.msra.mxu1 %v6323_v2  ;;  %v6388_v1 = vcombine.high %v306_v60, %v310_v61  ;;  %v313_v2 = vld [vmem:[#allocation5 + $0x610] sm:$0xff] }
 0x1c1   :  { %3630 = vmatprep.subr.bf16.mxu0 %v6330_v38  ;;  %3794 = vmatprep.subr.bf16.mxu1 %v6332_v3  ;;  %v317_v38 = vld [vmem:[#allocation5 + $0x630] sm:$0xff]  ;;  %v314_v3 = vld [vmem:[#allocation5 + $0x618] sm:$0xff] }
 0x1c2   :  { %v6394_v7 = vcombine.high %v313_v2, %v317_v38  ;;  %v6393_v14 = vcombine.low %v313_v2, %v317_v38  ;;  %v374_v2 = vld [vmem:[#allocation5 + $0x7f8] sm:$0xff] }
 0x1c3   :  { %3622 = vmatmul.mubr.bf16.vlgmr.msra.gmra.mrb[4].mxu0 %v7899_v12  ;;  %3786 = vmatmul.mubr.bf16.vlgmr.msra.gmra.mrb[4].mxu1 %v7899_v12  ;;  %v6347_v12 = vcombine.low %v266_v16, %v270_v17  ;;  %v6395_v16 = vcombine.low %v314_v3, %v318_v4 }
 0x1c4   :  { %3631 = vmatpush1.bf16.msra.mxu0 %v6329_v8  ;;  %3795 = vmatpush1.bf16.msra.mxu1 %v6331_v9  ;;  %v6396_v8 = vcombine.high %v314_v3, %v318_v4  ;;  %v321_v9 = vld [vmem:[#allocation5 + $0x650] sm:$0xff] }
 0x1c5   :  { %3632 = vmatprep.subr.bf16.mxu0 %v6338_v10  ;;  %3796 = vmatprep.subr.bf16.mxu1 %v6340_v11  ;;  %v325_v10 = vld [vmem:[#allocation5 + $0x670] sm:$0xff]  ;;  %v322_v11 = vld [vmem:[#allocation5 + $0x658] sm:$0xff] }
 0x1c6   :  { %3662 = vmatprep.mubr.bf16.mxu0 %v7905_v53  ;;  %3826 = vmatprep.mubr.bf16.mxu1 %v7905_v53  ;;  %v6364_v53 = vcombine.high %v282_v32, %v286_v33  ;;  %v6402_v17 = vcombine.high %v321_v9, %v325_v10  ;;  %v6401_v57 = vcombine.low %v321_v9, %v325_v10  ;;  %v382_v9 = vld [vmem:[#allocation5 + $0x838] sm:$0xff] }
 0x1c7   :  { %v6403_v23 = vcombine.low %v322_v11, %v326_v13 }
 0x1c8   :  { %3633 = vmatpush1.bf16.msra.mxu0 %v6337_v18  ;;  %3797 = vmatpush1.bf16.msra.mxu1 %v6339_v19  ;;  %v6404_v18 = vcombine.high %v322_v11, %v326_v13  ;;  %v329_v19 = vld [vmem:[#allocation5 + $0x690] sm:$0xff] }
 0x1c9   :  { %3634 = vmatprep.subr.bf16.mxu0 %v6346_v20  ;;  %3798 = vmatprep.subr.bf16.mxu1 %v6348_v21  ;;  %v333_v20 = vld [vmem:[#allocation5 + $0x6b0] sm:$0xff]  ;;  %v330_v21 = vld [vmem:[#allocation5 + $0x698] sm:$0xff] }
 0x1ca   :  { %v6410_v26 = vcombine.high %v329_v19, %v333_v20  ;;  %v6409_v31 = vcombine.low %v329_v19, %v333_v20  ;;  %v6411_v32 = vcombine.low %v330_v21, %v334_v22  ;;  %v390_v19 = vld [vmem:[#allocation5 + $0x878] sm:$0xff] }
 0x1cc   :  { %3635 = vmatpush1.bf16.msra.mxu0 %v6345_v27  ;;  %3799 = vmatpush1.bf16.msra.mxu1 %v6347_v12  ;;  %v6412_v27 = vcombine.high %v330_v21, %v334_v22  ;;  %v337_v12 = vld [vmem:[#allocation5 + $0x6d0] sm:$0xff] }
 0x1cd   :  { %3636 = vmatprep.subr.bf16.mxu0 %v6354_v28  ;;  %3800 = vmatprep.subr.bf16.mxu1 %v6356_v29  ;;  %v341_v28 = vld [vmem:[#allocation5 + $0x6f0] sm:$0xff]  ;;  %v338_v29 = vld [vmem:[#allocation5 + $0x6d8] sm:$0xff] }
 0x1ce   :  { %v6418_v33 = vcombine.high %v337_v12, %v341_v28  ;;  %v6417_v40 = vcombine.low %v337_v12, %v341_v28  ;;  %v6419_v41 = vcombine.low %v338_v29, %v342_v30  ;;  %v398_v12 = vld [vmem:[#allocation5 + $0x8b8] sm:$0xff] }
 0x1d0   :  { %3637 = vmatpush1.bf16.msra.mxu0 %v6353_v15  ;;  %3801 = vmatpush1.bf16.msra.mxu1 %v6355_v35  ;;  %v6420_v15 = vcombine.high %v338_v29, %v342_v30  ;;  %v345_v35 = vld [vmem:[#allocation5 + $0x710] sm:$0xff] }
 0x1d1   :  { %3638 = vmatprep.subr.bf16.mxu0 %v6362_v36  ;;  %3802 = vmatprep.subr.bf16.mxu1 %v6364_v53  ;;  %v349_v36 = vld [vmem:[#allocation5 + $0x730] sm:$0xff]  ;;  %v346_v53 = vld [vmem:[#allocation5 + $0x718] sm:$0xff] }
 0x1d2   :  { %v6426_v42 = vcombine.high %v345_v35, %v349_v36  ;;  %v6425_v24 = vcombine.low %v345_v35, %v349_v36  ;;  %v6427_v49 = vcombine.low %v346_v53, %v350_v37  ;;  %v406_v35 = vld [vmem:[#allocation5 + $0x8f8] sm:$0xff] }
 0x1d4   :  { %3639 = vmatpush1.bf16.msra.mxu0 %v6361_v43  ;;  %3803 = vmatpush1.bf16.msra.mxu1 %v6363_v44  ;;  %v6428_v43 = vcombine.high %v346_v53, %v350_v37  ;;  %v353_v44 = vld [vmem:[#allocation5 + $0x750] sm:$0xff] }
 0x1d5   :  { %3640 = vmatprep.subr.bf16.mxu0 %v6370_v45  ;;  %3804 = vmatprep.subr.bf16.mxu1 %v6372_v46  ;;  %v357_v45 = vld [vmem:[#allocation5 + $0x770] sm:$0xff]  ;;  %v354_v46 = vld [vmem:[#allocation5 + $0x758] sm:$0xff] }
 0x1d6   :  { %v6434_v50 = vcombine.high %v353_v44, %v357_v45  ;;  %v6433_v59 = vcombine.low %v353_v44, %v357_v45  ;;  %v6435_v60 = vcombine.low %v354_v46, %v358_v47 }
 0x1d8   :  { %3641 = vmatpush1.bf16.msra.mxu0 %v6369_v51  ;;  %3805 = vmatpush1.bf16.msra.mxu1 %v6371_v52  ;;  %v6436_v51 = vcombine.high %v354_v46, %v358_v47  ;;  %v361_v52 = vld [vmem:[#allocation5 + $0x790] sm:$0xff] }
 0x1d9   :  { %3642 = vmatprep.subr.bf16.mxu0 %v6378_v54  ;;  %3806 = vmatprep.subr.bf16.mxu1 %v6380_v56  ;;  %v365_v54 = vld [vmem:[#allocation5 + $0x7b0] sm:$0xff]  ;;  %v362_v56 = vld [vmem:[#allocation5 + $0x798] sm:$0xff] }
 0x1da   :  { %v6442_v61 = vcombine.high %v361_v52, %v365_v54  ;;  %v6441_v38 = vcombine.low %v361_v52, %v365_v54  ;;  %v6443_v3 = vcombine.low %v362_v56, %v366_v58  ;;  %v417_v47 = vld [vmem:[#allocation5 + $0x950] sm:$0xff] }
 0x1dc   :  { %3643 = vmatpush1.bf16.msra.mxu0 %v6377_v62  ;;  %3807 = vmatpush1.bf16.msra.mxu1 %v6379_v63  ;;  %v6444_v62 = vcombine.high %v362_v56, %v366_v58  ;;  %v369_v63 = vld [vmem:[#allocation5 + $0x7d0] sm:$0xff] }
 0x1dd   :  { %3644 = vmatprep.subr.bf16.mxu0 %v6386_v0  ;;  %3808 = vmatprep.subr.bf16.mxu1 %v6388_v1  ;;  %v373_v0 = vld [vmem:[#allocation5 + $0x7f0] sm:$0xff]  ;;  %v370_v1 = vld [vmem:[#allocation5 + $0x7d8] sm:$0xff] }
 0x1de   :  { %v6450_v4 = vcombine.high %v369_v63, %v373_v0  ;;  %v6449_v10 = vcombine.low %v369_v63, %v373_v0  ;;  %v6451_v11 = vcombine.low %v370_v1, %v374_v2  ;;  %v425_v58 = vld [vmem:[#allocation5 + $0x990] sm:$0xff] }
 0x1e0   :  { %3645 = vmatpush1.bf16.msra.mxu0 %v6385_v5  ;;  %3809 = vmatpush1.bf16.msra.mxu1 %v6387_v6  ;;  %v6452_v5 = vcombine.high %v370_v1, %v374_v2  ;;  %v377_v6 = vld [vmem:[#allocation5 + $0x810] sm:$0xff] }
 0x1e1   :  { %3646 = vmatprep.subr.bf16.mxu0 %v6394_v7  ;;  %3810 = vmatprep.subr.bf16.mxu1 %v6396_v8  ;;  %v381_v7 = vld [vmem:[#allocation5 + $0x830] sm:$0xff]  ;;  %v378_v8 = vld [vmem:[#allocation5 + $0x818] sm:$0xff] }
 0x1e2   :  { %v6458_v13 = vcombine.high %v377_v6, %v381_v7  ;;  %v6457_v20 = vcombine.low %v377_v6, %v381_v7  ;;  %v6459_v21 = vcombine.low %v378_v8, %v382_v9  ;;  %v433_v2 = vld [vmem:[#allocation5 + $0x9d0] sm:$0xff] }
 0x1e4   :  { %3647 = vmatpush1.bf16.msra.mxu0 %v6393_v14  ;;  %3811 = vmatpush1.bf16.msra.mxu1 %v6395_v16  ;;  %v6460_v14 = vcombine.high %v378_v8, %v382_v9  ;;  %v385_v16 = vld [vmem:[#allocation5 + $0x850] sm:$0xff] }
 0x1e5   :  { %3648 = vmatprep.subr.bf16.mxu0 %v6402_v17  ;;  %3812 = vmatprep.subr.bf16.mxu1 %v6404_v18  ;;  %v389_v17 = vld [vmem:[#allocation5 + $0x870] sm:$0xff]  ;;  %v386_v18 = vld [vmem:[#allocation5 + $0x858] sm:$0xff] }
 0x1e6   :  { %v6466_v22 = vcombine.high %v385_v16, %v389_v17  ;;  %v6465_v28 = vcombine.low %v385_v16, %v389_v17  ;;  %v6467_v29 = vcombine.low %v386_v18, %v390_v19  ;;  %v441_v9 = vld [vmem:[#allocation5 + $0xa10] sm:$0xff] }
 0x1e8   :  { %3649 = vmatpush1.bf16.msra.mxu0 %v6401_v57  ;;  %3813 = vmatpush1.bf16.msra.mxu1 %v6403_v23  ;;  %v6468_v57 = vcombine.high %v386_v18, %v390_v19  ;;  %v393_v23 = vld [vmem:[#allocation5 + $0x890] sm:$0xff] }
 0x1e9   :  { %3650 = vmatprep.subr.bf16.mxu0 %v6410_v26  ;;  %3814 = vmatprep.subr.bf16.mxu1 %v6412_v27  ;;  %v397_v26 = vld [vmem:[#allocation5 + $0x8b0] sm:$0xff]  ;;  %v394_v27 = vld [vmem:[#allocation5 + $0x898] sm:$0xff] }
 0x1ea   :  { %v6474_v30 = vcombine.high %v393_v23, %v397_v26  ;;  %v6473_v36 = vcombine.low %v393_v23, %v397_v26  ;;  %v449_v19 = vld [vmem:[#allocation5 + $0xa50] sm:$0xff] }
 0x1ec   :  { %3651 = vmatpush1.bf16.msra.mxu0 %v6409_v31  ;;  %3815 = vmatpush1.bf16.msra.mxu1 %v6411_v32  ;;  %v6476_v31 = vcombine.high %v394_v27, %v398_v12  ;;  %v401_v32 = vld [vmem:[#allocation5 + $0x8d0] sm:$0xff] }
 0x1ed   :  { %3652 = vmatprep.subr.bf16.mxu0 %v6418_v33  ;;  %3816 = vmatprep.subr.bf16.mxu1 %v6420_v15  ;;  %v405_v33 = vld [vmem:[#allocation5 + $0x8f0] sm:$0xff]  ;;  %v402_v15 = vld [vmem:[#allocation5 + $0x8d8] sm:$0xff] }
 0x1ee   :  { %v6482_v53 = vcombine.high %v401_v32, %v405_v33  ;;  %v6484_v37 = vcombine.high %v402_v15, %v406_v35  ;;  %v6481_v44 = vcombine.low %v401_v32, %v405_v33  ;;  %v6483_v45 = vcombine.low %v402_v15, %v406_v35  ;;  %v465_v35 = vld [vmem:[#allocation5 + $0xad0] sm:$0xff] }
 0x1f0   :  { %3653 = vmatpush1.bf16.msra.mxu0 %v6417_v40  ;;  %3817 = vmatpush1.bf16.msra.mxu1 %v6419_v41  ;;  %v409_v40 = vld [vmem:[#allocation5 + $0x910] sm:$0xff] }
 0x1f1   :  { %3654 = vmatprep.subr.bf16.mxu0 %v6426_v42  ;;  %3818 = vmatprep.subr.bf16.mxu1 %v6428_v43  ;;  %v413_v41 = vld [vmem:[#allocation5 + $0x930] sm:$0xff]  ;;  %v410_v42 = vld [vmem:[#allocation5 + $0x918] sm:$0xff] }
 0x1f2   :  { %v414_v43 = vld [vmem:[#allocation5 + $0x938] sm:$0xff]  ;;  %v6490_v46 = vcombine.high %v409_v40, %v413_v41 }
 0x1f3   :  { %v6491_v52 = vcombine.low %v410_v42, %v414_v43 }
 0x1f4   :  { %3655 = vmatpush1.bf16.msra.mxu0 %v6425_v24  ;;  %3819 = vmatpush1.bf16.msra.mxu1 %v6427_v49  ;;  %v421_v24 = vld [vmem:[#allocation5 + $0x970] sm:$0xff]  ;;  %v418_v49 = vld [vmem:[#allocation5 + $0x958] sm:$0xff] }
 0x1f5   :  { %3656 = vmatprep.subr.bf16.mxu0 %v6434_v50  ;;  %3820 = vmatprep.subr.bf16.mxu1 %v6436_v51  ;;  %v422_v50 = vld [vmem:[#allocation5 + $0x978] sm:$0xff]  ;;  %v6489_v51 = vcombine.low %v409_v40, %v413_v41  ;;  %v6498_v54 = vcombine.high %v417_v47, %v421_v24 }
 0x1f6   :  { %v6500_v56 = vcombine.high %v418_v49, %v422_v50  ;;  %v6499_v63 = vcombine.low %v418_v49, %v422_v50  ;;  %v481_v50 = vld [vmem:[#allocation5 + $0xb50] sm:$0xff] }
 0x1f8   :  { %3657 = vmatpush1.bf16.msra.mxu0 %v6433_v59  ;;  %3821 = vmatpush1.bf16.msra.mxu1 %v6435_v60  ;;  %v429_v59 = vld [vmem:[#allocation5 + $0x9b0] sm:$0xff]  ;;  %v426_v60 = vld [vmem:[#allocation5 + $0x998] sm:$0xff] }
 0x1f9   :  { %3658 = vmatprep.subr.bf16.mxu0 %v6442_v61  ;;  %3822 = vmatprep.subr.bf16.mxu1 %v6444_v62  ;;  %v430_v61 = vld [vmem:[#allocation5 + $0x9b8] sm:$0xff]  ;;  %v6497_v62 = vcombine.low %v417_v47, %v421_v24  ;;  %v6506_v0 = vcombine.high %v425_v58, %v429_v59 }
 0x1fa   :  { %v6508_v1 = vcombine.high %v426_v60, %v430_v61  ;;  %v6507_v6 = vcombine.low %v426_v60, %v430_v61  ;;  %v489_v61 = vld [vmem:[#allocation5 + $0xb90] sm:$0xff] }
 0x1fc   :  { %3659 = vmatpush1.bf16.msra.mxu0 %v6441_v38  ;;  %3823 = vmatpush1.bf16.msra.mxu1 %v6443_v3  ;;  %v437_v38 = vld [vmem:[#allocation5 + $0x9f0] sm:$0xff]  ;;  %v434_v3 = vld [vmem:[#allocation5 + $0x9d8] sm:$0xff] }
 0x1fd   :  { %3660 = vmatprep.subr.bf16.mxu0 %v6450_v4  ;;  %3824 = vmatprep.subr.bf16.mxu1 %v6452_v5  ;;  %v438_v4 = vld [vmem:[#allocation5 + $0x9f8] sm:$0xff]  ;;  %v6505_v5 = vcombine.low %v425_v58, %v429_v59  ;;  %v6514_v7 = vcombine.high %v433_v2, %v437_v38 }
 0x1fe   :  { %v6516_v8 = vcombine.high %v434_v3, %v438_v4  ;;  %v6515_v16 = vcombine.low %v434_v3, %v438_v4  ;;  %v497_v4 = vld [vmem:[#allocation5 + $0xbd0] sm:$0xff] }
 0x200   :  { %3661 = vmatpush1.bf16.msra.mxu0 %v6449_v10  ;;  %3825 = vmatpush1.bf16.msra.mxu1 %v6451_v11  ;;  %v445_v10 = vld [vmem:[#allocation5 + $0xa30] sm:$0xff]  ;;  %v442_v11 = vld [vmem:[#allocation5 + $0xa18] sm:$0xff] }
 0x201   :  { %3671 = vmatprep.subr.bf16.mxu0 %v6458_v13  ;;  %3835 = vmatprep.subr.bf16.mxu1 %v6460_v14  ;;  %v446_v13 = vld [vmem:[#allocation5 + $0xa38] sm:$0xff]  ;;  %v6513_v14 = vcombine.low %v433_v2, %v437_v38  ;;  %v6522_v17 = vcombine.high %v441_v9, %v445_v10 }
 0x202   :  { %v6524_v18 = vcombine.high %v442_v11, %v446_v13  ;;  %v6523_v23 = vcombine.low %v442_v11, %v446_v13  ;;  %v505_v13 = vld [vmem:[#allocation5 + $0xc10] sm:$0xff] }
 0x203   :  { %3663 = vmatmul.mubr.bf16.vlgmr.msra.gmra.mrb[4].mxu0 %v7915_v25  ;;  %3827 = vmatmul.mubr.bf16.vlgmr.msra.gmra.mrb[4].mxu1 %v7915_v25  ;;  %v6475_v25 = vcombine.low %v394_v27, %v398_v12  ;;  %v457_v12 = vld [vmem:[#allocation5 + $0xa90] sm:$0xff] }
 0x204   :  { %3672 = vmatpush1.bf16.msra.mxu0 %v6457_v20  ;;  %3836 = vmatpush1.bf16.msra.mxu1 %v6459_v21  ;;  %v453_v20 = vld [vmem:[#allocation5 + $0xa70] sm:$0xff]  ;;  %v450_v21 = vld [vmem:[#allocation5 + $0xa58] sm:$0xff] }
 0x205   :  { %3673 = vmatprep.subr.bf16.mxu0 %v6466_v22  ;;  %3837 = vmatprep.subr.bf16.mxu1 %v6468_v57  ;;  %v454_v22 = vld [vmem:[#allocation5 + $0xa78] sm:$0xff]  ;;  %v6521_v57 = vcombine.low %v441_v9, %v445_v10  ;;  %v6530_v26 = vcombine.high %v449_v19, %v453_v20 }
 0x206   :  { %3703 = vmatprep.mubr.bf16.mxu0 %v7919_v34  ;;  %3867 = vmatprep.mubr.bf16.mxu1 %v7919_v34  ;;  %v6492_v34 = vcombine.high %v410_v42, %v414_v43  ;;  %v6532_v27 = vcombine.high %v450_v21, %v454_v22  ;;  %v6531_v32 = vcombine.low %v450_v21, %v454_v22  ;;  %v473_v43 = vld [vmem:[#allocation5 + $0xb10] sm:$0xff] }
 0x207   :  { %v513_v22 = vld [vmem:[#allocation5 + $0xc50] sm:$0xff] }
 0x208   :  { %3674 = vmatpush1.bf16.msra.mxu0 %v6465_v28  ;;  %3838 = vmatpush1.bf16.msra.mxu1 %v6467_v29  ;;  %v461_v28 = vld [vmem:[#allocation5 + $0xab0] sm:$0xff]  ;;  %v458_v29 = vld [vmem:[#allocation5 + $0xa98] sm:$0xff] }
 0x209   :  { %3675 = vmatprep.subr.bf16.mxu0 %v6474_v30  ;;  %3839 = vmatprep.subr.bf16.mxu1 %v6476_v31  ;;  %v462_v30 = vld [vmem:[#allocation5 + $0xab8] sm:$0xff]  ;;  %v6529_v31 = vcombine.low %v449_v19, %v453_v20  ;;  %v6538_v33 = vcombine.high %v457_v12, %v461_v28 }
 0x20a   :  { %v6540_v15 = vcombine.high %v458_v29, %v462_v30  ;;  %v6539_v40 = vcombine.low %v458_v29, %v462_v30  ;;  %v521_v30 = vld [vmem:[#allocation5 + $0xc90] sm:$0xff] }
 0x20c   :  { %3676 = vmatpush1.bf16.msra.mxu0 %v6473_v36  ;;  %3840 = vmatpush1.bf16.msra.mxu1 %v6475_v25  ;;  %v469_v36 = vld [vmem:[#allocation5 + $0xaf0] sm:$0xff]  ;;  %v466_v25 = vld [vmem:[#allocation5 + $0xad8] sm:$0xff] }
 0x20d   :  { %3677 = vmatprep.subr.bf16.mxu0 %v6482_v53  ;;  %3841 = vmatprep.subr.bf16.mxu1 %v6484_v37  ;;  %v470_v53 = vld [vmem:[#allocation5 + $0xaf8] sm:$0xff]  ;;  %v6537_v37 = vcombine.low %v457_v12, %v461_v28  ;;  %v6546_v41 = vcombine.high %v465_v35, %v469_v36 }
 0x20e   :  { %v6548_v42 = vcombine.high %v466_v25, %v470_v53  ;;  %v6547_v47 = vcombine.low %v466_v25, %v470_v53  ;;  %v529_v53 = vld [vmem:[#allocation5 + $0xcd0] sm:$0xff] }
 0x210   :  { %3678 = vmatpush1.bf16.msra.mxu0 %v6481_v44  ;;  %3842 = vmatpush1.bf16.msra.mxu1 %v6483_v45  ;;  %v477_v44 = vld [vmem:[#allocation5 + $0xb30] sm:$0xff]  ;;  %v474_v45 = vld [vmem:[#allocation5 + $0xb18] sm:$0xff] }
 0x211   :  { %3679 = vmatprep.subr.bf16.mxu0 %v6490_v46  ;;  %3843 = vmatprep.subr.bf16.mxu1 %v6492_v34  ;;  %v478_v46 = vld [vmem:[#allocation5 + $0xb38] sm:$0xff]  ;;  %v6545_v34 = vcombine.low %v465_v35, %v469_v36  ;;  %v6554_v24 = vcombine.high %v473_v43, %v477_v44 }
 0x212   :  { %v6556_v49 = vcombine.high %v474_v45, %v478_v46  ;;  %v6555_v58 = vcombine.low %v474_v45, %v478_v46  ;;  %v537_v45 = vld [vmem:[#allocation5 + $0xd10] sm:$0xff] }
 0x213   :  { %v541_v46 = vld [vmem:[#allocation5 + $0xd30] sm:$0xff] }
 0x214   :  { %3680 = vmatpush1.bf16.msra.mxu0 %v6489_v51  ;;  %3844 = vmatpush1.bf16.msra.mxu1 %v6491_v52  ;;  %v485_v51 = vld [vmem:[#allocation5 + $0xb70] sm:$0xff]  ;;  %v482_v52 = vld [vmem:[#allocation5 + $0xb58] sm:$0xff] }
 0x215   :  { %3681 = vmatprep.subr.bf16.mxu0 %v6498_v54  ;;  %3845 = vmatprep.subr.bf16.mxu1 %v6500_v56  ;;  %v486_v54 = vld [vmem:[#allocation5 + $0xb78] sm:$0xff]  ;;  %v6553_v56 = vcombine.low %v473_v43, %v477_v44  ;;  %v6562_v59 = vcombine.high %v481_v50, %v485_v51 }
 0x216   :  { %v6564_v60 = vcombine.high %v482_v52, %v486_v54  ;;  %v6563_v2 = vcombine.low %v482_v52, %v486_v54  ;;  %v549_v52 = vld [vmem:[#allocation5 + $0xd70] sm:$0xff]  ;;  %v546_v54 = vld [vmem:[#allocation5 + $0xd58] sm:$0xff] }
 0x218   :  { %3682 = vmatpush1.bf16.msra.mxu0 %v6497_v62  ;;  %3846 = vmatpush1.bf16.msra.mxu1 %v6499_v63  ;;  %v493_v62 = vld [vmem:[#allocation5 + $0xbb0] sm:$0xff]  ;;  %v490_v63 = vld [vmem:[#allocation5 + $0xb98] sm:$0xff] }
 0x219   :  { %3683 = vmatprep.subr.bf16.mxu0 %v6506_v0  ;;  %3847 = vmatprep.subr.bf16.mxu1 %v6508_v1  ;;  %v494_v0 = vld [vmem:[#allocation5 + $0xbb8] sm:$0xff]  ;;  %v6561_v1 = vcombine.low %v481_v50, %v485_v51  ;;  %v6570_v38 = vcombine.high %v489_v61, %v493_v62  ;;  %v6618_v50 = vcombine.high %v537_v45, %v541_v46  ;;  %v545_v51 = vld [vmem:[#allocation5 + $0xd50] sm:$0xff] }
 0x21a   :  { %v6572_v3 = vcombine.high %v490_v63, %v494_v0  ;;  %v6571_v9 = vcombine.low %v490_v63, %v494_v0  ;;  %v557_v63 = vld [vmem:[#allocation5 + $0xdb0] sm:$0xff]  ;;  %v554_v0 = vld [vmem:[#allocation5 + $0xd98] sm:$0xff] }
 0x21c   :  { %3684 = vmatpush1.bf16.msra.mxu0 %v6505_v5  ;;  %3848 = vmatpush1.bf16.msra.mxu1 %v6507_v6  ;;  %v501_v5 = vld [vmem:[#allocation5 + $0xbf0] sm:$0xff]  ;;  %v498_v6 = vld [vmem:[#allocation5 + $0xbd8] sm:$0xff] }
 0x21d   :  { %3685 = vmatprep.subr.bf16.mxu0 %v6514_v7  ;;  %3849 = vmatprep.subr.bf16.mxu1 %v6516_v8  ;;  %v502_v7 = vld [vmem:[#allocation5 + $0xbf8] sm:$0xff]  ;;  %v6569_v8 = vcombine.low %v489_v61, %v493_v62  ;;  %v6578_v10 = vcombine.high %v497_v4, %v501_v5  ;;  %v553_v62 = vld [vmem:[#allocation5 + $0xd90] sm:$0xff] }
 0x21e   :  { %v6580_v11 = vcombine.high %v498_v6, %v502_v7  ;;  %v6579_v19 = vcombine.low %v498_v6, %v502_v7  ;;  %v561_v6 = vld [vmem:[#allocation5 + $0xdd0] sm:$0xff] }
 0x21f   :  { %v565_v7 = vld [vmem:[#allocation5 + $0xdf0] sm:$0xff] }
 0x220   :  { %3686 = vmatpush1.bf16.msra.mxu0 %v6513_v14  ;;  %3850 = vmatpush1.bf16.msra.mxu1 %v6515_v16  ;;  %v509_v14 = vld [vmem:[#allocation5 + $0xc30] sm:$0xff]  ;;  %v506_v16 = vld [vmem:[#allocation5 + $0xc18] sm:$0xff] }
 0x221   :  { %3687 = vmatprep.subr.bf16.mxu0 %v6522_v17  ;;  %3851 = vmatprep.subr.bf16.mxu1 %v6524_v18  ;;  %v510_v17 = vld [vmem:[#allocation5 + $0xc38] sm:$0xff]  ;;  %v6577_v18 = vcombine.low %v497_v4, %v501_v5  ;;  %v6586_v20 = vcombine.high %v505_v13, %v509_v14 }
 0x222   :  { %v6588_v21 = vcombine.high %v506_v16, %v510_v17  ;;  %v6587_v12 = vcombine.low %v506_v16, %v510_v17  ;;  %v6633_v16 = vcombine.low %v553_v62, %v557_v63 }
 0x224   :  { %3688 = vmatpush1.bf16.msra.mxu0 %v6521_v57  ;;  %3852 = vmatpush1.bf16.msra.mxu1 %v6523_v23  ;;  %v517_v57 = vld [vmem:[#allocation5 + $0xc70] sm:$0xff]  ;;  %v514_v23 = vld [vmem:[#allocation5 + $0xc58] sm:$0xff] }
 0x225   :  { %3689 = vmatprep.subr.bf16.mxu0 %v6530_v26  ;;  %3853 = vmatprep.subr.bf16.mxu1 %v6532_v27  ;;  %v518_v26 = vld [vmem:[#allocation5 + $0xc78] sm:$0xff]  ;;  %v6585_v27 = vcombine.low %v505_v13, %v509_v14  ;;  %v6594_v28 = vcombine.high %v513_v22, %v517_v57 }
 0x226   :  { %v6596_v29 = vcombine.high %v514_v23, %v518_v26  ;;  %v6595_v35 = vcombine.low %v514_v23, %v518_v26  ;;  %v573_v23 = vld [vmem:[#allocation5 + $0xe30] sm:$0xff]  ;;  %v570_v26 = vld [vmem:[#allocation5 + $0xe18] sm:$0xff] }
 0x228   :  { %3690 = vmatpush1.bf16.msra.mxu0 %v6529_v31  ;;  %3854 = vmatpush1.bf16.msra.mxu1 %v6531_v32  ;;  %v525_v31 = vld [vmem:[#allocation5 + $0xcb0] sm:$0xff]  ;;  %v522_v32 = vld [vmem:[#allocation5 + $0xc98] sm:$0xff] }
 0x229   :  { %3691 = vmatprep.subr.bf16.mxu0 %v6538_v33  ;;  %3855 = vmatprep.subr.bf16.mxu1 %v6540_v15  ;;  %v526_v33 = vld [vmem:[#allocation5 + $0xcb8] sm:$0xff]  ;;  %v6593_v15 = vcombine.low %v513_v22, %v517_v57  ;;  %v6602_v36 = vcombine.high %v521_v30, %v525_v31  ;;  %v569_v57 = vld [vmem:[#allocation5 + $0xe10] sm:$0xff] }
 0x22a   :  { %v6604_v25 = vcombine.high %v522_v32, %v526_v33 }
 0x22c   :  { %3692 = vmatpush1.bf16.msra.mxu0 %v6537_v37  ;;  %3856 = vmatpush1.bf16.msra.mxu1 %v6539_v40  ;;  %v533_v37 = vld [vmem:[#allocation5 + $0xcf0] sm:$0xff]  ;;  %v530_v40 = vld [vmem:[#allocation5 + $0xcd8] sm:$0xff] }
 0x22d   :  { %3693 = vmatprep.subr.bf16.mxu0 %v6546_v41  ;;  %3857 = vmatprep.subr.bf16.mxu1 %v6548_v42  ;;  %v534_v41 = vld [vmem:[#allocation5 + $0xcf8] sm:$0xff]  ;;  %v6601_v42 = vcombine.low %v521_v30, %v525_v31  ;;  %v6610_v43 = vcombine.high %v529_v53, %v533_v37  ;;  %v577_v31 = vld [vmem:[#allocation5 + $0xe50] sm:$0xff] }
 0x22e   :  { %v6612_v44 = vcombine.high %v530_v40, %v534_v41 }
 0x230   :  { %3694 = vmatpush1.bf16.msra.mxu0 %v6545_v34  ;;  %3858 = vmatpush1.bf16.msra.mxu1 %v6547_v47  ;;  %v538_v34 = vld [vmem:[#allocation5 + $0xd18] sm:$0xff] }
 0x231   :  { %3695 = vmatprep.subr.bf16.mxu0 %v6554_v24  ;;  %3859 = vmatprep.subr.bf16.mxu1 %v6556_v49  ;;  %v542_v47 = vld [vmem:[#allocation5 + $0xd38] sm:$0xff]  ;;  %v6609_v24 = vcombine.low %v529_v53, %v533_v37  ;;  %v6611_v49 = vcombine.low %v530_v40, %v534_v41  ;;  %v585_v37 = vld [vmem:[#allocation5 + $0xe90] sm:$0xff] }
 0x232   :  { %v589_v40 = vld [vmem:[#allocation5 + $0xeb0] sm:$0xff]  ;;  %v586_v41 = vld [vmem:[#allocation5 + $0xe98] sm:$0xff] }
 0x234   :  { %3696 = vmatpush1.bf16.msra.mxu0 %v6553_v56  ;;  %3860 = vmatpush1.bf16.msra.mxu1 %v6555_v58  ;;  %v550_v56 = vld [vmem:[#allocation5 + $0xd78] sm:$0xff]  ;;  %v6617_v58 = vcombine.low %v537_v45, %v541_v46  ;;  %v593_v46 = vld [vmem:[#allocation5 + $0xed0] sm:$0xff] }
 0x235   :  { %3697 = vmatprep.subr.bf16.mxu0 %v6562_v59  ;;  %3861 = vmatprep.subr.bf16.mxu1 %v6564_v60  ;;  %v6619_v59 = vcombine.low %v538_v34, %v542_v47  ;;  %v6626_v60 = vcombine.high %v545_v51, %v549_v52  ;;  %v6628_v61 = vcombine.high %v546_v54, %v550_v56 }
 0x238   :  { %3698 = vmatpush1.bf16.msra.mxu0 %v6561_v1  ;;  %3862 = vmatpush1.bf16.msra.mxu1 %v6563_v2  ;;  %v558_v1 = vld [vmem:[#allocation5 + $0xdb8] sm:$0xff]  ;;  %v6625_v2 = vcombine.low %v545_v51, %v549_v52  ;;  %v601_v52 = vld [vmem:[#allocation5 + $0xf10] sm:$0xff] }
 0x239   :  { %3699 = vmatprep.subr.bf16.mxu0 %v6570_v38  ;;  %3863 = vmatprep.subr.bf16.mxu1 %v6572_v3  ;;  %v6627_v38 = vcombine.low %v546_v54, %v550_v56  ;;  %v6634_v3 = vcombine.high %v553_v62, %v557_v63  ;;  %v6636_v5 = vcombine.high %v554_v0, %v558_v1  ;;  %v605_v54 = vld [vmem:[#allocation5 + $0xf30] sm:$0xff]  ;;  %v633_v56 = vlaneseq }
 0x23a   :  { %v6682_v62 = vcombine.high %v601_v52, %v605_v54 }
 0x23c   :  { %3700 = vmatpush1.bf16.msra.mxu0 %v6569_v8  ;;  %3864 = vmatpush1.bf16.msra.mxu1 %v6571_v9 }
 0x23d   :  { %3701 = vmatprep.subr.bf16.mxu0 %v6578_v10  ;;  %3865 = vmatprep.subr.bf16.mxu1 %v6580_v11  ;;  %v562_v10 = vld [vmem:[#allocation5 + $0xdd8] sm:$0xff] }
 0x23e   :  { %v566_v11 = vld [vmem:[#allocation5 + $0xdf8] sm:$0xff] }
 0x23f   :  { %v6644_v22 = vcombine.high %v562_v10, %v566_v11 }
 0x240   :  { %3702 = vmatpush1.bf16.msra.mxu0 %v6577_v18  ;;  %3866 = vmatpush1.bf16.msra.mxu1 %v6579_v19  ;;  %v6635_v19 = vcombine.low %v554_v0, %v558_v1  ;;  %v609_v0 = vld [vmem:[#allocation5 + $0xf50] sm:$0xff] }
 0x241   :  { %3712 = vmatprep.subr.bf16.mxu0 %v6586_v20  ;;  %3876 = vmatprep.subr.bf16.mxu1 %v6588_v21  ;;  %v6642_v20 = vcombine.high %v561_v6, %v565_v7  ;;  %v613_v1 = vld [vmem:[#allocation5 + $0xf70] sm:$0xff] }
 0x243   :  { %3704 = vmatmul.mubr.bf16.vlgmr.msra.gmra.mrb[4].mxu0 %v7929_v39  ;;  %3868 = vmatmul.mubr.bf16.vlgmr.msra.gmra.mrb[4].mxu1 %v7929_v39  ;;  %v6603_v39 = vcombine.low %v522_v32, %v526_v33  ;;  %v581_v32 = vld [vmem:[#allocation5 + $0xe70] sm:$0xff]  ;;  %v578_v33 = vld [vmem:[#allocation5 + $0xe58] sm:$0xff] }
 0x244   :  { %3713 = vmatpush1.bf16.msra.mxu0 %v6585_v27  ;;  %3877 = vmatpush1.bf16.msra.mxu1 %v6587_v12  ;;  %v574_v27 = vld [vmem:[#allocation5 + $0xe38] sm:$0xff]  ;;  %v6641_v12 = vcombine.low %v561_v6, %v565_v7  ;;  %v6690_v7 = vcombine.high %v609_v0, %v613_v1 }
 0x245   :  { %3714 = vmatprep.subr.bf16.mxu0 %v6594_v28  ;;  %3878 = vmatprep.subr.bf16.mxu1 %v6596_v29  ;;  %v6643_v28 = vcombine.low %v562_v10, %v566_v11  ;;  %v6650_v29 = vcombine.high %v569_v57, %v573_v23  ;;  %v6652_v30 = vcombine.high %v570_v26, %v574_v27  ;;  %v617_v11 = vld [vmem:[#allocation5 + $0xf90] sm:$0xff] }
 0x246   :  { %3744 = vmatprep.mubr.bf16.mxu0 %v7933_v48  ;;  %3908 = vmatprep.mubr.bf16.mxu1 %v7933_v48  ;;  %v6620_v48 = vcombine.high %v538_v34, %v542_v47  ;;  %v597_v34 = vld [vmem:[#allocation5 + $0xef0] sm:$0xff]  ;;  %v594_v47 = vld [vmem:[#allocation5 + $0xed8] sm:$0xff] }
 0x248   :  { %3715 = vmatpush1.bf16.msra.mxu0 %v6593_v15  ;;  %3879 = vmatpush1.bf16.msra.mxu1 %v6595_v35  ;;  %v582_v15 = vld [vmem:[#allocation5 + $0xe78] sm:$0xff]  ;;  %v6649_v35 = vcombine.low %v569_v57, %v573_v23  ;;  %v625_v23 = vld [vmem:[#allocation5 + $0xfd0] sm:$0xff] }
 0x249   :  { %3716 = vmatprep.subr.bf16.mxu0 %v6602_v36  ;;  %3880 = vmatprep.subr.bf16.mxu1 %v6604_v25  ;;  %v6651_v36 = vcombine.low %v570_v26, %v574_v27  ;;  %v6658_v25 = vcombine.high %v577_v31, %v581_v32  ;;  %v6660_v53 = vcombine.high %v578_v33, %v582_v15  ;;  %v629_v26 = vld [vmem:[#allocation5 + $0xff0] sm:$0xff] }
 0x24c   :  { %3717 = vmatpush1.bf16.msra.mxu0 %v6601_v42  ;;  %3881 = vmatpush1.bf16.msra.mxu1 %v6603_v39  ;;  %v590_v42 = vld [vmem:[#allocation5 + $0xeb8] sm:$0xff]  ;;  %v6657_v39 = vcombine.low %v577_v31, %v581_v32  ;;  %v6706_v31 = vcombine.high %v625_v23, %v629_v26 }
 0x24d   :  { %3718 = vmatprep.subr.bf16.mxu0 %v6610_v43  ;;  %3882 = vmatprep.subr.bf16.mxu1 %v6612_v44  ;;  %v6659_v43 = vcombine.low %v578_v33, %v582_v15  ;;  %v6666_v44 = vcombine.high %v585_v37, %v589_v40  ;;  %v6668_v45 = vcombine.high %v586_v41, %v590_v42 }
 0x24e   :  { %v6705_v15 = vcombine.low %v625_v23, %v629_v26  ;;  %v7216_v23 = vld [vmem:[#allocation8 + $0x164] ss:$16 sps:$4 sm:$0xff]   ;;  %v7219_v26 = vld [vmem:[#allocation8 + $0x16c] ss:$16 sps:$4 sm:$0xff]  }
 0x250   :  { %3719 = vmatpush1.bf16.msra.mxu0 %v6609_v24  ;;  %3883 = vmatpush1.bf16.msra.mxu1 %v6611_v49  ;;  %v598_v24 = vld [vmem:[#allocation5 + $0xef8] sm:$0xff]  ;;  %v6665_v49 = vcombine.low %v585_v37, %v589_v40  ;;  %v7151_v40 = vld [vmem:[#allocation8 + $0x8] ss:$16 sps:$4 sm:$0xff]  }
 0x251   :  { %3720 = vmatprep.subr.bf16.mxu0 %v6618_v50  ;;  %3884 = vmatprep.subr.bf16.mxu1 %v6620_v48  ;;  %v6667_v50 = vcombine.low %v586_v41, %v590_v42  ;;  %v6674_v48 = vcombine.high %v593_v46, %v597_v34  ;;  %v6676_v51 = vcombine.high %v594_v47, %v598_v24  ;;  %v7148_v37 = vld [vmem:[#allocation8] ss:$16 sps:$4 sm:$0xff]   ;;  %v7156_v41 = vld [vmem:[#allocation8 + $0x24] ss:$16 sps:$4 sm:$0xff]  }
 0x254   :  { %3721 = vmatpush1.bf16.msra.mxu0 %v6617_v58  ;;  %3885 = vmatpush1.bf16.msra.mxu1 %v6619_v59  ;;  %v602_v58 = vld [vmem:[#allocation5 + $0xf18] sm:$0xff] }
 0x255   :  { %3722 = vmatprep.subr.bf16.mxu0 %v6626_v60  ;;  %3886 = vmatprep.subr.bf16.mxu1 %v6628_v61  ;;  %v606_v59 = vld [vmem:[#allocation5 + $0xf38] sm:$0xff]  ;;  %v6673_v60 = vcombine.low %v593_v46, %v597_v34  ;;  %v6675_v61 = vcombine.low %v594_v47, %v598_v24  ;;  %v7163_v34 = vld [vmem:[#allocation8 + $0x48] ss:$16 sps:$4 sm:$0xff]   ;;  %v7171_v24 = vld [vmem:[#allocation8 + $0x6c] ss:$16 sps:$4 sm:$0xff]  }
 0x256   :  { %v7959_v4 = vpop.f32.mrb[0].mxu0  ;;  %v7961_v8 = vpop.f32.mrb[0].mxu1  ;;  %v6684_v63 = vcombine.high %v602_v58, %v606_v59  ;;  %v6683_v6 = vcombine.low %v602_v58, %v606_v59  ;;  %v7160_v46 = vld [vmem:[#allocation8 + $0x40] ss:$16 sps:$4 sm:$0xff]   ;;  %v7168_v47 = vld [vmem:[#allocation8 + $0x64] ss:$16 sps:$4 sm:$0xff]  }
 0x257   :  { %v7963_v9 = vpop.f32.mrb[1].mxu0  ;;  %v7965_v13 = vpop.f32.mrb[1].mxu1  ;;  %v7178_v58 = vld [vmem:[#allocation8 + $0xa0] ss:$16 sps:$4 sm:$0xff]   ;;  %v7181_v59 = vld [vmem:[#allocation8 + $0xa8] ss:$16 sps:$4 sm:$0xff]  }
 0x258   :  { %v3422_v14 = vpop.f32.mrb[2].mxu0  ;;  %3723 = vmatpush1.bf16.msra.mxu0 %v6625_v2  ;;  %v3586_v17 = vpop.f32.mrb[2].mxu1  ;;  %3887 = vmatpush1.bf16.msra.mxu1 %v6627_v38  ;;  %v7967_v2 = vshrl.u32 %v633_v56, 7  ;;  %v610_v38 = vld [vmem:[#allocation5 + $0xf58] sm:$0xff]  ;;  %v7183_v56 = vld [vmem:[#allocation8 + $0xac] ss:$16 sps:$4 sm:$0xff]  }
 0x259   :  { %v3423_v18 = vpop.f32.mrb[3].mxu0  ;;  %3724 = vmatprep.subr.bf16.mxu0 %v6634_v3  ;;  %v3587_v21 = vpop.f32.mrb[3].mxu1  ;;  %3888 = vmatprep.subr.bf16.mxu1 %v6636_v5  ;;  %v614_v3 = vld [vmem:[#allocation5 + $0xf78] sm:$0xff]  ;;  %v6681_v5 = vcombine.low %v601_v52, %v605_v54  ;;  %v621_v14 = vld [vmem:[#allocation5 + $0xfb0] sm:$0xff] }
 0x25a   :  { %v6692_v10 = vcombine.high %v610_v38, %v614_v3  ;;  %v618_v17 = vld [vmem:[#allocation5 + $0xf98] sm:$0xff]  ;;  %v6691_v21 = vcombine.low %v610_v38, %v614_v3  ;;  %v7175_v52 = vld [vmem:[#allocation8 + $0x88] ss:$16 sps:$4 sm:$0xff]  }
 0x25b   :  { %v622_v18 = vld [vmem:[#allocation5 + $0xfb8] sm:$0xff]  ;;  %v7193_v3 = vld [vmem:[#allocation8 + $0xe8] ss:$16 sps:$4 sm:$0xff]  }
 0x25c   :  { %3725 = vmatpush1.bf16.msra.mxu0 %v6633_v16  ;;  %3889 = vmatpush1.bf16.msra.mxu1 %v6635_v19  ;;  %v639_v16 = vsub.s32 1, %v7967_v2  ;;  %v7970_v19 = vld [vmem:[#allocation7] sm:$0xff]  ;;  %v6700_v57 = vcombine.high %v618_v17, %v622_v18  ;;  %v7180_v54 = vld [vmem:[#allocation8 + $0xa4] ss:$16 sps:$4 sm:$0xff]   ;;  %v7190_v38 = vld [vmem:[#allocation8 + $0xe0] ss:$16 sps:$4 sm:$0xff]  }
 0x25d   :  { %3726 = vmatprep.subr.bf16.mxu0 %v6642_v20  ;;  %3890 = vmatprep.subr.bf16.mxu1 %v6644_v22  ;;  %v6689_v20 = vcombine.low %v609_v0, %v613_v1  ;;  %v6698_v22 = vcombine.high %v617_v11, %v621_v14  ;;  %v7192_v0 = vld [vmem:[#allocation8 + $0xe4] ss:$16 sps:$4 sm:$0xff]   ;;  %v7195_v1 = vld [vmem:[#allocation8 + $0xec] ss:$16 sps:$4 sm:$0xff]  }
 0x25e   :  { %v640_v27 = vrot.slane %v7970_v19, %v639_v16 }
 0x260   :  { %3727 = vmatpush1.bf16.msra.mxu0 %v6641_v12  ;;  %3891 = vmatpush1.bf16.msra.mxu1 %v6643_v28  ;;  %v626_v12 = vld [vmem:[#allocation5 + $0xfd8] sm:$0xff]  ;;  %v7043_v33 = vadd.f32 %v7963_v9, %v640_v27  ;;  %v7159_v9 = vld [vmem:[#allocation8 + $0x2c] ss:$16 sps:$4 sm:$0xff]  }
 0x261   :  { %3728 = vmatprep.subr.bf16.mxu0 %v6650_v29  ;;  %3892 = vmatprep.subr.bf16.mxu1 %v6652_v30  ;;  %v630_v28 = vld [vmem:[#allocation5 + $0xff8] sm:$0xff]  ;;  %v6697_v29 = vcombine.low %v617_v11, %v621_v14  ;;  %v6699_v30 = vcombine.low %v618_v17, %v622_v18  ;;  %v7207_v14 = vld [vmem:[#allocation8 + $0x12c] ss:$16 sps:$4 sm:$0xff]   ;;  %v7205_v18 = vld [vmem:[#allocation8 + $0x128] ss:$16 sps:$4 sm:$0xff]  }
 0x262   :  { %v6708_v32 = vcombine.high %v626_v12, %v630_v28  ;;  %v7204_v11 = vld [vmem:[#allocation8 + $0x124] ss:$16 sps:$4 sm:$0xff]   ;;  %v7202_v17 = vld [vmem:[#allocation8 + $0x120] ss:$16 sps:$4 sm:$0xff]  }
 0x263   :  { %v7214_v27 = vld [vmem:[#allocation8 + $0x160] ss:$16 sps:$4 sm:$0xff]  }
 0x264   :  { %3729 = vmatpush1.bf16.msra.mxu0 %v6649_v35  ;;  %3893 = vmatpush1.bf16.msra.mxu1 %v6651_v36  ;;  %v6707_v35 = vcombine.low %v626_v12, %v630_v28  ;;  %v7150_v36 = vld [vmem:[#allocation8 + $0x4] ss:$16 sps:$4 sm:$0xff]   ;;  %v7217_v12 = vld [vmem:[#allocation8 + $0x168] ss:$16 sps:$4 sm:$0xff]  }
 0x265   :  { %3730 = vmatprep.subr.bf16.mxu0 %v6658_v25  ;;  %3894 = vmatprep.subr.bf16.mxu1 %v6660_v53  ;;  %v7153_v25 = vld [vmem:[#allocation8 + $0xc] ss:$16 sps:$4 sm:$0xff]   ;;  %v3918_v53 = vmax.f32 %v7043_v33, 0.0  ;;  %v7222_v28 = vld [vmem:[#allocation8 + $0x184] ss:$16 sps:$4 sm:$0xff]  }
 0x266   :  { %v7228_v33 = vld [vmem:[#allocation8 + $0x1a4] ss:$16 sps:$4 sm:$0xff]  }
 0x267   :  { %v3926_v42 = vpack.c.bf16 %v3918_v53, %v3918_v53  ;;  %v7229_v53 = vld [vmem:[#allocation8 + $0x1a8] ss:$16 sps:$4 sm:$0xff]  }
 0x268   :  { %3731 = vmatpush1.bf16.msra.mxu0 %v6657_v39  ;;  %3895 = vmatpush1.bf16.msra.mxu1 %v6659_v43  ;;  %v7154_v39 = vld [vmem:[#allocation8 + $0x20] ss:$16 sps:$4 sm:$0xff]   ;;  %v7157_v43 = vld [vmem:[#allocation8 + $0x28] ss:$16 sps:$4 sm:$0xff]  }
 0x269   :  { %3732 = vmatprep.subr.bf16.mxu0 %v6666_v44  ;;  %3896 = vmatprep.subr.bf16.mxu1 %v6668_v45  ;;  %v7162_v44 = vld [vmem:[#allocation8 + $0x44] ss:$16 sps:$4 sm:$0xff]   ;;  %v7165_v45 = vld [vmem:[#allocation8 + $0x4c] ss:$16 sps:$4 sm:$0xff]  }
 0x26c   :  { %3733 = vmatpush1.bf16.msra.mxu0 %v6665_v49  ;;  %3897 = vmatpush1.bf16.msra.mxu1 %v6667_v50  ;;  %v7169_v49 = vld [vmem:[#allocation8 + $0x68] ss:$16 sps:$4 sm:$0xff]   ;;  %v7174_v50 = vld [vmem:[#allocation8 + $0x84] ss:$16 sps:$4 sm:$0xff]  }
 0x26d   :  { %3734 = vmatprep.subr.bf16.mxu0 %v6674_v48  ;;  %3898 = vmatprep.subr.bf16.mxu1 %v6676_v51  ;;  %v7177_v48 = vld [vmem:[#allocation8 + $0x8c] ss:$16 sps:$4 sm:$0xff]   ;;  %v7172_v51 = vld [vmem:[#allocation8 + $0x80] ss:$16 sps:$4 sm:$0xff]  }
 0x270   :  { %3735 = vmatpush1.bf16.msra.mxu0 %v6673_v60  ;;  %3899 = vmatpush1.bf16.msra.mxu1 %v6675_v61  ;;  %v7186_v60 = vld [vmem:[#allocation8 + $0xc4] ss:$16 sps:$4 sm:$0xff]   ;;  %v7189_v61 = vld [vmem:[#allocation8 + $0xcc] ss:$16 sps:$4 sm:$0xff]  }
 0x271   :  { %3736 = vmatprep.subr.bf16.mxu0 %v6682_v62  ;;  %3900 = vmatprep.subr.bf16.mxu1 %v6684_v63  ;;  %v7184_v62 = vld [vmem:[#allocation8 + $0xc0] ss:$16 sps:$4 sm:$0xff]   ;;  %v7187_v63 = vld [vmem:[#allocation8 + $0xc8] ss:$16 sps:$4 sm:$0xff]  }
 0x274   :  { %3737 = vmatpush1.bf16.msra.mxu0 %v6681_v5  ;;  %3901 = vmatpush1.bf16.msra.mxu1 %v6683_v6  ;;  %v7198_v5 = vld [vmem:[#allocation8 + $0x104] ss:$16 sps:$4 sm:$0xff]   ;;  %v7201_v6 = vld [vmem:[#allocation8 + $0x10c] ss:$16 sps:$4 sm:$0xff]  }
 0x275   :  { %3738 = vmatprep.subr.bf16.mxu0 %v6690_v7  ;;  %3902 = vmatprep.subr.bf16.mxu1 %v6692_v10  ;;  %v7196_v7 = vld [vmem:[#allocation8 + $0x100] ss:$16 sps:$4 sm:$0xff]   ;;  %v7199_v10 = vld [vmem:[#allocation8 + $0x108] ss:$16 sps:$4 sm:$0xff]  }
 0x278   :  { %3739 = vmatpush1.bf16.msra.mxu0 %v6689_v20  ;;  %3903 = vmatpush1.bf16.msra.mxu1 %v6691_v21  ;;  %v7210_v20 = vld [vmem:[#allocation8 + $0x144] ss:$16 sps:$4 sm:$0xff]   ;;  %v7213_v21 = vld [vmem:[#allocation8 + $0x14c] ss:$16 sps:$4 sm:$0xff]  }
 0x279   :  { %3740 = vmatprep.subr.bf16.mxu0 %v6698_v22  ;;  %3904 = vmatprep.subr.bf16.mxu1 %v6700_v57  ;;  %v7208_v22 = vld [vmem:[#allocation8 + $0x140] ss:$16 sps:$4 sm:$0xff]   ;;  %v7211_v57 = vld [vmem:[#allocation8 + $0x148] ss:$16 sps:$4 sm:$0xff]  }
 0x27c   :  { %3741 = vmatpush1.bf16.msra.mxu0 %v6697_v29  ;;  %3905 = vmatpush1.bf16.msra.mxu1 %v6699_v30  ;;  %v7225_v29 = vld [vmem:[#allocation8 + $0x18c] ss:$16 sps:$4 sm:$0xff]   ;;  %v7220_v30 = vld [vmem:[#allocation8 + $0x180] ss:$16 sps:$4 sm:$0xff]  }
 0x27d   :  { %3742 = vmatprep.subr.bf16.mxu0 %v6706_v31  ;;  %3906 = vmatprep.subr.bf16.mxu1 %v6708_v32  ;;  %v635_v31 = vsub.s32 0, %v7967_v2  ;;  %v7223_v32 = vld [vmem:[#allocation8 + $0x188] ss:$16 sps:$4 sm:$0xff]  }
 0x280   :  { %3743 = vmatpush1.bf16.msra.mxu0 %v6705_v15  ;;  %3907 = vmatpush1.bf16.msra.mxu1 %v6707_v35  ;;  %v7231_v15 = vld [vmem:[#allocation8 + $0x1ac] ss:$16 sps:$4 sm:$0xff]   ;;  %v647_v35 = vsub.s32 3, %v7967_v2 }
 0x281   :  { %5491 = vmatprep.subr.bf16.mxu0 %v7150_v36  ;;  %5655 = vmatprep.subr.bf16.mxu1 %v7153_v25  ;;  %v7226_v36 = vld [vmem:[#allocation8 + $0x1a0] ss:$16 sps:$4 sm:$0xff]   ;;  %v636_v25 = vrot.slane %v7970_v19, %v635_v31 }
 0x283   :  { %3745 = vmatmul.mubr.bf16.vlgmr.msra.gmra.mrb[4].mxu0 %v7941_v55  ;;  %3909 = vmatmul.mubr.bf16.vlgmr.msra.gmra.mrb[4].mxu1 %v7941_v55  ;;  %v7166_v55 = vld [vmem:[#allocation8 + $0x60] ss:$16 sps:$4 sm:$0xff]  }
 0x284   :  { %5492 = vmatpush1.bf16.msra.mxu0 %v7148_v37  ;;  %5523 = vmatprep.mubr.bf16.mxu0 %v3926_v42  ;;  %v7234_v37 = vld [vmem:[#allocation8 + $0x1c4] ss:$16 sps:$4 sm:$0xff]  }
 0x285   :  { %5656 = vmatpush1.bf16.msra.mxu1 %v7151_v40  ;;  %5687 = vmatprep.mubr.bf16.mxu1 %v3926_v42  ;;  %v7237_v40 = vld [vmem:[#allocation8 + $0x1cc] ss:$16 sps:$4 sm:$0xff]   ;;  %v7232_v42 = vld [vmem:[#allocation8 + $0x1c0] ss:$16 sps:$4 sm:$0xff]  }
 0x286   :  { %5493 = vmatprep.subr.bf16.mxu0 %v7156_v41  ;;  %5657 = vmatprep.subr.bf16.mxu1 %v7159_v9  ;;  %v648_v41 = vrot.slane %v7970_v19, %v647_v35  ;;  %v7042_v9 = vadd.f32 %v7959_v4, %v636_v25  ;;  %v7244_v4 = vld [vmem:[#allocation8 + $0x200] ss:$16 sps:$4 sm:$0xff]   ;;  %v7309_v25 = vld [vmem:[#allocation8 + $0x34c] ss:$16 sps:$4 sm:$0xff]  }
 0x288   :  { %5494 = vmatpush1.bf16.msra.mxu0 %v7154_v39  ;;  %v7235_v39 = vld [vmem:[#allocation8 + $0x1c8] ss:$16 sps:$4 sm:$0xff]  }
 0x289   :  { %5658 = vmatpush1.bf16.msra.mxu1 %v7157_v43  ;;  %5495 = vmatprep.subr.bf16.mxu0 %v7162_v44  ;;  %v7240_v43 = vld [vmem:[#allocation8 + $0x1e4] ss:$16 sps:$4 sm:$0xff]   ;;  %v7243_v44 = vld [vmem:[#allocation8 + $0x1ec] ss:$16 sps:$4 sm:$0xff]  }
 0x28a   :  { %5659 = vmatprep.subr.bf16.mxu1 %v7165_v45  ;;  %v7045_v45 = vadd.f32 %v7965_v13, %v648_v41  ;;  %v7255_v13 = vld [vmem:[#allocation8 + $0x22c] ss:$16 sps:$4 sm:$0xff]  }
 0x28b   :  { %v7315_v41 = vld [vmem:[#allocation8 + $0x36c] ss:$16 sps:$4 sm:$0xff]  }
 0x28c   :  { %5496 = vmatpush1.bf16.msra.mxu0 %v7160_v46  ;;  %v7238_v46 = vld [vmem:[#allocation8 + $0x1e0] ss:$16 sps:$4 sm:$0xff]  }
 0x28d   :  { %5660 = vmatpush1.bf16.msra.mxu1 %v7163_v34  ;;  %5497 = vmatprep.subr.bf16.mxu0 %v7168_v47  ;;  %v3917_v34 = vmax.f32 %v7042_v9, 0.0  ;;  %v7241_v47 = vld [vmem:[#allocation8 + $0x1e8] ss:$16 sps:$4 sm:$0xff]  }
 0x28e   :  { %5661 = vmatprep.subr.bf16.mxu1 %v7171_v24  ;;  %v7246_v24 = vld [vmem:[#allocation8 + $0x204] ss:$16 sps:$4 sm:$0xff]   ;;  %v7313_v9 = vld [vmem:[#allocation8 + $0x368] ss:$16 sps:$4 sm:$0xff]  }
 0x290   :  { %5498 = vmatpush1.bf16.msra.mxu0 %v7166_v55  ;;  %v7249_v55 = vld [vmem:[#allocation8 + $0x20c] ss:$16 sps:$4 sm:$0xff]  }
 0x291   :  { %5662 = vmatpush1.bf16.msra.mxu1 %v7169_v49  ;;  %5499 = vmatprep.subr.bf16.mxu0 %v7174_v50  ;;  %v3920_v49 = vmax.f32 %v7045_v45, 0.0  ;;  %v3925_v50 = vpack.c.bf16 %v3917_v34, %v3917_v34  ;;  %v643_v45 = vsub.s32 2, %v7967_v2  ;;  %v7324_v34 = vld [vmem:[#allocation8 + $0x3a4] ss:$16 sps:$4 sm:$0xff]  }
 0x292   :  { %5663 = vmatprep.subr.bf16.mxu1 %v7177_v48  ;;  %v7247_v48 = vld [vmem:[#allocation8 + $0x208] ss:$16 sps:$4 sm:$0xff]  }
 0x294   :  { %5500 = vmatpush1.bf16.msra.mxu0 %v7172_v51  ;;  %v7252_v51 = vld [vmem:[#allocation8 + $0x224] ss:$16 sps:$4 sm:$0xff]  }
 0x295   :  { %5664 = vmatpush1.bf16.msra.mxu1 %v7175_v52  ;;  %5501 = vmatprep.subr.bf16.mxu0 %v7180_v54  ;;  %v3928_v52 = vpack.c.bf16 %v3920_v49, %v3920_v49  ;;  %v7250_v54 = vld [vmem:[#allocation8 + $0x220] ss:$16 sps:$4 sm:$0xff]   ;;  %v7325_v49 = vld [vmem:[#allocation8 + $0x3a8] ss:$16 sps:$4 sm:$0xff]  }
 0x296   :  { %5665 = vmatprep.subr.bf16.mxu1 %v7183_v56  ;;  %v7253_v56 = vld [vmem:[#allocation8 + $0x228] ss:$16 sps:$4 sm:$0xff]  }
 0x298   :  { %5502 = vmatpush1.bf16.msra.mxu0 %v7178_v58  ;;  %v7258_v58 = vld [vmem:[#allocation8 + $0x244] ss:$16 sps:$4 sm:$0xff]  }
 0x299   :  { %5666 = vmatpush1.bf16.msra.mxu1 %v7181_v59  ;;  %5503 = vmatprep.subr.bf16.mxu0 %v7186_v60  ;;  %v7261_v59 = vld [vmem:[#allocation8 + $0x24c] ss:$16 sps:$4 sm:$0xff]   ;;  %v7256_v60 = vld [vmem:[#allocation8 + $0x240] ss:$16 sps:$4 sm:$0xff]  }
 0x29a   :  { %5667 = vmatprep.subr.bf16.mxu1 %v7189_v61  ;;  %v7259_v61 = vld [vmem:[#allocation8 + $0x248] ss:$16 sps:$4 sm:$0xff]  }
 0x29c   :  { %5504 = vmatpush1.bf16.msra.mxu0 %v7184_v62  ;;  %v7264_v62 = vld [vmem:[#allocation8 + $0x264] ss:$16 sps:$4 sm:$0xff]  }
 0x29d   :  { %5668 = vmatpush1.bf16.msra.mxu1 %v7187_v63  ;;  %5505 = vmatprep.subr.bf16.mxu0 %v7192_v0  ;;  %v7267_v63 = vld [vmem:[#allocation8 + $0x26c] ss:$16 sps:$4 sm:$0xff]   ;;  %v7262_v0 = vld [vmem:[#allocation8 + $0x260] ss:$16 sps:$4 sm:$0xff]  }
 0x29e   :  { %5669 = vmatprep.subr.bf16.mxu1 %v7195_v1  ;;  %v7265_v1 = vld [vmem:[#allocation8 + $0x268] ss:$16 sps:$4 sm:$0xff]  }
 0x2a0   :  { %5506 = vmatpush1.bf16.msra.mxu0 %v7190_v38  ;;  %v7270_v38 = vld [vmem:[#allocation8 + $0x284] ss:$16 sps:$4 sm:$0xff]  }
 0x2a1   :  { %5670 = vmatpush1.bf16.msra.mxu1 %v7193_v3  ;;  %5507 = vmatprep.subr.bf16.mxu0 %v7198_v5  ;;  %v7273_v3 = vld [vmem:[#allocation8 + $0x28c] ss:$16 sps:$4 sm:$0xff]   ;;  %v7268_v5 = vld [vmem:[#allocation8 + $0x280] ss:$16 sps:$4 sm:$0xff]  }
 0x2a2   :  { %5671 = vmatprep.subr.bf16.mxu1 %v7201_v6  ;;  %v7271_v6 = vld [vmem:[#allocation8 + $0x288] ss:$16 sps:$4 sm:$0xff]  }
 0x2a4   :  { %5508 = vmatpush1.bf16.msra.mxu0 %v7196_v7  ;;  %v7276_v7 = vld [vmem:[#allocation8 + $0x2a4] ss:$16 sps:$4 sm:$0xff]  }
 0x2a5   :  { %5672 = vmatpush1.bf16.msra.mxu1 %v7199_v10  ;;  %5509 = vmatprep.subr.bf16.mxu0 %v7204_v11  ;;  %v7279_v10 = vld [vmem:[#allocation8 + $0x2ac] ss:$16 sps:$4 sm:$0xff]   ;;  %v7274_v11 = vld [vmem:[#allocation8 + $0x2a0] ss:$16 sps:$4 sm:$0xff]  }
 0x2a6   :  { %5673 = vmatprep.subr.bf16.mxu1 %v7207_v14  ;;  %v7277_v14 = vld [vmem:[#allocation8 + $0x2a8] ss:$16 sps:$4 sm:$0xff]  }
 0x2a8   :  { %5510 = vmatpush1.bf16.msra.mxu0 %v7202_v17  ;;  %v7282_v17 = vld [vmem:[#allocation8 + $0x2c4] ss:$16 sps:$4 sm:$0xff]  }
 0x2a9   :  { %5674 = vmatpush1.bf16.msra.mxu1 %v7205_v18  ;;  %5511 = vmatprep.subr.bf16.mxu0 %v7210_v20  ;;  %v7285_v18 = vld [vmem:[#allocation8 + $0x2cc] ss:$16 sps:$4 sm:$0xff]   ;;  %v7280_v20 = vld [vmem:[#allocation8 + $0x2c0] ss:$16 sps:$4 sm:$0xff]  }
 0x2aa   :  { %5675 = vmatprep.subr.bf16.mxu1 %v7213_v21  ;;  %v7283_v21 = vld [vmem:[#allocation8 + $0x2c8] ss:$16 sps:$4 sm:$0xff]  }
 0x2ac   :  { %5512 = vmatpush1.bf16.msra.mxu0 %v7208_v22  ;;  %v7288_v22 = vld [vmem:[#allocation8 + $0x2e4] ss:$16 sps:$4 sm:$0xff]  }
 0x2ad   :  { %5676 = vmatpush1.bf16.msra.mxu1 %v7211_v57  ;;  %5513 = vmatprep.subr.bf16.mxu0 %v7216_v23  ;;  %v7291_v57 = vld [vmem:[#allocation8 + $0x2ec] ss:$16 sps:$4 sm:$0xff]   ;;  %v7286_v23 = vld [vmem:[#allocation8 + $0x2e0] ss:$16 sps:$4 sm:$0xff]  }
 0x2ae   :  { %5677 = vmatprep.subr.bf16.mxu1 %v7219_v26  ;;  %v7289_v26 = vld [vmem:[#allocation8 + $0x2e8] ss:$16 sps:$4 sm:$0xff]  }
 0x2b0   :  { %5514 = vmatpush1.bf16.msra.mxu0 %v7214_v27  ;;  %v7294_v27 = vld [vmem:[#allocation8 + $0x304] ss:$16 sps:$4 sm:$0xff]  }
 0x2b1   :  { %5678 = vmatpush1.bf16.msra.mxu1 %v7217_v12  ;;  %5515 = vmatprep.subr.bf16.mxu0 %v7222_v28  ;;  %v7297_v12 = vld [vmem:[#allocation8 + $0x30c] ss:$16 sps:$4 sm:$0xff]   ;;  %v7292_v28 = vld [vmem:[#allocation8 + $0x300] ss:$16 sps:$4 sm:$0xff]  }
 0x2b2   :  { %5679 = vmatprep.subr.bf16.mxu1 %v7225_v29  ;;  %v7295_v29 = vld [vmem:[#allocation8 + $0x308] ss:$16 sps:$4 sm:$0xff]  }
 0x2b4   :  { %5516 = vmatpush1.bf16.msra.mxu0 %v7220_v30  ;;  %v7300_v30 = vld [vmem:[#allocation8 + $0x324] ss:$16 sps:$4 sm:$0xff]  }
 0x2b5   :  { %5680 = vmatpush1.bf16.msra.mxu1 %v7223_v32  ;;  %5517 = vmatprep.subr.bf16.mxu0 %v7228_v33  ;;  %v7303_v32 = vld [vmem:[#allocation8 + $0x32c] ss:$16 sps:$4 sm:$0xff]   ;;  %v7298_v33 = vld [vmem:[#allocation8 + $0x320] ss:$16 sps:$4 sm:$0xff]  }
 0x2b6   :  { %5681 = vmatprep.subr.bf16.mxu1 %v7231_v15  ;;  %v7301_v15 = vld [vmem:[#allocation8 + $0x328] ss:$16 sps:$4 sm:$0xff]  }
 0x2b8   :  { %5518 = vmatpush1.bf16.msra.mxu0 %v7226_v36  ;;  %v7306_v36 = vld [vmem:[#allocation8 + $0x344] ss:$16 sps:$4 sm:$0xff]  }
 0x2b9   :  { %5682 = vmatpush1.bf16.msra.mxu1 %v7229_v53  ;;  %5519 = vmatprep.subr.bf16.mxu0 %v7234_v37  ;;  %v7304_v53 = vld [vmem:[#allocation8 + $0x340] ss:$16 sps:$4 sm:$0xff]   ;;  %v7307_v37 = vld [vmem:[#allocation8 + $0x348] ss:$16 sps:$4 sm:$0xff]  }
 0x2ba   :  { %5683 = vmatprep.subr.bf16.mxu1 %v7237_v40  ;;  %v7312_v40 = vld [vmem:[#allocation8 + $0x364] ss:$16 sps:$4 sm:$0xff]  }
 0x2bc   :  { %5520 = vmatpush1.bf16.msra.mxu0 %v7232_v42  ;;  %v7310_v42 = vld [vmem:[#allocation8 + $0x360] ss:$16 sps:$4 sm:$0xff]  }
 0x2bd   :  { %5684 = vmatpush1.bf16.msra.mxu1 %v7235_v39  ;;  %5521 = vmatprep.subr.bf16.mxu0 %v7240_v43  ;;  %v7318_v39 = vld [vmem:[#allocation8 + $0x384] ss:$16 sps:$4 sm:$0xff]   ;;  %v7321_v43 = vld [vmem:[#allocation8 + $0x38c] ss:$16 sps:$4 sm:$0xff]  }
 0x2be   :  { %5685 = vmatprep.subr.bf16.mxu1 %v7243_v44  ;;  %v7316_v44 = vld [vmem:[#allocation8 + $0x380] ss:$16 sps:$4 sm:$0xff]  }
 0x2c0   :  { %5522 = vmatpush1.bf16.msra.mxu0 %v7238_v46  ;;  %v7319_v46 = vld [vmem:[#allocation8 + $0x388] ss:$16 sps:$4 sm:$0xff]  }
 0x2c1   :  { %5686 = vmatpush1.bf16.msra.mxu1 %v7241_v47  ;;  %5532 = vmatprep.subr.bf16.mxu0 %v7246_v24  ;;  %v7327_v47 = vld [vmem:[#allocation8 + $0x3ac] ss:$16 sps:$4 sm:$0xff]   ;;  %v7322_v24 = vld [vmem:[#allocation8 + $0x3a0] ss:$16 sps:$4 sm:$0xff]  }
 0x2c2   :  { %5696 = vmatprep.subr.bf16.mxu1 %v7249_v55  ;;  %v644_v55 = vrot.slane %v7970_v19, %v643_v45 }
 0x2c3   :  { %5524 = vmatmul.mubr.bf16.vlgmr.msra.gmra.mrb[8].mxu0 %v3925_v50 }
 0x2c4   :  { %5688 = vmatmul.mubr.bf16.vlgmr.msra.gmra.mrb[8].mxu1 %v3925_v50  ;;  %5533 = vmatpush1.bf16.msra.mxu0 %v7244_v4  ;;  %v7330_v4 = vld [vmem:[#allocation8 + $0x3c4] ss:$16 sps:$4 sm:$0xff]   ;;  %v7333_v50 = vld [vmem:[#allocation8 + $0x3cc] ss:$16 sps:$4 sm:$0xff]  }
 0x2c5   :  { %5564 = vmatprep.mubr.bf16.mxu0 %v3928_v52  ;;  %5697 = vmatpush1.bf16.msra.mxu1 %v7247_v48  ;;  %v7328_v48 = vld [vmem:[#allocation8 + $0x3c0] ss:$16 sps:$4 sm:$0xff]  }
 0x2c6   :  { %5728 = vmatprep.mubr.bf16.mxu1 %v3928_v52  ;;  %5534 = vmatprep.subr.bf16.mxu0 %v7252_v51  ;;  %v7044_v51 = vadd.f32 %v7961_v8, %v644_v55  ;;  %v7331_v52 = vld [vmem:[#allocation8 + $0x3c8] ss:$16 sps:$4 sm:$0xff]   ;;  %v7411_v55 = vld [vmem:[#allocation8 + $0x56c] ss:$16 sps:$4 sm:$0xff]  }
 0x2c7   :  { %5698 = vmatprep.subr.bf16.mxu1 %v7255_v13  ;;  %v7336_v13 = vld [vmem:[#allocation8 + $0x3e4] ss:$16 sps:$4 sm:$0xff]   ;;  %v7343_v8 = vld [vmem:[#allocation8 + $0x408] ss:$16 sps:$4 sm:$0xff]  }
 0x2c8   :  { %5535 = vmatpush1.bf16.msra.mxu0 %v7250_v54  ;;  %v7339_v54 = vld [vmem:[#allocation8 + $0x3ec] ss:$16 sps:$4 sm:$0xff]  }
 0x2c9   :  { %5699 = vmatpush1.bf16.msra.mxu1 %v7253_v56  ;;  %5536 = vmatprep.subr.bf16.mxu0 %v7258_v58  ;;  %v7334_v56 = vld [vmem:[#allocation8 + $0x3e0] ss:$16 sps:$4 sm:$0xff]   ;;  %v3919_v58 = vmax.f32 %v7044_v51, 0.0 }
 0x2ca   :  { %5700 = vmatprep.subr.bf16.mxu1 %v7261_v59  ;;  %v7337_v59 = vld [vmem:[#allocation8 + $0x3e8] ss:$16 sps:$4 sm:$0xff]   ;;  %v7412_v51 = vld [vmem:[#allocation8 + $0x580] ss:$16 sps:$4 sm:$0xff]  }
 0x2cc   :  { %5537 = vmatpush1.bf16.msra.mxu0 %v7256_v60  ;;  %v7342_v60 = vld [vmem:[#allocation8 + $0x404] ss:$16 sps:$4 sm:$0xff]  }
 0x2cd   :  { %5701 = vmatpush1.bf16.msra.mxu1 %v7259_v61  ;;  %5538 = vmatprep.subr.bf16.mxu0 %v7264_v62  ;;  %v7345_v61 = vld [vmem:[#allocation8 + $0x40c] ss:$16 sps:$4 sm:$0xff]   ;;  %v7340_v62 = vld [vmem:[#allocation8 + $0x400] ss:$16 sps:$4 sm:$0xff]  }
 0x2ce   :  { %5702 = vmatprep.subr.bf16.mxu1 %v7267_v63  ;;  %v3927_v63 = vpack.c.bf16 %v3919_v58, %v3919_v58  ;;  %v7421_v58 = vld [vmem:[#allocation8 + $0x5a8] ss:$16 sps:$4 sm:$0xff]  }
 0x2d0   :  { %5539 = vmatpush1.bf16.msra.mxu0 %v7262_v0  ;;  %v7348_v0 = vld [vmem:[#allocation8 + $0x424] ss:$16 sps:$4 sm:$0xff]  }
 0x2d1   :  { %5703 = vmatpush1.bf16.msra.mxu1 %v7265_v1  ;;  %5540 = vmatprep.subr.bf16.mxu0 %v7270_v38  ;;  %v7351_v1 = vld [vmem:[#allocation8 + $0x42c] ss:$16 sps:$4 sm:$0xff]   ;;  %v7346_v38 = vld [vmem:[#allocation8 + $0x420] ss:$16 sps:$4 sm:$0xff]  }
 0x2d2   :  { %5704 = vmatprep.subr.bf16.mxu1 %v7273_v3  ;;  %v7349_v3 = vld [vmem:[#allocation8 + $0x428] ss:$16 sps:$4 sm:$0xff]  }
 0x2d4   :  { %5541 = vmatpush1.bf16.msra.mxu0 %v7268_v5  ;;  %v7354_v5 = vld [vmem:[#allocation8 + $0x444] ss:$16 sps:$4 sm:$0xff]  }
 0x2d5   :  { %5705 = vmatpush1.bf16.msra.mxu1 %v7271_v6  ;;  %5542 = vmatprep.subr.bf16.mxu0 %v7276_v7  ;;  %v7357_v6 = vld [vmem:[#allocation8 + $0x44c] ss:$16 sps:$4 sm:$0xff]   ;;  %v7352_v7 = vld [vmem:[#allocation8 + $0x440] ss:$16 sps:$4 sm:$0xff]  }
 0x2d6   :  { %5706 = vmatprep.subr.bf16.mxu1 %v7279_v10  ;;  %v7355_v10 = vld [vmem:[#allocation8 + $0x448] ss:$16 sps:$4 sm:$0xff]  }
 0x2d8   :  { %5543 = vmatpush1.bf16.msra.mxu0 %v7274_v11  ;;  %v7360_v11 = vld [vmem:[#allocation8 + $0x464] ss:$16 sps:$4 sm:$0xff]  }
 0x2d9   :  { %5707 = vmatpush1.bf16.msra.mxu1 %v7277_v14  ;;  %5544 = vmatprep.subr.bf16.mxu0 %v7282_v17  ;;  %v7363_v14 = vld [vmem:[#allocation8 + $0x46c] ss:$16 sps:$4 sm:$0xff]   ;;  %v7358_v17 = vld [vmem:[#allocation8 + $0x460] ss:$16 sps:$4 sm:$0xff]  }
 0x2da   :  { %5708 = vmatprep.subr.bf16.mxu1 %v7285_v18  ;;  %v7361_v18 = vld [vmem:[#allocation8 + $0x468] ss:$16 sps:$4 sm:$0xff]  }
 0x2dc   :  { %5545 = vmatpush1.bf16.msra.mxu0 %v7280_v20  ;;  %v7366_v20 = vld [vmem:[#allocation8 + $0x484] ss:$16 sps:$4 sm:$0xff]  }
 0x2dd   :  { %5709 = vmatpush1.bf16.msra.mxu1 %v7283_v21  ;;  %5546 = vmatprep.subr.bf16.mxu0 %v7288_v22  ;;  %v7369_v21 = vld [vmem:[#allocation8 + $0x48c] ss:$16 sps:$4 sm:$0xff]   ;;  %v7364_v22 = vld [vmem:[#allocation8 + $0x480] ss:$16 sps:$4 sm:$0xff]  }
 0x2de   :  { %5710 = vmatprep.subr.bf16.mxu1 %v7291_v57  ;;  %v7367_v57 = vld [vmem:[#allocation8 + $0x488] ss:$16 sps:$4 sm:$0xff]  }
 0x2e0   :  { %5547 = vmatpush1.bf16.msra.mxu0 %v7286_v23  ;;  %v7372_v23 = vld [vmem:[#allocation8 + $0x4a4] ss:$16 sps:$4 sm:$0xff]  }
 0x2e1   :  { %5711 = vmatpush1.bf16.msra.mxu1 %v7289_v26  ;;  %5548 = vmatprep.subr.bf16.mxu0 %v7294_v27  ;;  %v7375_v26 = vld [vmem:[#allocation8 + $0x4ac] ss:$16 sps:$4 sm:$0xff]   ;;  %v7370_v27 = vld [vmem:[#allocation8 + $0x4a0] ss:$16 sps:$4 sm:$0xff]  }
 0x2e2   :  { %5712 = vmatprep.subr.bf16.mxu1 %v7297_v12  ;;  %v7373_v12 = vld [vmem:[#allocation8 + $0x4a8] ss:$16 sps:$4 sm:$0xff]  }
 0x2e4   :  { %5549 = vmatpush1.bf16.msra.mxu0 %v7292_v28  ;;  %v7378_v28 = vld [vmem:[#allocation8 + $0x4c4] ss:$16 sps:$4 sm:$0xff]  }
 0x2e5   :  { %5713 = vmatpush1.bf16.msra.mxu1 %v7295_v29  ;;  %5550 = vmatprep.subr.bf16.mxu0 %v7300_v30  ;;  %v7381_v29 = vld [vmem:[#allocation8 + $0x4cc] ss:$16 sps:$4 sm:$0xff]   ;;  %v7376_v30 = vld [vmem:[#allocation8 + $0x4c0] ss:$16 sps:$4 sm:$0xff]  }
 0x2e6   :  { %5714 = vmatprep.subr.bf16.mxu1 %v7303_v32  ;;  %v7379_v32 = vld [vmem:[#allocation8 + $0x4c8] ss:$16 sps:$4 sm:$0xff]  }
 0x2e8   :  { %5551 = vmatpush1.bf16.msra.mxu0 %v7298_v33  ;;  %v7384_v33 = vld [vmem:[#allocation8 + $0x4e4] ss:$16 sps:$4 sm:$0xff]  }
 0x2e9   :  { %5715 = vmatpush1.bf16.msra.mxu1 %v7301_v15  ;;  %5552 = vmatprep.subr.bf16.mxu0 %v7306_v36  ;;  %v7387_v15 = vld [vmem:[#allocation8 + $0x4ec] ss:$16 sps:$4 sm:$0xff]   ;;  %v7382_v36 = vld [vmem:[#allocation8 + $0x4e0] ss:$16 sps:$4 sm:$0xff]  }
 0x2ea   :  { %5716 = vmatprep.subr.bf16.mxu1 %v7309_v25  ;;  %v7385_v25 = vld [vmem:[#allocation8 + $0x4e8] ss:$16 sps:$4 sm:$0xff]  }
 0x2ec   :  { %5553 = vmatpush1.bf16.msra.mxu0 %v7304_v53  ;;  %v7390_v53 = vld [vmem:[#allocation8 + $0x504] ss:$16 sps:$4 sm:$0xff]  }
 0x2ed   :  { %5717 = vmatpush1.bf16.msra.mxu1 %v7307_v37  ;;  %5554 = vmatprep.subr.bf16.mxu0 %v7312_v40  ;;  %v7393_v37 = vld [vmem:[#allocation8 + $0x50c] ss:$16 sps:$4 sm:$0xff]   ;;  %v7388_v40 = vld [vmem:[#allocation8 + $0x500] ss:$16 sps:$4 sm:$0xff]  }
 0x2ee   :  { %5718 = vmatprep.subr.bf16.mxu1 %v7315_v41  ;;  %v7391_v41 = vld [vmem:[#allocation8 + $0x508] ss:$16 sps:$4 sm:$0xff]  }
 0x2f0   :  { %5555 = vmatpush1.bf16.msra.mxu0 %v7310_v42  ;;  %v7396_v42 = vld [vmem:[#allocation8 + $0x524] ss:$16 sps:$4 sm:$0xff]  }
 0x2f1   :  { %5719 = vmatpush1.bf16.msra.mxu1 %v7313_v9  ;;  %5556 = vmatprep.subr.bf16.mxu0 %v7318_v39  ;;  %v7399_v9 = vld [vmem:[#allocation8 + $0x52c] ss:$16 sps:$4 sm:$0xff]   ;;  %v7394_v39 = vld [vmem:[#allocation8 + $0x520] ss:$16 sps:$4 sm:$0xff]  }
 0x2f2   :  { %5720 = vmatprep.subr.bf16.mxu1 %v7321_v43  ;;  %v7397_v43 = vld [vmem:[#allocation8 + $0x528] ss:$16 sps:$4 sm:$0xff]  }
 0x2f4   :  { %5557 = vmatpush1.bf16.msra.mxu0 %v7316_v44  ;;  %v7402_v44 = vld [vmem:[#allocation8 + $0x544] ss:$16 sps:$4 sm:$0xff]  }
 0x2f5   :  { %5721 = vmatpush1.bf16.msra.mxu1 %v7319_v46  ;;  %5558 = vmatprep.subr.bf16.mxu0 %v7324_v34  ;;  %v7405_v46 = vld [vmem:[#allocation8 + $0x54c] ss:$16 sps:$4 sm:$0xff]   ;;  %v7400_v34 = vld [vmem:[#allocation8 + $0x540] ss:$16 sps:$4 sm:$0xff]  }
 0x2f6   :  { %5722 = vmatprep.subr.bf16.mxu1 %v7327_v47  ;;  %v7403_v47 = vld [vmem:[#allocation8 + $0x548] ss:$16 sps:$4 sm:$0xff]  }
 0x2f8   :  { %5559 = vmatpush1.bf16.msra.mxu0 %v7322_v24  ;;  %v7408_v24 = vld [vmem:[#allocation8 + $0x564] ss:$16 sps:$4 sm:$0xff]  }
 0x2f9   :  { %5723 = vmatpush1.bf16.msra.mxu1 %v7325_v49  ;;  %5560 = vmatprep.subr.bf16.mxu0 %v7330_v4  ;;  %v7406_v49 = vld [vmem:[#allocation8 + $0x560] ss:$16 sps:$4 sm:$0xff]   ;;  %v7409_v4 = vld [vmem:[#allocation8 + $0x568] ss:$16 sps:$4 sm:$0xff]  }
 0x2fa   :  { %5724 = vmatprep.subr.bf16.mxu1 %v7333_v50  ;;  %v7414_v50 = vld [vmem:[#allocation8 + $0x584] ss:$16 sps:$4 sm:$0xff]  }
 0x2fc   :  { %5561 = vmatpush1.bf16.msra.mxu0 %v7328_v48  ;;  %v7417_v48 = vld [vmem:[#allocation8 + $0x58c] ss:$16 sps:$4 sm:$0xff]  }
 0x2fd   :  { %5725 = vmatpush1.bf16.msra.mxu1 %v7331_v52  ;;  %5562 = vmatprep.subr.bf16.mxu0 %v7336_v13  ;;  %v7415_v52 = vld [vmem:[#allocation8 + $0x588] ss:$16 sps:$4 sm:$0xff]   ;;  %v7420_v13 = vld [vmem:[#allocation8 + $0x5a4] ss:$16 sps:$4 sm:$0xff]  }
 0x2fe   :  { %5726 = vmatprep.subr.bf16.mxu1 %v7339_v54  ;;  %v7423_v54 = vld [vmem:[#allocation8 + $0x5ac] ss:$16 sps:$4 sm:$0xff]  }
 0x300   :  { %5563 = vmatpush1.bf16.msra.mxu0 %v7334_v56  ;;  %v7418_v56 = vld [vmem:[#allocation8 + $0x5a0] ss:$16 sps:$4 sm:$0xff]  }
 0x301   :  { %5727 = vmatpush1.bf16.msra.mxu1 %v7337_v59  ;;  %5573 = vmatprep.subr.bf16.mxu0 %v7342_v60  ;;  %v7426_v59 = vld [vmem:[#allocation8 + $0x5c4] ss:$16 sps:$4 sm:$0xff]   ;;  %v7429_v60 = vld [vmem:[#allocation8 + $0x5cc] ss:$16 sps:$4 sm:$0xff]  }
 0x302   :  { %5737 = vmatprep.subr.bf16.mxu1 %v7345_v61  ;;  %v7424_v61 = vld [vmem:[#allocation8 + $0x5c0] ss:$16 sps:$4 sm:$0xff]  }
 0x303   :  { %5565 = vmatmul.mubr.bf16.vlgmr.msra.gmra.mrb[8].mxu0 %v3927_v63 }
 0x304   :  { %5729 = vmatmul.mubr.bf16.vlgmr.msra.gmra.mrb[8].mxu1 %v3927_v63  ;;  %5574 = vmatpush1.bf16.msra.mxu0 %v7340_v62  ;;  %v7427_v62 = vld [vmem:[#allocation8 + $0x5c8] ss:$16 sps:$4 sm:$0xff]   ;;  %v7432_v63 = vld [vmem:[#allocation8 + $0x5e4] ss:$16 sps:$4 sm:$0xff]  }
 0x305   :  { %5738 = vmatpush1.bf16.msra.mxu1 %v7343_v8  ;;  %5575 = vmatprep.subr.bf16.mxu0 %v7348_v0  ;;  %v7435_v8 = vld [vmem:[#allocation8 + $0x5ec] ss:$16 sps:$4 sm:$0xff]   ;;  %v7430_v0 = vld [vmem:[#allocation8 + $0x5e0] ss:$16 sps:$4 sm:$0xff]  }
 0x306   :  { %5739 = vmatprep.subr.bf16.mxu1 %v7351_v1  ;;  %v7433_v1 = vld [vmem:[#allocation8 + $0x5e8] ss:$16 sps:$4 sm:$0xff]  }
 0x308   :  { %5576 = vmatpush1.bf16.msra.mxu0 %v7346_v38  ;;  %v7438_v38 = vld [vmem:[#allocation8 + $0x604] ss:$16 sps:$4 sm:$0xff]  }
 0x309   :  { %5740 = vmatpush1.bf16.msra.mxu1 %v7349_v3  ;;  %5577 = vmatprep.subr.bf16.mxu0 %v7354_v5  ;;  %v7441_v3 = vld [vmem:[#allocation8 + $0x60c] ss:$16 sps:$4 sm:$0xff]   ;;  %v651_v5 = vsub.s32 4, %v7967_v2 }
 0x30a   :  { %5741 = vmatprep.subr.bf16.mxu1 %v7357_v6  ;;  %v655_v6 = vsub.s32 5, %v7967_v2 }
 0x30c   :  { %5578 = vmatpush1.bf16.msra.mxu0 %v7352_v7  ;;  %v663_v7 = vsub.s32 7, %v7967_v2 }
 0x30d   :  { %5742 = vmatpush1.bf16.msra.mxu1 %v7355_v10  ;;  %5579 = vmatprep.subr.bf16.mxu0 %v7360_v11  ;;  %v652_v10 = vrot.slane %v7970_v19, %v651_v5  ;;  %v656_v11 = vrot.slane %v7970_v19, %v655_v6  ;;  %v7490_v5 = vld [vmem:[#allocation8 + $0x720] ss:$16 sps:$4 sm:$0xff]   ;;  %v7493_v6 = vld [vmem:[#allocation8 + $0x728] ss:$16 sps:$4 sm:$0xff]  }
 0x30e   :  { %5743 = vmatprep.subr.bf16.mxu1 %v7363_v14  ;;  %v664_v14 = vrot.slane %v7970_v19, %v663_v7  ;;  %v7444_v19 = vld [vmem:[#allocation8 + $0x624] ss:$16 sps:$4 sm:$0xff]  }
 0x30f   :  { %v7498_v7 = vld [vmem:[#allocation8 + $0x744] ss:$16 sps:$4 sm:$0xff]  }
 0x310   :  { %5580 = vmatpush1.bf16.msra.mxu0 %v7358_v17 }
 0x311   :  { %5744 = vmatpush1.bf16.msra.mxu1 %v7361_v18  ;;  %5581 = vmatprep.subr.bf16.mxu0 %v7366_v20 }
 0x312   :  { %5745 = vmatprep.subr.bf16.mxu1 %v7369_v21 }
 0x314   :  { %5582 = vmatpush1.bf16.msra.mxu0 %v7364_v22 }
 0x315   :  { %5746 = vmatpush1.bf16.msra.mxu1 %v7367_v57  ;;  %5583 = vmatprep.subr.bf16.mxu0 %v7372_v23 }
 0x316   :  { %5747 = vmatprep.subr.bf16.mxu1 %v7375_v26 }
 0x318   :  { %5584 = vmatpush1.bf16.msra.mxu0 %v7370_v27 }
 0x319   :  { %5748 = vmatpush1.bf16.msra.mxu1 %v7373_v12  ;;  %5585 = vmatprep.subr.bf16.mxu0 %v7378_v28 }
 0x31a   :  { %5749 = vmatprep.subr.bf16.mxu1 %v7381_v29 }
 0x31c   :  { %5586 = vmatpush1.bf16.msra.mxu0 %v7376_v30 }
 0x31d   :  { %5750 = vmatpush1.bf16.msra.mxu1 %v7379_v32  ;;  %5587 = vmatprep.subr.bf16.mxu0 %v7384_v33 }
 0x31e   :  { %5751 = vmatprep.subr.bf16.mxu1 %v7387_v15  ;;  %v7436_v15 = vld [vmem:[#allocation8 + $0x600] ss:$16 sps:$4 sm:$0xff]  }
 0x320   :  { %5588 = vmatpush1.bf16.msra.mxu0 %v7382_v36  ;;  %v7439_v36 = vld [vmem:[#allocation8 + $0x608] ss:$16 sps:$4 sm:$0xff]  }
 0x321   :  { %5752 = vmatpush1.bf16.msra.mxu1 %v7385_v25  ;;  %5589 = vmatprep.subr.bf16.mxu0 %v7390_v53  ;;  %v7447_v53 = vld [vmem:[#allocation8 + $0x62c] ss:$16 sps:$4 sm:$0xff]  }
 0x322   :  { %5753 = vmatprep.subr.bf16.mxu1 %v7393_v37 }
 0x324   :  { %5590 = vmatpush1.bf16.msra.mxu0 %v7388_v40  ;;  %v7442_v40 = vld [vmem:[#allocation8 + $0x620] ss:$16 sps:$4 sm:$0xff]  }
 0x325   :  { %5754 = vmatpush1.bf16.msra.mxu1 %v7391_v41  ;;  %5591 = vmatprep.subr.bf16.mxu0 %v7396_v42  ;;  %v7445_v41 = vld [vmem:[#allocation8 + $0x628] ss:$16 sps:$4 sm:$0xff]   ;;  %v7450_v42 = vld [vmem:[#allocation8 + $0x644] ss:$16 sps:$4 sm:$0xff]  }
 0x326   :  { %5755 = vmatprep.subr.bf16.mxu1 %v7399_v9  ;;  %v7453_v9 = vld [vmem:[#allocation8 + $0x64c] ss:$16 sps:$4 sm:$0xff]  }
 0x328   :  { %5592 = vmatpush1.bf16.msra.mxu0 %v7394_v39  ;;  %v7448_v39 = vld [vmem:[#allocation8 + $0x640] ss:$16 sps:$4 sm:$0xff]  }
 0x329   :  { %5756 = vmatpush1.bf16.msra.mxu1 %v7397_v43  ;;  %5593 = vmatprep.subr.bf16.mxu0 %v7402_v44  ;;  %v7451_v43 = vld [vmem:[#allocation8 + $0x648] ss:$16 sps:$4 sm:$0xff]   ;;  %v7456_v44 = vld [vmem:[#allocation8 + $0x664] ss:$16 sps:$4 sm:$0xff]  }
 0x32a   :  { %5757 = vmatprep.subr.bf16.mxu1 %v7405_v46  ;;  %v7459_v46 = vld [vmem:[#allocation8 + $0x66c] ss:$16 sps:$4 sm:$0xff]  }
 0x32c   :  { %5594 = vmatpush1.bf16.msra.mxu0 %v7400_v34  ;;  %v7454_v34 = vld [vmem:[#allocation8 + $0x660] ss:$16 sps:$4 sm:$0xff]  }
 0x32d   :  { %5758 = vmatpush1.bf16.msra.mxu1 %v7403_v47  ;;  %5595 = vmatprep.subr.bf16.mxu0 %v7408_v24  ;;  %v7457_v47 = vld [vmem:[#allocation8 + $0x668] ss:$16 sps:$4 sm:$0xff]   ;;  %v7462_v24 = vld [vmem:[#allocation8 + $0x684] ss:$16 sps:$4 sm:$0xff]  }
 0x32e   :  { %5759 = vmatprep.subr.bf16.mxu1 %v7411_v55  ;;  %v7465_v55 = vld [vmem:[#allocation8 + $0x68c] ss:$16 sps:$4 sm:$0xff]  }
 0x330   :  { %5596 = vmatpush1.bf16.msra.mxu0 %v7406_v49  ;;  %v7460_v49 = vld [vmem:[#allocation8 + $0x680] ss:$16 sps:$4 sm:$0xff]  }
 0x331   :  { %5760 = vmatpush1.bf16.msra.mxu1 %v7409_v4  ;;  %5597 = vmatprep.subr.bf16.mxu0 %v7414_v50  ;;  %v7463_v4 = vld [vmem:[#allocation8 + $0x688] ss:$16 sps:$4 sm:$0xff]   ;;  %v7468_v50 = vld [vmem:[#allocation8 + $0x6a4] ss:$16 sps:$4 sm:$0xff]  }
 0x332   :  { %5761 = vmatprep.subr.bf16.mxu1 %v7417_v48  ;;  %v7471_v48 = vld [vmem:[#allocation8 + $0x6ac] ss:$16 sps:$4 sm:$0xff]  }
 0x334   :  { %5598 = vmatpush1.bf16.msra.mxu0 %v7412_v51  ;;  %v7466_v51 = vld [vmem:[#allocation8 + $0x6a0] ss:$16 sps:$4 sm:$0xff]  }
 0x335   :  { %5762 = vmatpush1.bf16.msra.mxu1 %v7415_v52  ;;  %5599 = vmatprep.subr.bf16.mxu0 %v7420_v13  ;;  %v7469_v52 = vld [vmem:[#allocation8 + $0x6a8] ss:$16 sps:$4 sm:$0xff]   ;;  %v7474_v13 = vld [vmem:[#allocation8 + $0x6c4] ss:$16 sps:$4 sm:$0xff]  }
 0x336   :  { %5763 = vmatprep.subr.bf16.mxu1 %v7423_v54  ;;  %v7477_v54 = vld [vmem:[#allocation8 + $0x6cc] ss:$16 sps:$4 sm:$0xff]  }
 0x338   :  { %5600 = vmatpush1.bf16.msra.mxu0 %v7418_v56  ;;  %v7472_v56 = vld [vmem:[#allocation8 + $0x6c0] ss:$16 sps:$4 sm:$0xff]  }
 0x339   :  { %5764 = vmatpush1.bf16.msra.mxu1 %v7421_v58  ;;  %5601 = vmatprep.subr.bf16.mxu0 %v7426_v59  ;;  %v7475_v58 = vld [vmem:[#allocation8 + $0x6c8] ss:$16 sps:$4 sm:$0xff]   ;;  %v7480_v59 = vld [vmem:[#allocation8 + $0x6e4] ss:$16 sps:$4 sm:$0xff]  }
 0x33a   :  { %5765 = vmatprep.subr.bf16.mxu1 %v7429_v60  ;;  %v7483_v60 = vld [vmem:[#allocation8 + $0x6ec] ss:$16 sps:$4 sm:$0xff]  }
 0x33c   :  { %5602 = vmatpush1.bf16.msra.mxu0 %v7424_v61  ;;  %v7478_v61 = vld [vmem:[#allocation8 + $0x6e0] ss:$16 sps:$4 sm:$0xff]  }
 0x33d   :  { %5766 = vmatpush1.bf16.msra.mxu1 %v7427_v62  ;;  %5603 = vmatprep.subr.bf16.mxu0 %v7432_v63  ;;  %v7481_v62 = vld [vmem:[#allocation8 + $0x6e8] ss:$16 sps:$4 sm:$0xff]   ;;  %v7486_v63 = vld [vmem:[#allocation8 + $0x704] ss:$16 sps:$4 sm:$0xff]  }
 0x33e   :  { %5767 = vmatprep.subr.bf16.mxu1 %v7435_v8  ;;  %v7489_v8 = vld [vmem:[#allocation8 + $0x70c] ss:$16 sps:$4 sm:$0xff]  }
 0x340   :  { %5604 = vmatpush1.bf16.msra.mxu0 %v7430_v0  ;;  %v7484_v0 = vld [vmem:[#allocation8 + $0x700] ss:$16 sps:$4 sm:$0xff]  }
 0x341   :  { %5768 = vmatpush1.bf16.msra.mxu1 %v7433_v1  ;;  %5614 = vmatprep.subr.bf16.mxu0 %v7438_v38  ;;  %v7487_v1 = vld [vmem:[#allocation8 + $0x708] ss:$16 sps:$4 sm:$0xff]   ;;  %v7492_v38 = vld [vmem:[#allocation8 + $0x724] ss:$16 sps:$4 sm:$0xff]  }
 0x342   :  { %5778 = vmatprep.subr.bf16.mxu1 %v7441_v3  ;;  %v7495_v3 = vld [vmem:[#allocation8 + $0x72c] ss:$16 sps:$4 sm:$0xff]  }
 0x356   :  { %v3746_v17 = vpop.f32.mrb[4].mxu0  ;;  %v7999_v20 = vpop.f32.mrb[4].mxu1 }
 0x357   :  { %v7046_v18 = vadd.f32 %v3746_v17, %v652_v10  ;;  %v3748_v21 = vpop.f32.mrb[5].mxu0  ;;  %v3912_v57 = vpop.f32.mrb[5].mxu1  ;;  %v7501_v10 = vld [vmem:[#allocation8 + $0x74c] ss:$16 sps:$4 sm:$0xff]   ;;  %v7504_v17 = vld [vmem:[#allocation8 + $0x764] ss:$16 sps:$4 sm:$0xff]  }
 0x358   :  { %v7047_v22 = vadd.f32 %v3748_v21, %v656_v11  ;;  %v3750_v23 = vpop.f32.mrb[6].mxu0  ;;  %v7049_v27 = vadd.f32 %v3912_v57, %v664_v14  ;;  %v3914_v12 = vpop.f32.mrb[6].mxu1  ;;  %v7496_v11 = vld [vmem:[#allocation8 + $0x740] ss:$16 sps:$4 sm:$0xff]   ;;  %v7499_v14 = vld [vmem:[#allocation8 + $0x748] ss:$16 sps:$4 sm:$0xff]  }
 0x359   :  { %v3921_v26 = vmax.f32 %v7046_v18, 0.0  ;;  %v3751_v28 = vpop.f32.mrb[7].mxu0  ;;  %v3915_v30 = vpop.f32.mrb[7].mxu1  ;;  %v7507_v18 = vld [vmem:[#allocation8 + $0x76c] ss:$16 sps:$4 sm:$0xff]   ;;  %v659_v12 = vsub.s32 6, %v7967_v2 }
 0x35a   :  { %v3922_v29 = vmax.f32 %v7047_v22, 0.0  ;;  %v3924_v32 = vmax.f32 %v7049_v27, 0.0  ;;  %v7502_v21 = vld [vmem:[#allocation8 + $0x760] ss:$16 sps:$4 sm:$0xff]   ;;  %v7505_v22 = vld [vmem:[#allocation8 + $0x768] ss:$16 sps:$4 sm:$0xff]  }
 0x35b   :  { %v3929_v25 = vpack.c.bf16 %v3921_v26, %v3921_v26  ;;  %v7510_v57 = vld [vmem:[#allocation8 + $0x784] ss:$16 sps:$4 sm:$0xff]   ;;  %v7513_v23 = vld [vmem:[#allocation8 + $0x78c] ss:$16 sps:$4 sm:$0xff]   ;;  %v7508_v26 = vld [vmem:[#allocation8 + $0x780] ss:$16 sps:$4 sm:$0xff]  }
 0x35c   :  { %v3930_v33 = vpack.c.bf16 %v3922_v29, %v3922_v29  ;;  %v3932_v37 = vpack.c.bf16 %v3924_v32, %v3924_v32  ;;  %v7511_v27 = vld [vmem:[#allocation8 + $0x788] ss:$16 sps:$4 sm:$0xff]   ;;  %v7516_v28 = vld [vmem:[#allocation8 + $0x7a4] ss:$16 sps:$4 sm:$0xff]   ;;  %v7519_v29 = vld [vmem:[#allocation8 + $0x7ac] ss:$16 sps:$4 sm:$0xff]  }
 0x35d   :  { %v7514_v30 = vld [vmem:[#allocation8 + $0x7a0] ss:$16 sps:$4 sm:$0xff]   ;;  %v7517_v32 = vld [vmem:[#allocation8 + $0x7a8] ss:$16 sps:$4 sm:$0xff]  }
 0x35e   :  { %5605 = vmatprep.mubr.bf16.mxu0 %v3930_v33  ;;  %5769 = vmatprep.mubr.bf16.mxu1 %v3930_v33  ;;  %v7564_v33 = vld [vmem:[#allocation7] sm:$0xff] }
 0x35f   :  { %5606 = vmatmul.mubr.bf16.vlgmr.msra.gmra.mrb[8].mxu0 %v3929_v25  ;;  %5770 = vmatmul.mubr.bf16.vlgmr.msra.gmra.mrb[8].mxu1 %v3929_v25  ;;  %v7525_v25 = vld [vmem:[#allocation8 + $0x7cc] ss:$16 sps:$4 sm:$0xff]  }
 0x360   :  { %5615 = vmatpush1.bf16.msra.mxu0 %v7436_v15  ;;  %5779 = vmatpush1.bf16.msra.mxu1 %v7439_v36  ;;  %v660_v15 = vrot.slane %v7564_v33, %v659_v12  ;;  %v7522_v36 = vld [vmem:[#allocation8 + $0x7c4] ss:$16 sps:$4 sm:$0xff]  }
 0x361   :  { %5646 = vmatprep.mubr.bf16.mxu0 %v3932_v37  ;;  %5810 = vmatprep.mubr.bf16.mxu1 %v3932_v37 }
 0x362   :  { %5616 = vmatprep.subr.bf16.mxu0 %v7444_v19  ;;  %5780 = vmatprep.subr.bf16.mxu1 %v7447_v53  ;;  %v7520_v19 = vld [vmem:[#allocation8 + $0x7c0] ss:$16 sps:$4 sm:$0xff]   ;;  %v7523_v53 = vld [vmem:[#allocation8 + $0x7c8] ss:$16 sps:$4 sm:$0xff]   ;;  %v7048_v37 = vadd.f32 %v7999_v20, %v660_v15 }
 0x363   :  { %v7536_v20 = vld [vmem:[#allocation11 + $0x48] sm:$0xff]  }
 0x364   :  { %5617 = vmatpush1.bf16.msra.mxu0 %v7442_v40  ;;  %5781 = vmatpush1.bf16.msra.mxu1 %v7445_v41  ;;  %v7528_v40 = vld [vmem:[#allocation8 + $0x7e4] ss:$16 sps:$4 sm:$0xff]   ;;  %v7531_v41 = vld [vmem:[#allocation8 + $0x7ec] ss:$16 sps:$4 sm:$0xff]  }
 0x365   :  { %5618 = vmatprep.subr.bf16.mxu0 %v7450_v42  ;;  %5782 = vmatprep.subr.bf16.mxu1 %v7453_v9  ;;  %v7526_v42 = vld [vmem:[#allocation8 + $0x7e0] ss:$16 sps:$4 sm:$0xff]   ;;  %v7529_v9 = vld [vmem:[#allocation8 + $0x7e8] ss:$16 sps:$4 sm:$0xff]  }
 0x368   :  { %5619 = vmatpush1.bf16.msra.mxu0 %v7448_v39  ;;  %5783 = vmatpush1.bf16.msra.mxu1 %v7451_v43  ;;  %v3923_v39 = vmax.f32 %v7048_v37, 0.0  ;;  %v7532_v43 = vld [vmem:[#allocation11 + $0x40] sm:$0xff]  }
 0x369   :  { %5620 = vmatprep.subr.bf16.mxu0 %v7456_v44  ;;  %5784 = vmatprep.subr.bf16.mxu1 %v7459_v46  ;;  %v7533_v44 = vld [vmem:[#allocation11 + $0xc0] sm:$0xff]  }
 0x36a   :  { %v7534_v46 = vld [vmem:[#allocation11] sm:$0xff]  }
 0x36c   :  { %5621 = vmatpush1.bf16.msra.mxu0 %v7454_v34  ;;  %5785 = vmatpush1.bf16.msra.mxu1 %v7457_v47  ;;  %v7535_v34 = vld [vmem:[#allocation11 + $0x80] sm:$0xff]   ;;  %v3931_v47 = vpack.c.bf16 %v3923_v39, %v3923_v39 }
 0x36d   :  { %5622 = vmatprep.subr.bf16.mxu0 %v7462_v24  ;;  %5786 = vmatprep.subr.bf16.mxu1 %v7465_v55  ;;  %v7537_v24 = vld [vmem:[#allocation11 + $0xc8] sm:$0xff]  }
 0x36e   :  { %v7538_v55 = vld [vmem:[#allocation11 + $0x8] sm:$0xff]  }
 0x370   :  { %5623 = vmatpush1.bf16.msra.mxu0 %v7460_v49  ;;  %5787 = vmatpush1.bf16.msra.mxu1 %v7463_v4  ;;  %v7539_v49 = vld [vmem:[#allocation11 + $0x88] sm:$0xff]   ;;  %v7540_v4 = vld [vmem:[#allocation11 + $0x50] sm:$0xff]  }
 0x371   :  { %5624 = vmatprep.subr.bf16.mxu0 %v7468_v50  ;;  %5788 = vmatprep.subr.bf16.mxu1 %v7471_v48  ;;  %v7541_v50 = vld [vmem:[#allocation11 + $0xd0] sm:$0xff]  }
 0x372   :  { %v7542_v48 = vld [vmem:[#allocation11 + $0x10] sm:$0xff]  }
 0x374   :  { %5625 = vmatpush1.bf16.msra.mxu0 %v7466_v51  ;;  %5789 = vmatpush1.bf16.msra.mxu1 %v7469_v52  ;;  %v7543_v51 = vld [vmem:[#allocation11 + $0x90] sm:$0xff]   ;;  %v7544_v52 = vld [vmem:[#allocation11 + $0x58] sm:$0xff]  }
 0x375   :  { %5626 = vmatprep.subr.bf16.mxu0 %v7474_v13  ;;  %5790 = vmatprep.subr.bf16.mxu1 %v7477_v54  ;;  %v7545_v13 = vld [vmem:[#allocation11 + $0xd8] sm:$0xff]  }
 0x376   :  { %v7546_v54 = vld [vmem:[#allocation11 + $0x18] sm:$0xff]  }
 0x378   :  { %5627 = vmatpush1.bf16.msra.mxu0 %v7472_v56  ;;  %5791 = vmatpush1.bf16.msra.mxu1 %v7475_v58  ;;  %v7547_v56 = vld [vmem:[#allocation11 + $0x98] sm:$0xff]   ;;  %v7548_v58 = vld [vmem:[#allocation11 + $0x60] sm:$0xff]  }
 0x379   :  { %5628 = vmatprep.subr.bf16.mxu0 %v7480_v59  ;;  %5792 = vmatprep.subr.bf16.mxu1 %v7483_v60  ;;  %v7549_v59 = vld [vmem:[#allocation11 + $0xe0] sm:$0xff]  }
 0x37a   :  { %v7550_v60 = vld [vmem:[#allocation11 + $0x20] sm:$0xff]  }
 0x37c   :  { %5629 = vmatpush1.bf16.msra.mxu0 %v7478_v61  ;;  %5793 = vmatpush1.bf16.msra.mxu1 %v7481_v62  ;;  %v7551_v61 = vld [vmem:[#allocation11 + $0xa0] sm:$0xff]   ;;  %v7552_v62 = vld [vmem:[#allocation11 + $0x68] sm:$0xff]  }
 0x37d   :  { %5630 = vmatprep.subr.bf16.mxu0 %v7486_v63  ;;  %5794 = vmatprep.subr.bf16.mxu1 %v7489_v8  ;;  %v7553_v63 = vld [vmem:[#allocation11 + $0xe8] sm:$0xff]  }
 0x37e   :  { %v7554_v8 = vld [vmem:[#allocation11 + $0x28] sm:$0xff]  }
 0x380   :  { %5631 = vmatpush1.bf16.msra.mxu0 %v7484_v0  ;;  %5795 = vmatpush1.bf16.msra.mxu1 %v7487_v1  ;;  %v7555_v0 = vld [vmem:[#allocation11 + $0xa8] sm:$0xff]   ;;  %v7556_v1 = vld [vmem:[#allocation11 + $0x70] sm:$0xff]  }
 0x381   :  { %5632 = vmatprep.subr.bf16.mxu0 %v7492_v38  ;;  %5796 = vmatprep.subr.bf16.mxu1 %v7495_v3  ;;  %v7557_v38 = vld [vmem:[#allocation11 + $0xf0] sm:$0xff]  }
 0x382   :  { %v7558_v3 = vld [vmem:[#allocation11 + $0x30] sm:$0xff]  }
 0x384   :  { %5633 = vmatpush1.bf16.msra.mxu0 %v7490_v5  ;;  %5797 = vmatpush1.bf16.msra.mxu1 %v7493_v6  ;;  %v7559_v5 = vld [vmem:[#allocation11 + $0xb0] sm:$0xff]   ;;  %v7560_v6 = vld [vmem:[#allocation11 + $0x78] sm:$0xff]  }
 0x385   :  { %5634 = vmatprep.subr.bf16.mxu0 %v7498_v7  ;;  %5798 = vmatprep.subr.bf16.mxu1 %v7501_v10  ;;  %v7561_v7 = vld [vmem:[#allocation11 + $0xf8] sm:$0xff]  }
 0x386   :  { %v7562_v10 = vld [vmem:[#allocation11 + $0x38] sm:$0xff]  }
 0x388   :  { %5635 = vmatpush1.bf16.msra.mxu0 %v7496_v11  ;;  %5799 = vmatpush1.bf16.msra.mxu1 %v7499_v14  ;;  %v7563_v11 = vld [vmem:[#allocation11 + $0xb8] sm:$0xff]  }
 0x389   :  { %5636 = vmatprep.subr.bf16.mxu0 %v7504_v17  ;;  %5800 = vmatprep.subr.bf16.mxu1 %v7507_v18  ;;  %v4189_v14 = vld [vmem:[#allocation10] sm:$0xf] }
 0x38a   :  { %v4194_v17 = vrot.slane %v4189_v14, %v635_v31  ;;  %v4202_v18 = vrot.slane %v4189_v14, %v643_v45 }
 0x38c   :  { %5637 = vmatpush1.bf16.msra.mxu0 %v7502_v21  ;;  %5801 = vmatpush1.bf16.msra.mxu1 %v7505_v22  ;;  %v4198_v21 = vrot.slane %v4189_v14, %v639_v16  ;;  %v4206_v22 = vrot.slane %v4189_v14, %v647_v35 }
 0x38d   :  { %5638 = vmatprep.subr.bf16.mxu0 %v7510_v57  ;;  %5802 = vmatprep.subr.bf16.mxu1 %v7513_v23 }
 0x390   :  { %5639 = vmatpush1.bf16.msra.mxu0 %v7508_v26  ;;  %5803 = vmatpush1.bf16.msra.mxu1 %v7511_v27 }
 0x391   :  { %5640 = vmatprep.subr.bf16.mxu0 %v7516_v28  ;;  %5804 = vmatprep.subr.bf16.mxu1 %v7519_v29 }
 0x394   :  { %5641 = vmatpush1.bf16.msra.mxu0 %v7514_v30  ;;  %5805 = vmatpush1.bf16.msra.mxu1 %v7517_v32 }
 0x395   :  { %5642 = vmatprep.subr.bf16.mxu0 %v7522_v36  ;;  %5806 = vmatprep.subr.bf16.mxu1 %v7525_v25 }
 0x398   :  { %5643 = vmatpush1.bf16.msra.mxu0 %v7520_v19  ;;  %5807 = vmatpush1.bf16.msra.mxu1 %v7523_v53 }
 0x399   :  { %5644 = vmatprep.subr.bf16.mxu0 %v7528_v40  ;;  %5808 = vmatprep.subr.bf16.mxu1 %v7531_v41  ;;  %v6965_v41 = vld [vmem:[#allocation13] ss:$0 sm:$0xff] }
 0x39c   :  { %5645 = vmatpush1.bf16.msra.mxu0 %v7526_v42  ;;  %5809 = vmatpush1.bf16.msra.mxu1 %v7529_v9 }
 0x39d   :  { %6998 = vmatprep.subr.bf16.mxu0 %v7532_v43  ;;  %7020 = vmatprep.subr.bf16.mxu1 %v7533_v44 }
 0x39f   :  { %5647 = vmatmul.mubr.bf16.vlgmr.msra.gmra.mrb[8].mxu0 %v3931_v47  ;;  %5811 = vmatmul.mubr.bf16.vlgmr.msra.gmra.mrb[8].mxu1 %v3931_v47 }
 0x3a0   :  { %6999 = vmatpush3.bf16.msra.mxu0 %v7534_v46  ;;  %7021 = vmatpush3.bf16.msra.mxu1 %v7535_v34 }
 0x3a1   :  { %7000 = vmatprep.subr.bf16.mxu0 %v7536_v20  ;;  %7022 = vmatprep.subr.bf16.mxu1 %v7537_v24 }
 0x3a4   :  { %7001 = vmatpush3.bf16.msra.mxu0 %v7538_v55  ;;  %7023 = vmatpush3.bf16.msra.mxu1 %v7539_v49 }
 0x3a5   :  { %7002 = vmatprep.subr.bf16.mxu0 %v7540_v4  ;;  %7024 = vmatprep.subr.bf16.mxu1 %v7541_v50 }
 0x3a8   :  { %7003 = vmatpush3.bf16.msra.mxu0 %v7542_v48  ;;  %7025 = vmatpush3.bf16.msra.mxu1 %v7543_v51 }
 0x3a9   :  { %7004 = vmatprep.subr.bf16.mxu0 %v7544_v52  ;;  %7026 = vmatprep.subr.bf16.mxu1 %v7545_v13 }
 0x3ac   :  { %7005 = vmatpush3.bf16.msra.mxu0 %v7546_v54  ;;  %7027 = vmatpush3.bf16.msra.mxu1 %v7547_v56 }
 0x3ad   :  { %7006 = vmatprep.subr.bf16.mxu0 %v7548_v58  ;;  %7028 = vmatprep.subr.bf16.mxu1 %v7549_v59 }
 0x3b0   :  { %7007 = vmatpush3.bf16.msra.mxu0 %v7550_v60  ;;  %7029 = vmatpush3.bf16.msra.mxu1 %v7551_v61 }
 0x3b1   :  { %7008 = vmatprep.subr.bf16.mxu0 %v7552_v62  ;;  %7030 = vmatprep.subr.bf16.mxu1 %v7553_v63 }
 0x3b4   :  { %7009 = vmatpush3.bf16.msra.mxu0 %v7554_v8  ;;  %7031 = vmatpush3.bf16.msra.mxu1 %v7555_v0 }
 0x3b5   :  { %7010 = vmatprep.subr.bf16.mxu0 %v7556_v1  ;;  %7032 = vmatprep.subr.bf16.mxu1 %v7557_v38 }
 0x3b8   :  { %7011 = vmatpush3.bf16.msra.mxu0 %v7558_v3  ;;  %7033 = vmatpush3.bf16.msra.mxu1 %v7559_v5 }
 0x3b9   :  { %7012 = vmatprep.subr.bf16.mxu0 %v7560_v6  ;;  %7034 = vmatprep.subr.bf16.mxu1 %v7561_v7 }
 0x3bc   :  { %7013 = vmatpush3.bf16.msra.mxu0 %v7562_v10  ;;  %7035 = vmatpush3.bf16.msra.mxu1 %v7563_v11 }
 0x472   :  { %v5648_v57 = vpop.f32.mrb[8].mxu0  ;;  %v5812_v23 = vpop.f32.mrb[8].mxu1 }
 0x473   :  { %v7050_v26 = vadd.f32 %v5648_v57, %v4194_v17  ;;  %v7052_v27 = vadd.f32 %v5812_v23, %v4202_v18  ;;  %v5650_v12 = vpop.f32.mrb[9].mxu0  ;;  %v5814_v28 = vpop.f32.mrb[9].mxu1 }
 0x474   :  { %v7051_v29 = vadd.f32 %v5650_v12, %v4198_v21  ;;  %v7053_v30 = vadd.f32 %v5814_v28, %v4206_v22  ;;  %v5652_v32 = vpop.f32.mrb[10].mxu0  ;;  %v5816_v33 = vpop.f32.mrb[10].mxu1 }
 0x475   :  { %v5819_v31 = vmax.f32 %v7050_v26, 0.0  ;;  %v5821_v15 = vmax.f32 %v7052_v27, 0.0  ;;  %v5653_v36 = vpop.f32.mrb[11].mxu0  ;;  %v5817_v45 = vpop.f32.mrb[11].mxu1 }
 0x476   :  { %v5820_v25 = vmax.f32 %v7051_v29, 0.0  ;;  %v5822_v19 = vmax.f32 %v7053_v30, 0.0 }
 0x477   :  { %v5823_v2 = vpack.c.bf16 %v5819_v31, %v5819_v31  ;;  %v5825_v35 = vpack.c.bf16 %v5821_v15, %v5821_v15 }
 0x478   :  { %v5824_v16 = vpack.c.bf16 %v5820_v25, %v5820_v25  ;;  %v5826_v53 = vpack.c.bf16 %v5822_v19, %v5822_v19 }
 0x47a   :  { %6122 = vmatprep.mubr.bf16.mxu0 %v5824_v16  ;;  %6162 = vmatprep.mubr.bf16.mxu1 %v5826_v53 }
 0x47b   :  { %6123 = vmatmul.mubr.bf16.vlgmr.msra.gmra.mrb[12].mxu0 %v5823_v2  ;;  %6163 = vmatmul.mubr.bf16.vlgmr.msra.gmra.mrb[12].mxu1 %v5825_v35 }
 0x54e   :  { %v7014_v37 = vpop.f32.mrb[12].mxu0  ;;  %v7036_v40 = vpop.f32.mrb[12].mxu1 }
 0x54f   :  { %v7015_v42 = vpop.f32.mrb[13].mxu0  ;;  %v7037_v9 = vpop.f32.mrb[13].mxu1 }
 0x550   :  { %v7016_v39 = vadd.f32 %v7015_v42, %v7014_v37  ;;  %v7038_v43 = vadd.f32 %v7037_v9, %v7036_v40  ;;  %v7017_v44 = vpop.f32.mrb[14].mxu0  ;;  %v7039_v46 = vpop.f32.mrb[14].mxu1 }
 0x551   :  { %v7018_v34 = vpop.f32.mrb[15].mxu0  ;;  %v7040_v47 = vpop.f32.mrb[15].mxu1 }
 0x552   :  { %v6125_v20 = vadd.f32 %v7016_v39, %v6965_v41 }
 0x554   :  { %v6165_v24 = vadd.f32 %v7038_v43, %v6125_v20 }
 0x556   :  { %6170 = vst [vmem:[#allocation14] sm:$0xff] %v6165_v24 }
 0x557   :  { %7730 = shalt.err (!%p7727_p4)
}
 0x558   :  { %s7731_s15 = scalar_lea.hbm %s8030_s7, 128 }
 0x559   :  { %p7732_p5 = scmp.ne.s32.totalorder %s8030_s7, %s7731_s15  ;;  %p7735_p6 = scmp.lt.u32.totalorder %s7731_s15, %s8030_s7 }
 0x55b   :  { %p7737_p7 = pnand %p7735_p6, %p7732_p5 }
 0x55d   :  { %7740 = shalt.err (!%p7737_p7)
}
 0x55e   :  { %6180 = dma.vmem_to_hbm [thread:$0]  %s6178_s13, 128, %s8030_s7, [#allocation4]  }
 0x55f   :  { %7749 = dma.done.wait [#allocation4], 128  }
 0x560   :  { %7750 = vsyncadd [#allocation4], 4294967168 }
 0x561   :  { %6184 = vsyncpa [#allocation3], 1 }
 0x562   :  { %6185 = vsyncpa [#allocation6], 1 }
 0x563   :  { %6186 = vsyncpa [#allocation9], 1 }
 0x564   :  { %6187 = vsyncpa [#allocation12], 1 }
 0x565   :  { %6188 = vsyncpa [#allocation4], 1 }

</bundles_post_ra>
